<compile_context>
chip_gen: v6e
topology: v6e:2x2x1
jax: 0.10.0
libtpu: 0.0.40
codegen_flags: <defaults>
</compile_context>

<pallas_src>
import jax
import jax.numpy as jnp
from jax.experimental import pallas as pl
from jax.experimental.pallas import tpu as pltpu


_VMEM_LIMIT = 32 * 1024 * 1024  # explicit scoped-VMEM budget; safe on v5e/v6e/v7x


def _pick_tm(m, cap=256):
    """Largest multiple-of-16 divisor of m <= cap giving >=2 grid steps."""
    if m <= 16:
        return m
    start = min(cap, m // 2)
    start -= start % 16
    for t in range(start, 15, -16):
        if m % t == 0:
            return t
    return m


# ----------------------------- Pallas kernels ------------------------------ #

def _conv_relu_pool_kernel(slab_ref, w_ref, b_ref, o_ref):
    # slab_ref: (4, tm, K) bf16 -- leading axis = the 4 members of each 2x2
    # pool window; rows = pooled output pixels (b, hp, wp); K = patch features.
    s = slab_ref[...]
    four, tm, kdim = s.shape
    # One long-M MXU call instead of 4 short ones (merge is layout-free:
    # tm % 16 == 0, K is the minor dim).
    y = jnp.dot(s.reshape(four * tm, kdim), w_ref[...],
                preferred_element_type=jnp.float32)          # (4*tm, N) f32
    m01 = jnp.maximum(y[0 * tm:1 * tm], y[1 * tm:2 * tm])
    m23 = jnp.maximum(y[2 * tm:3 * tm], y[3 * tm:4 * tm])
    z = jnp.maximum(m01, m23)                                # (tm, N)
    # bias is per-channel and shared by the 4 window members, ReLU monotone:
    # relu(max(.) + b) == maxpool(relu(conv + b)).
    o_ref[...] = jnp.maximum(z + b_ref[...], 0.0).astype(o_ref.dtype)


def conv_relu_pool(slab, w, b):
    """Fused conv(as matmul) + bias + ReLU + 2x2 max-pool.

    slab: (4, M, K) bf16 window-ordered patches, w: (K, N) bf16, b: (1, N) f32.
    Returns (M, N) bf16 pooled activations, rows ordered (b, hp, wp).
    """
    _, M, K = slab.shape
    N = w.shape[1]
    tm = _pick_tm(M)
    return pl.pallas_call(
        _conv_relu_pool_kernel,
        out_shape=jax.ShapeDtypeStruct((M, N), jnp.bfloat16),
        grid=(M // tm,),
        in_specs=[
            pl.BlockSpec((4, tm, K), lambda i: (0, i, 0)),
            pl.BlockSpec((K, N), lambda i: (0, 0)),
            pl.BlockSpec((1, N), lambda i: (0, 0)),
        ],
        out_specs=pl.BlockSpec((tm, N), lambda i: (i, 0)),
        compiler_params=pltpu.CompilerParams(
            dimension_semantics=("parallel",),
            vmem_limit_bytes=_VMEM_LIMIT,
        ),
    )(slab, w, b)


def _conv3_head_kernel(slab_ref, w3_ref, b3_ref, w1_ref, b1_ref,
                       w2_ref, b2_ref, o_ref):
    # conv3 (as matmul) + bias + ReLU + pool, rows ordered (p=hp*2+wp, b).
    w3 = w3_ref[...]
    y0 = jnp.dot(slab_ref[0], w3, preferred_element_type=jnp.float32)
    y1 = jnp.dot(slab_ref[1], w3, preferred_element_type=jnp.float32)
    y2 = jnp.dot(slab_ref[2], w3, preferred_element_type=jnp.float32)
    y3 = jnp.dot(slab_ref[3], w3, preferred_element_type=jnp.float32)
    y = jnp.maximum(jnp.maximum(y0, y1), jnp.maximum(y2, y3))
    y = jnp.maximum(y + b3_ref[...], 0.0)                    # (4*B, 128) f32

    # fc1: the NCHW flatten is folded into w1 (shape (4, 128, H1)); rows of y
    # for pool position p are the contiguous slice [p*B, (p+1)*B).
    bsz = o_ref.shape[0]
    h = jnp.zeros((bsz, w1_ref.shape[2]), jnp.float32)
    for p in range(4):
        yp = y[p * bsz:(p + 1) * bsz, :]                     # (B, 128)
        h = h + jnp.dot(yp, w1_ref[p], preferred_element_type=jnp.float32)
    h = jnp.maximum(h + b1_ref[...], 0.0)

    logits = jnp.dot(h, w2_ref[...], preferred_element_type=jnp.float32) + b2_ref[...]
    m = jnp.max(logits, axis=-1, keepdims=True)
    e = jnp.exp(logits - m)
    s = jnp.sum(e, axis=-1, keepdims=True)
    o_ref[...] = (e / s).astype(o_ref.dtype)                 # exact softmax divide


def conv3_fc_head(slab, w3, b3, w1, b1, w2, b2, batch):
    _, M3, K3 = slab.shape
    N3 = w3.shape[1]
    NOUT = w2.shape[1]
    return pl.pallas_call(
        _conv3_head_kernel,
        out_shape=jax.ShapeDtypeStruct((batch, NOUT), jnp.float32),
        grid=(1,),
        in_specs=[
            pl.BlockSpec((4, M3, K3), lambda i: (0, 0, 0)),
            pl.BlockSpec((K3, N3), lambda i: (0, 0)),
            pl.BlockSpec((1, N3), lambda i: (0, 0)),
            pl.BlockSpec(w1.shape, lambda i: (0, 0, 0)),
            pl.BlockSpec(b1.shape, lambda i: (0, 0)),
            pl.BlockSpec(w2.shape, lambda i: (0, 0)),
            pl.BlockSpec(b2.shape, lambda i: (0, 0)),
        ],
        out_specs=pl.BlockSpec((batch, NOUT), lambda i: (0, 0)),
        compiler_params=pltpu.CompilerParams(vmem_limit_bytes=_VMEM_LIMIT),
    )(slab, w3, b3, w1, b1, w2, b2)


# ------------------------------- JAX glue ---------------------------------- #

def _pooled_im2col(x, k, *, pool_major=False):
    """x: (B, H, W, C) NHWC -> slab (4, M, K), built with ONE strided gather.

    slab[ph*2+pw, m, (kh*k+kw)*C + c] = x[b, 2*hp+ph+kh, 2*wp+pw+kw, c]
      with m = b*Hp*Wp + hp*Wp + wp     (pool_major=False, conv1/conv2)
        or m = (hp*Wp + wp)*B + b       (pool_major=True, conv3 -> FC head).
    """
    B, H, W, C = x.shape
    Ho, Wo = H - k + 1, W - k + 1
    assert Ho % 2 == 0 and Wo % 2 == 0, "odd conv output would drop rows in the 2x2 pool"
    Hp, Wp = Ho // 2, Wo // 2
    K = k * k * C
    members = []
    for ph in range(2):
        for pw in range(2):
            taps = [
                x[:, ph + kh: ph + kh + 2 * (Hp - 1) + 1: 2,
                     pw + kw: pw + kw + 2 * (Wp - 1) + 1: 2, :]
                for kh in range(k) for kw in range(k)
            ]
            m = jnp.concatenate(taps, axis=-1)               # (B, Hp, Wp, K)
            if pool_major:
                m = jnp.transpose(m, (1, 2, 0, 3))           # (Hp, Wp, B, K)
            members.append(m.reshape(B * Hp * Wp, K))
    slab = jnp.stack(members, axis=0)                        # (4, M, K)
    return slab, (B, Hp, Wp)


def init_params(key):
    """Deterministic synthetic init; shapes/orders match the PyTorch module."""
    ks = jax.random.split(key, 10)

    def conv_params(kw_key, kb_key, cout, cin, k=5, scale=0.05):
        w = jax.random.normal(kw_key, (cout, cin, k, k), jnp.float32) * scale
        b = jax.random.normal(kb_key, (cout,), jnp.float32) * 0.01
        # (Cout,Cin,KH,KW) -> (KH,KW,Cin,Cout) -> (K, Cout), bf16 for the MXU.
        w_mat = jnp.transpose(w, (2, 3, 1, 0)).reshape(k * k * cin, cout)
        return w_mat.astype(jnp.bfloat16), b.reshape(1, cout)

    def fc1_params(kw_key, kb_key, c=128, hw=4, dout=32, scale=0.05):
        # PyTorch fc1: (dout, c*h*w), flatten order (c, h, w) from the NCHW view.
        w = jax.random.normal(kw_key, (dout, c * hw), jnp.float32) * scale
        b = jax.random.normal(kb_key, (dout,), jnp.float32) * 0.01
        # Fold the flatten into the weight: block by pool position p = h*2+w so
        # the fused kernel does 4 contiguous (B,128)x(128,dout) dots.
        w_mat = jnp.transpose(w).reshape(c, hw, dout).transpose(1, 0, 2)  # (4, c, dout)
        return w_mat, b.reshape(1, dout)

    def fc2_params(kw_key, kb_key, din=32, dout=2, scale=0.05):
        w = jax.random.normal(kw_key, (dout, din), jnp.float32) * scale
        b = jax.random.normal(kb_key, (dout,), jnp.float32) * 0.01
        return jnp.transpose(w), b.reshape(1, dout)

    return {
        "conv1": conv_params(ks[0], ks[1], 32, 1),
        "conv2": conv_params(ks[2], ks[3], 64, 32),
        "conv3": conv_params(ks[4], ks[5], 128, 64),
        "fc1": fc1_params(ks[6], ks[7]),
        "fc2": fc2_params(ks[8], ks[9]),
    }


@jax.jit
def net_forward(x_nchw, params):
    # x_nchw: (B, 1, 44, 44) float32 (PyTorch NCHW layout)
    x = jnp.transpose(x_nchw, (0, 2, 3, 1)).astype(jnp.bfloat16)   # NHWC bf16
    for name in ("conv1", "conv2"):
        w, b = params[name]
        slab, (B, Hp, Wp) = _pooled_im2col(x, 5)
        y = conv_relu_pool(slab, w, b)            # fused conv+bias+ReLU+pool
        x = y.reshape(B, Hp, Wp, -1)              # NHWC, rows already (b,hp,wp)
    w3, b3 = params["conv3"]
    slab3, (B, _, _) = _pooled_im2col(x, 5, pool_major=True)
    w1, b1 = params["fc1"]
    w2, b2 = params["fc2"]
    # conv3 + pool + fc1 + ReLU + fc2 + softmax in one kernel.
    return conv3_fc_head(slab3, w3, b3, w1, b1, w2, b2, B)


if __name__ == "__main__":
    key = jax.random.PRNGKey(0)
    k_param, k_x = jax.random.split(key)
    params = init_params(k_param)
    x = jax.random.normal(k_x, (2, 1, 44, 44), jnp.float32)  # batch=2, 1-channel 44x44

    probs = jax.block_until_ready(net_forward(x, params))

    assert probs.shape == (2, 2)
    assert bool(jnp.all(jnp.isfinite(probs)))
    # softmax normalization is an exact f32 divide now.
    assert bool(jnp.allclose(jnp.sum(probs, axis=1), 1.0, atol=1e-3))
    print("KERNEL_OK")
</pallas_src>

<mosaic_0001>
module attributes {stable_mosaic.version = 11 : i64} {
  func.func @_conv_relu_pool_kernel(%arg0: i32, %arg1: memref<4x160x25xbf16, #tpu.memory_space<vmem>>, %arg2: memref<25x32xbf16, #tpu.memory_space<vmem>>, %arg3: memref<1x32xf32, #tpu.memory_space<vmem>>, %arg4: memref<160x32xbf16, #tpu.memory_space<vmem>>) attributes {dimension_semantics = [#tpu.dimension_semantics<parallel>], iteration_bounds = array<i64: 5>, scalar_prefetch = 0 : i64, scratch_operands = 0 : i64, tpu.core_type = #tpu.core_type<tc>, window_params = [{transform_indices = @transform_0, window_bounds = array<i64: 4, 160, 25>}, {pipeline_mode = #tpu.pipeline_mode<synchronous>, transform_indices = @transform_1, window_bounds = array<i64: 25, 32>}, {pipeline_mode = #tpu.pipeline_mode<synchronous>, transform_indices = @transform_2, window_bounds = array<i64: 1, 32>}, {transform_indices = @transform_3, window_bounds = array<i64: 160, 32>}]} {
    %c0 = arith.constant 0 : index
    %c0_0 = arith.constant 0 : index
    %c0_1 = arith.constant 0 : index
    %0 = vector.load %arg1[%c0, %c0_0, %c0_1] : memref<4x160x25xbf16, #tpu.memory_space<vmem>>, vector<4x160x25xbf16>
    %1 = vector.shape_cast %0 : vector<4x160x25xbf16> to vector<640x25xbf16>
    %c0_2 = arith.constant 0 : index
    %c0_3 = arith.constant 0 : index
    %2 = vector.load %arg2[%c0_2, %c0_3] : memref<25x32xbf16, #tpu.memory_space<vmem>>, vector<25x32xbf16>
    %cst = arith.constant dense<0.000000e+00> : vector<640x32xf32>
    %3 = tpu.matmul %1, %2, %cst {dimension_numbers = #tpu.dot_dimension_numbers<[1], [0], [0], [1], [0, 0, 1, 1], [], []>} : vector<640x25xbf16>, vector<25x32xbf16>, vector<640x32xf32> -> vector<640x32xf32>
    %4 = vector.extract_strided_slice %3 {offsets = [0, 0], sizes = [160, 32], strides = [1, 1]} : vector<640x32xf32> to vector<160x32xf32>
    %5 = vector.extract_strided_slice %3 {offsets = [160, 0], sizes = [160, 32], strides = [1, 1]} : vector<640x32xf32> to vector<160x32xf32>
    %6 = arith.maximumf %4, %5 : vector<160x32xf32>
    %7 = vector.extract_strided_slice %3 {offsets = [320, 0], sizes = [160, 32], strides = [1, 1]} : vector<640x32xf32> to vector<160x32xf32>
    %8 = vector.extract_strided_slice %3 {offsets = [480, 0], sizes = [160, 32], strides = [1, 1]} : vector<640x32xf32> to vector<160x32xf32>
    %9 = arith.maximumf %7, %8 : vector<160x32xf32>
    %10 = arith.maximumf %6, %9 : vector<160x32xf32>
    %c0_4 = arith.constant 0 : index
    %c0_5 = arith.constant 0 : index
    %11 = vector.load %arg3[%c0_4, %c0_5] : memref<1x32xf32, #tpu.memory_space<vmem>>, vector<1x32xf32>
    %12 = vector.broadcast %11 : vector<1x32xf32> to vector<160x32xf32>
    %13 = arith.addf %10, %12 : vector<160x32xf32>
    %cst_6 = arith.constant 0.000000e+00 : f32
    %14 = vector.broadcast %cst_6 : f32 to vector<160x32xf32>
    %15 = arith.maximumf %13, %14 : vector<160x32xf32>
    %16 = arith.truncf %15 : vector<160x32xf32> to vector<160x32xbf16>
    %c0_7 = arith.constant 0 : index
    %c0_8 = arith.constant 0 : index
    %17 = vector.load %arg4[%c0_7, %c0_8] : memref<160x32xbf16, #tpu.memory_space<vmem>>, vector<160x32xbf16>
    tpu.vector_store %arg4[%c0_7, %c0_8], %16 {strides = array<i32>} : memref<160x32xbf16, #tpu.memory_space<vmem>>, vector<160x32xbf16>,
    return
  }
  func.func @transform_0(%arg0: i32) -> (i32, i32, i32) {
    %c0_i32 = arith.constant 0 : i32
    %c0_i32_0 = arith.constant 0 : i32
    %c0_i32_1 = arith.constant 0 : i32
    return %c0_i32, %arg0, %c0_i32_0 : i32, i32, i32
  }
  func.func @transform_1(%arg0: i32) -> (i32, i32) {
    %c0_i32 = arith.constant 0 : i32
    %c0_i32_0 = arith.constant 0 : i32
    %c0_i32_1 = arith.constant 0 : i32
    return %c0_i32, %c0_i32_0 : i32, i32
  }
  func.func @transform_2(%arg0: i32) -> (i32, i32) {
    %c0_i32 = arith.constant 0 : i32
    %c0_i32_0 = arith.constant 0 : i32
    %c0_i32_1 = arith.constant 0 : i32
    return %c0_i32, %c0_i32_0 : i32, i32
  }
  func.func @transform_3(%arg0: i32) -> (i32, i32) {
    %c0_i32 = arith.constant 0 : i32
    %c0_i32_0 = arith.constant 0 : i32
    return %arg0, %c0_i32 : i32, i32
  }
}

module attributes {stable_mosaic.version = 11 : i64} {
  func.func @_conv_relu_pool_kernel(%arg0: i32, %arg1: memref<4x64x800xbf16, #tpu.memory_space<vmem>>, %arg2: memref<800x64xbf16, #tpu.memory_space<vmem>>, %arg3: memref<1x64xf32, #tpu.memory_space<vmem>>, %arg4: memref<64x64xbf16, #tpu.memory_space<vmem>>) attributes {dimension_semantics = [#tpu.dimension_semantics<parallel>], iteration_bounds = array<i64: 2>, scalar_prefetch = 0 : i64, scratch_operands = 0 : i64, tpu.core_type = #tpu.core_type<tc>, window_params = [{transform_indices = @transform_0, window_bounds = array<i64: 4, 64, 800>}, {pipeline_mode = #tpu.pipeline_mode<synchronous>, transform_indices = @transform_1, window_bounds = array<i64: 800, 64>}, {pipeline_mode = #tpu.pipeline_mode<synchronous>, transform_indices = @transform_2, window_bounds = array<i64: 1, 64>}, {transform_indices = @transform_3, window_bounds = array<i64: 64, 64>}]} {
    %c0 = arith.constant 0 : index
    %c0_0 = arith.constant 0 : index
    %c0_1 = arith.constant 0 : index
    %0 = vector.load %arg1[%c0, %c0_0, %c0_1] : memref<4x64x800xbf16, #tpu.memory_space<vmem>>, vector<4x64x800xbf16>
    %1 = vector.shape_cast %0 : vector<4x64x800xbf16> to vector<256x800xbf16>
    %c0_2 = arith.constant 0 : index
    %c0_3 = arith.constant 0 : index
    %2 = vector.load %arg2[%c0_2, %c0_3] : memref<800x64xbf16, #tpu.memory_space<vmem>>, vector<800x64xbf16>
    %cst = arith.constant dense<0.000000e+00> : vector<256x64xf32>
    %3 = tpu.matmul %1, %2, %cst {dimension_numbers = #tpu.dot_dimension_numbers<[1], [0], [0], [1], [0, 0, 1, 1], [], []>} : vector<256x800xbf16>, vector<800x64xbf16>, vector<256x64xf32> -> vector<256x64xf32>
    %4 = vector.extract_strided_slice %3 {offsets = [0, 0], sizes = [64, 64], strides = [1, 1]} : vector<256x64xf32> to vector<64x64xf32>
    %5 = vector.extract_strided_slice %3 {offsets = [64, 0], sizes = [64, 64], strides = [1, 1]} : vector<256x64xf32> to vector<64x64xf32>
    %6 = arith.maximumf %4, %5 : vector<64x64xf32>
    %7 = vector.extract_strided_slice %3 {offsets = [128, 0], sizes = [64, 64], strides = [1, 1]} : vector<256x64xf32> to vector<64x64xf32>
    %8 = vector.extract_strided_slice %3 {offsets = [192, 0], sizes = [64, 64], strides = [1, 1]} : vector<256x64xf32> to vector<64x64xf32>
    %9 = arith.maximumf %7, %8 : vector<64x64xf32>
    %10 = arith.maximumf %6, %9 : vector<64x64xf32>
    %c0_4 = arith.constant 0 : index
    %c0_5 = arith.constant 0 : index
    %11 = vector.load %arg3[%c0_4, %c0_5] : memref<1x64xf32, #tpu.memory_space<vmem>>, vector<1x64xf32>
    %12 = vector.broadcast %11 : vector<1x64xf32> to vector<64x64xf32>
    %13 = arith.addf %10, %12 : vector<64x64xf32>
    %cst_6 = arith.constant 0.000000e+00 : f32
    %14 = vector.broadcast %cst_6 : f32 to vector<64x64xf32>
    %15 = arith.maximumf %13, %14 : vector<64x64xf32>
    %16 = arith.truncf %15 : vector<64x64xf32> to vector<64x64xbf16>
    %c0_7 = arith.constant 0 : index
    %c0_8 = arith.constant 0 : index
    %17 = vector.load %arg4[%c0_7, %c0_8] : memref<64x64xbf16, #tpu.memory_space<vmem>>, vector<64x64xbf16>
    tpu.vector_store %arg4[%c0_7, %c0_8], %16 {strides = array<i32>} : memref<64x64xbf16, #tpu.memory_space<vmem>>, vector<64x64xbf16>,
    return
  }
  func.func @transform_0(%arg0: i32) -> (i32, i32, i32) {
    %c0_i32 = arith.constant 0 : i32
    %c0_i32_0 = arith.constant 0 : i32
    %c0_i32_1 = arith.constant 0 : i32
    return %c0_i32, %arg0, %c0_i32_0 : i32, i32, i32
  }
  func.func @transform_1(%arg0: i32) -> (i32, i32) {
    %c0_i32 = arith.constant 0 : i32
    %c0_i32_0 = arith.constant 0 : i32
    %c0_i32_1 = arith.constant 0 : i32
    return %c0_i32, %c0_i32_0 : i32, i32
  }
  func.func @transform_2(%arg0: i32) -> (i32, i32) {
    %c0_i32 = arith.constant 0 : i32
    %c0_i32_0 = arith.constant 0 : i32
    %c0_i32_1 = arith.constant 0 : i32
    return %c0_i32, %c0_i32_0 : i32, i32
  }
  func.func @transform_3(%arg0: i32) -> (i32, i32) {
    %c0_i32 = arith.constant 0 : i32
    %c0_i32_0 = arith.constant 0 : i32
    return %arg0, %c0_i32 : i32, i32
  }
}

module attributes {stable_mosaic.version = 11 : i64} {
  func.func @_conv3_head_kernel(%arg0: i32, %arg1: memref<4x8x1600xbf16, #tpu.memory_space<vmem>>, %arg2: memref<1600x128xbf16, #tpu.memory_space<vmem>>, %arg3: memref<1x128xf32, #tpu.memory_space<vmem>>, %arg4: memref<4x128x32xf32, #tpu.memory_space<vmem>>, %arg5: memref<1x32xf32, #tpu.memory_space<vmem>>, %arg6: memref<32x2xf32, #tpu.memory_space<vmem>>, %arg7: memref<1x2xf32, #tpu.memory_space<vmem>>, %arg8: memref<2x2xf32, #tpu.memory_space<vmem>>) attributes {dimension_semantics = [#tpu.dimension_semantics<arbitrary>], iteration_bounds = array<i64: 1>, scalar_prefetch = 0 : i64, scratch_operands = 0 : i64, tpu.core_type = #tpu.core_type<tc>, window_params = [{pipeline_mode = #tpu.pipeline_mode<synchronous>, transform_indices = @transform_0, window_bounds = array<i64: 4, 8, 1600>}, {pipeline_mode = #tpu.pipeline_mode<synchronous>, transform_indices = @transform_1, window_bounds = array<i64: 1600, 128>}, {pipeline_mode = #tpu.pipeline_mode<synchronous>, transform_indices = @transform_2, window_bounds = array<i64: 1, 128>}, {pipeline_mode = #tpu.pipeline_mode<synchronous>, transform_indices = @transform_3, window_bounds = array<i64: 4, 128, 32>}, {pipeline_mode = #tpu.pipeline_mode<synchronous>, transform_indices = @transform_4, window_bounds = array<i64: 1, 32>}, {pipeline_mode = #tpu.pipeline_mode<synchronous>, transform_indices = @transform_5, window_bounds = array<i64: 32, 2>}, {pipeline_mode = #tpu.pipeline_mode<synchronous>, transform_indices = @transform_6, window_bounds = array<i64: 1, 2>}, {pipeline_mode = #tpu.pipeline_mode<synchronous>, transform_indices = @transform_7, window_bounds = array<i64: 2, 2>}]} {
    %c0 = arith.constant 0 : index
    %c0_0 = arith.constant 0 : index
    %0 = vector.load %arg2[%c0, %c0_0] : memref<1600x128xbf16, #tpu.memory_space<vmem>>, vector<1600x128xbf16>
    %c0_1 = arith.constant 0 : index
    %c0_2 = arith.constant 0 : index
    %c0_3 = arith.constant 0 : index
    %1 = vector.load %arg1[%c0_1, %c0_2, %c0_3] : memref<4x8x1600xbf16, #tpu.memory_space<vmem>>, vector<1x8x1600xbf16>
    %2 = vector.shape_cast %1 : vector<1x8x1600xbf16> to vector<8x1600xbf16>
    %cst = arith.constant dense<0.000000e+00> : vector<8x128xf32>
    %3 = tpu.matmul %2, %0, %cst {dimension_numbers = #tpu.dot_dimension_numbers<[1], [0], [0], [1], [0, 0, 1, 1], [], []>} : vector<8x1600xbf16>, vector<1600x128xbf16>, vector<8x128xf32> -> vector<8x128xf32>
    %c1 = arith.constant 1 : index
    %c0_4 = arith.constant 0 : index
    %c0_5 = arith.constant 0 : index
    %4 = vector.load %arg1[%c1, %c0_4, %c0_5] : memref<4x8x1600xbf16, #tpu.memory_space<vmem>>, vector<1x8x1600xbf16>
    %5 = vector.shape_cast %4 : vector<1x8x1600xbf16> to vector<8x1600xbf16>
    %cst_6 = arith.constant dense<0.000000e+00> : vector<8x128xf32>
    %6 = tpu.matmul %5, %0, %cst_6 {dimension_numbers = #tpu.dot_dimension_numbers<[1], [0], [0], [1], [0, 0, 1, 1], [], []>} : vector<8x1600xbf16>, vector<1600x128xbf16>, vector<8x128xf32> -> vector<8x128xf32>
    %c2 = arith.constant 2 : index
    %c0_7 = arith.constant 0 : index
    %c0_8 = arith.constant 0 : index
    %7 = vector.load %arg1[%c2, %c0_7, %c0_8] : memref<4x8x1600xbf16, #tpu.memory_space<vmem>>, vector<1x8x1600xbf16>
    %8 = vector.shape_cast %7 : vector<1x8x1600xbf16> to vector<8x1600xbf16>
    %cst_9 = arith.constant dense<0.000000e+00> : vector<8x128xf32>
    %9 = tpu.matmul %8, %0, %cst_9 {dimension_numbers = #tpu.dot_dimension_numbers<[1], [0], [0], [1], [0, 0, 1, 1], [], []>} : vector<8x1600xbf16>, vector<1600x128xbf16>, vector<8x128xf32> -> vector<8x128xf32>
    %c3 = arith.constant 3 : index
    %c0_10 = arith.constant 0 : index
    %c0_11 = arith.constant 0 : index
    %10 = vector.load %arg1[%c3, %c0_10, %c0_11] : memref<4x8x1600xbf16, #tpu.memory_space<vmem>>, vector<1x8x1600xbf16>
    %11 = vector.shape_cast %10 : vector<1x8x1600xbf16> to vector<8x1600xbf16>
    %cst_12 = arith.constant dense<0.000000e+00> : vector<8x128xf32>
    %12 = tpu.matmul %11, %0, %cst_12 {dimension_numbers = #tpu.dot_dimension_numbers<[1], [0], [0], [1], [0, 0, 1, 1], [], []>} : vector<8x1600xbf16>, vector<1600x128xbf16>, vector<8x128xf32> -> vector<8x128xf32>
    %13 = arith.maximumf %3, %6 : vector<8x128xf32>
    %14 = arith.maximumf %9, %12 : vector<8x128xf32>
    %15 = arith.maximumf %13, %14 : vector<8x128xf32>
    %c0_13 = arith.constant 0 : index
    %c0_14 = arith.constant 0 : index
    %16 = vector.load %arg3[%c0_13, %c0_14] : memref<1x128xf32, #tpu.memory_space<vmem>>, vector<1x128xf32>
    %17 = vector.broadcast %16 : vector<1x128xf32> to vector<8x128xf32>
    %18 = arith.addf %15, %17 : vector<8x128xf32>
    %cst_15 = arith.constant 0.000000e+00 : f32
    %19 = vector.broadcast %cst_15 : f32 to vector<8x128xf32>
    %20 = arith.maximumf %18, %19 : vector<8x128xf32>
    %cst_16 = arith.constant 0.000000e+00 : f32
    %21 = vector.broadcast %cst_16 : f32 to vector<2x32xf32>
    %22 = vector.extract_strided_slice %20 {offsets = [0, 0], sizes = [2, 128], strides = [1, 1]} : vector<8x128xf32> to vector<2x128xf32>
    %c0_17 = arith.constant 0 : index
    %c0_18 = arith.constant 0 : index
    %c0_19 = arith.constant 0 : index
    %23 = vector.load %arg4[%c0_17, %c0_18, %c0_19] : memref<4x128x32xf32, #tpu.memory_space<vmem>>, vector<1x128x32xf32>
    %24 = vector.shape_cast %23 : vector<1x128x32xf32> to vector<128x32xf32>
    %cst_20 = arith.constant dense<0.000000e+00> : vector<2x32xf32>
    %25 = tpu.matmul %22, %24, %cst_20 {dimension_numbers = #tpu.dot_dimension_numbers<[1], [0], [0], [1], [0, 0, 1, 1], [], []>} : vector<2x128xf32>, vector<128x32xf32>, vector<2x32xf32> -> vector<2x32xf32>
    %26 = arith.addf %21, %25 : vector<2x32xf32>
    %27 = vector.extract_strided_slice %20 {offsets = [2, 0], sizes = [2, 128], strides = [1, 1]} : vector<8x128xf32> to vector<2x128xf32>
    %c1_21 = arith.constant 1 : index
    %c0_22 = arith.constant 0 : index
    %c0_23 = arith.constant 0 : index
    %28 = vector.load %arg4[%c1_21, %c0_22, %c0_23] : memref<4x128x32xf32, #tpu.memory_space<vmem>>, vector<1x128x32xf32>
    %29 = vector.shape_cast %28 : vector<1x128x32xf32> to vector<128x32xf32>
    %cst_24 = arith.constant dense<0.000000e+00> : vector<2x32xf32>
    %30 = tpu.matmul %27, %29, %cst_24 {dimension_numbers = #tpu.dot_dimension_numbers<[1], [0], [0], [1], [0, 0, 1, 1], [], []>} : vector<2x128xf32>, vector<128x32xf32>, vector<2x32xf32> -> vector<2x32xf32>
    %31 = arith.addf %26, %30 : vector<2x32xf32>
    %32 = vector.extract_strided_slice %20 {offsets = [4, 0], sizes = [2, 128], strides = [1, 1]} : vector<8x128xf32> to vector<2x128xf32>
    %c2_25 = arith.constant 2 : index
    %c0_26 = arith.constant 0 : index
    %c0_27 = arith.constant 0 : index
    %33 = vector.load %arg4[%c2_25, %c0_26, %c0_27] : memref<4x128x32xf32, #tpu.memory_space<vmem>>, vector<1x128x32xf32>
    %34 = vector.shape_cast %33 : vector<1x128x32xf32> to vector<128x32xf32>
    %cst_28 = arith.constant dense<0.000000e+00> : vector<2x32xf32>
    %35 = tpu.matmul %32, %34, %cst_28 {dimension_numbers = #tpu.dot_dimension_numbers<[1], [0], [0], [1], [0, 0, 1, 1], [], []>} : vector<2x128xf32>, vector<128x32xf32>, vector<2x32xf32> -> vector<2x32xf32>
    %36 = arith.addf %31, %35 : vector<2x32xf32>
    %37 = vector.extract_strided_slice %20 {offsets = [6, 0], sizes = [2, 128], strides = [1, 1]} : vector<8x128xf32> to vector<2x128xf32>
    %c3_29 = arith.constant 3 : index
    %c0_30 = arith.constant 0 : index
    %c0_31 = arith.constant 0 : index
    %38 = vector.load %arg4[%c3_29, %c0_30, %c0_31] : memref<4x128x32xf32, #tpu.memory_space<vmem>>, vector<1x128x32xf32>
    %39 = vector.shape_cast %38 : vector<1x128x32xf32> to vector<128x32xf32>
    %cst_32 = arith.constant dense<0.000000e+00> : vector<2x32xf32>
    %40 = tpu.matmul %37, %39, %cst_32 {dimension_numbers = #tpu.dot_dimension_numbers<[1], [0], [0], [1], [0, 0, 1, 1], [], []>} : vector<2x128xf32>, vector<128x32xf32>, vector<2x32xf32> -> vector<2x32xf32>
    %41 = arith.addf %36, %40 : vector<2x32xf32>
    %c0_33 = arith.constant 0 : index
    %c0_34 = arith.constant 0 : index
    %42 = vector.load %arg5[%c0_33, %c0_34] : memref<1x32xf32, #tpu.memory_space<vmem>>, vector<1x32xf32>
    %43 = vector.broadcast %42 : vector<1x32xf32> to vector<2x32xf32>
    %44 = arith.addf %41, %43 : vector<2x32xf32>
    %cst_35 = arith.constant 0.000000e+00 : f32
    %45 = vector.broadcast %cst_35 : f32 to vector<2x32xf32>
    %46 = arith.maximumf %44, %45 : vector<2x32xf32>
    %c0_36 = arith.constant 0 : index
    %c0_37 = arith.constant 0 : index
    %47 = vector.load %arg6[%c0_36, %c0_37] : memref<32x2xf32, #tpu.memory_space<vmem>>, vector<32x2xf32>
    %cst_38 = arith.constant dense<0.000000e+00> : vector<2x2xf32>
    %48 = tpu.matmul %46, %47, %cst_38 {dimension_numbers = #tpu.dot_dimension_numbers<[1], [0], [0], [1], [0, 0, 1, 1], [], []>} : vector<2x32xf32>, vector<32x2xf32>, vector<2x2xf32> -> vector<2x2xf32>
    %c0_39 = arith.constant 0 : index
    %c0_40 = arith.constant 0 : index
    %49 = vector.load %arg7[%c0_39, %c0_40] : memref<1x2xf32, #tpu.memory_space<vmem>>, vector<1x2xf32>
    %50 = vector.broadcast %49 : vector<1x2xf32> to vector<2x2xf32>
    %51 = arith.addf %48, %50 : vector<2x2xf32>
    %cst_41 = arith.constant dense<0xFF800000> : vector<2xf32>
    %52 = vector.multi_reduction <maximumf>, %51, %cst_41 [1] : vector<2x2xf32> to vector<2xf32>
    %53 = vector.shape_cast %52 : vector<2xf32> to vector<2x1xf32>
    %54 = vector.broadcast %53 : vector<2x1xf32> to vector<2x2xf32>
    %55 = arith.subf %51, %54 : vector<2x2xf32>
    %56 = math.exp %55 : vector<2x2xf32>
    %cst_42 = arith.constant dense<0.000000e+00> : vector<2xf32>
    %57 = vector.multi_reduction <add>, %56, %cst_42 [1] : vector<2x2xf32> to vector<2xf32>
    %58 = vector.shape_cast %57 : vector<2xf32> to vector<2x1xf32>
    %59 = vector.broadcast %58 : vector<2x1xf32> to vector<2x2xf32>
    %60 = arith.divf %56, %59 : vector<2x2xf32>
    %c0_43 = arith.constant 0 : index
    %c0_44 = arith.constant 0 : index
    %61 = vector.load %arg8[%c0_43, %c0_44] : memref<2x2xf32, #tpu.memory_space<vmem>>, vector<2x2xf32>
    tpu.vector_store %arg8[%c0_43, %c0_44], %60 {strides = array<i32>} : memref<2x2xf32, #tpu.memory_space<vmem>>, vector<2x2xf32>,
    return
  }
  func.func @transform_0(%arg0: i32) -> (i32, i32, i32) {
    %c0_i32 = arith.constant 0 : i32
    %c0_i32_0 = arith.constant 0 : i32
    %c0_i32_1 = arith.constant 0 : i32
    %c0_i32_2 = arith.constant 0 : i32
    return %c0_i32, %c0_i32_0, %c0_i32_1 : i32, i32, i32
  }
  func.func @transform_1(%arg0: i32) -> (i32, i32) {
    %c0_i32 = arith.constant 0 : i32
    %c0_i32_0 = arith.constant 0 : i32
    %c0_i32_1 = arith.constant 0 : i32
    return %c0_i32, %c0_i32_0 : i32, i32
  }
  func.func @transform_2(%arg0: i32) -> (i32, i32) {
    %c0_i32 = arith.constant 0 : i32
    %c0_i32_0 = arith.constant 0 : i32
    %c0_i32_1 = arith.constant 0 : i32
    return %c0_i32, %c0_i32_0 : i32, i32
  }
  func.func @transform_3(%arg0: i32) -> (i32, i32, i32) {
    %c0_i32 = arith.constant 0 : i32
    %c0_i32_0 = arith.constant 0 : i32
    %c0_i32_1 = arith.constant 0 : i32
    %c0_i32_2 = arith.constant 0 : i32
    return %c0_i32, %c0_i32_0, %c0_i32_1 : i32, i32, i32
  }
  func.func @transform_4(%arg0: i32) -> (i32, i32) {
    %c0_i32 = arith.constant 0 : i32
    %c0_i32_0 = arith.constant 0 : i32
    %c0_i32_1 = arith.constant 0 : i32
    return %c0_i32, %c0_i32_0 : i32, i32
  }
  func.func @transform_5(%arg0: i32) -> (i32, i32) {
    %c0_i32 = arith.constant 0 : i32
    %c0_i32_0 = arith.constant 0 : i32
    %c0_i32_1 = arith.constant 0 : i32
    return %c0_i32, %c0_i32_0 : i32, i32
  }
  func.func @transform_6(%arg0: i32) -> (i32, i32) {
    %c0_i32 = arith.constant 0 : i32
    %c0_i32_0 = arith.constant 0 : i32
    %c0_i32_1 = arith.constant 0 : i32
    return %c0_i32, %c0_i32_0 : i32, i32
  }
  func.func @transform_7(%arg0: i32) -> (i32, i32) {
    %c0_i32 = arith.constant 0 : i32
    %c0_i32_0 = arith.constant 0 : i32
    %c0_i32_1 = arith.constant 0 : i32
    return %c0_i32, %c0_i32_0 : i32, i32
  }
}

</mosaic_0001>

<bundles_post_ra>
// kernel: net_forward.3
= control target key start
LH: loop header
LB: loop body
LE: loop exit
PB: predicated region body
PF: predicated region fallthrough
CT: control target
= control target key end

     0   :  { %s1957_s12 = smov 0   ;;  %s1959_s13 = smov 0   ;;  %s2350_s0 = inlined_call_operand.vmem [shape: bf16[4,800,25], index: 0, kind: input, shape index: {}]   ;;  %s2351_s1 = inlined_call_operand.vmem [shape: bf16[25,32], index: 1, kind: input, shape index: {}]   ;;  %s2352_s2 = inlined_call_operand.vmem [shape: f32[1,32], index: 2, kind: input, shape index: {}]   ;;  %s2353_s3 = inlined_call_operand.vmem [shape: bf16[800,32], index: 3, kind: output, shape index: {}]  }
   0x1   :  { %s1961_s14 = smov 0  }
   0x2 LB: > { %s1580_s15 = sadd.s32 4294967295, %s1934_s14   ;;  %s1974_s16 = sadd.s32 1, %s1934_s14   ;;  %s1934_s14 = sphi %s1961_s14, %s2356_s14   ;;  %s1930_s13 = sphi %s1959_s13, %s2355_s13   ;;  %s1926_s12 = sphi %s1957_s12, %s2354_s12  }
   0x3   : > { %s17_s17 = ssub.s32 %s1934_s14, %s1974_s16  ;;  %s20_s18 = sadd.s32 1, %s1930_s13 }
   0x4   : > { %p18_p0 = scmp.eq.s32.totalorder %s17_s17, 0  ;;  %p27_p1 = scmp.ne.s32.totalorder %s1930_s13, %s1926_s12 }
   0x5   : > { %p28_p2 = scmp.eq.s32.totalorder %s1934_s14, 0  ;;  %p1583_p4 = scmp.ge.s32.totalorder %s1934_s14, 5 }
   0x6   : > { %s1983_s19 = scalar_select %p18_p0, %s1930_s13, %s20_s18  }
   0x7   : > { %p29_p3 = por %p28_p2, %p27_p1  ;;  %127 = sbr.rel (%p1583_p4) target bundleno = 37 (0x25), region = 24 }
   0xc   : > { %130 = sbr.rel (!%p29_p3) target bundleno = 37 (0x25), region = 28  ;;  %s132_s20 = sand.u32 (%p29_p3), 1, %s1930_s13  }
   0xd   : > { %s1692_s21 = smul.u32 (%p29_p3), 80, %s1934_s14 }
   0xe   : > { %s1843_s22 = smul.u32 (%p29_p3), 320, %s132_s20 }
   0xf   : > { %s1991_s25 = scalar_lea.vmem (%p29_p3), %s2350_s0, %s1692_s21 }
  0x10   : > { %v154_v0 = vld [vmem:[%s1991_s25] sm:$0xff] (%p29_p3)   ;;  %v158_v1 = vld [vmem:[%s1991_s25 + $0x8] sm:$0xff] (%p29_p3)   ;;  %v162_v2 = vld [vmem:[%s1991_s25 + $0x10] sm:$0xff] (%p29_p3)   ;;  %s1996_s26 = scalar_lea.vmem (%p29_p3), [#allocation2], %s1843_s22 }
  0x11   : > { %155 = vst [vmem:[%s1996_s26] sm:$0xff] %v154_v0   ;;  %159 = vst [vmem:[%s1996_s26 + $0x8] sm:$0xff] %v158_v1   ;;  %v166_v3 = vld [vmem:[%s1991_s25 + $0x18] sm:$0xff]   ;;  %v170_v4 = vld [vmem:[%s1991_s25 + $0x20] sm:$0xff]  }
  0x12   : > { %163 = vst [vmem:[%s1996_s26 + $0x10] sm:$0xff] %v162_v2   ;;  %v174_v5 = vld [vmem:[%s1991_s25 + $0x28] sm:$0xff]   ;;  %167 = vst [vmem:[%s1996_s26 + $0x18] sm:$0xff] %v166_v3   ;;  %v178_v6 = vld [vmem:[%s1991_s25 + $0x30] sm:$0xff]  }
  0x13   : > { %171 = vst [vmem:[%s1996_s26 + $0x20] sm:$0xff] %v170_v4   ;;  %175 = vst [vmem:[%s1996_s26 + $0x28] sm:$0xff] %v174_v5   ;;  %v182_v7 = vld [vmem:[%s1991_s25 + $0x38] sm:$0xff]   ;;  %v186_v8 = vld [vmem:[%s1991_s25 + $0x40] sm:$0xff]  }
  0x14   : > { %179 = vst [vmem:[%s1996_s26 + $0x30] sm:$0xff] %v178_v6   ;;  %183 = vst [vmem:[%s1996_s26 + $0x38] sm:$0xff] %v182_v7   ;;  %v190_v9 = vld [vmem:[%s1991_s25 + $0x48] sm:$0xff]   ;;  %v194_v10 = vld [vmem:[%s1991_s25 + $0x190] sm:$0xff]  }
  0x15   : > { %187 = vst [vmem:[%s1996_s26 + $0x40] sm:$0xff] %v186_v8   ;;  %v198_v11 = vld [vmem:[%s1991_s25 + $0x198] sm:$0xff]   ;;  %191 = vst [vmem:[%s1996_s26 + $0x48] sm:$0xff] %v190_v9   ;;  %v202_v12 = vld [vmem:[%s1991_s25 + $0x1a0] sm:$0xff]  }
  0x16   : > { %195 = vst [vmem:[%s1996_s26 + $0x50] sm:$0xff] %v194_v10   ;;  %199 = vst [vmem:[%s1996_s26 + $0x58] sm:$0xff] %v198_v11   ;;  %v206_v13 = vld [vmem:[%s1991_s25 + $0x1a8] sm:$0xff]   ;;  %v210_v14 = vld [vmem:[%s1991_s25 + $0x1b0] sm:$0xff]  }
  0x17   : > { %203 = vst [vmem:[%s1996_s26 + $0x60] sm:$0xff] %v202_v12   ;;  %207 = vst [vmem:[%s1996_s26 + $0x68] sm:$0xff] %v206_v13   ;;  %v214_v15 = vld [vmem:[%s1991_s25 + $0x1b8] sm:$0xff]   ;;  %v218_v16 = vld [vmem:[%s1991_s25 + $0x1c0] sm:$0xff]  }
  0x18   : > { %211 = vst [vmem:[%s1996_s26 + $0x70] sm:$0xff] %v210_v14   ;;  %v222_v17 = vld [vmem:[%s1991_s25 + $0x1c8] sm:$0xff]   ;;  %215 = vst [vmem:[%s1996_s26 + $0x78] sm:$0xff] %v214_v15   ;;  %v226_v18 = vld [vmem:[%s1991_s25 + $0x1d0] sm:$0xff]  }
  0x19   : > { %219 = vst [vmem:[%s1996_s26 + $0x80] sm:$0xff] %v218_v16   ;;  %223 = vst [vmem:[%s1996_s26 + $0x88] sm:$0xff] %v222_v17   ;;  %v230_v19 = vld [vmem:[%s1991_s25 + $0x1d8] sm:$0xff]   ;;  %v234_v20 = vld [vmem:[%s1991_s25 + $0x320] sm:$0xff]  }
  0x1a   : > { %227 = vst [vmem:[%s1996_s26 + $0x90] sm:$0xff] %v226_v18   ;;  %231 = vst [vmem:[%s1996_s26 + $0x98] sm:$0xff] %v230_v19   ;;  %v238_v21 = vld [vmem:[%s1991_s25 + $0x328] sm:$0xff]   ;;  %v242_v22 = vld [vmem:[%s1991_s25 + $0x330] sm:$0xff]  }
  0x1b   : > { %235 = vst [vmem:[%s1996_s26 + $0xa0] sm:$0xff] %v234_v20   ;;  %v246_v23 = vld [vmem:[%s1991_s25 + $0x338] sm:$0xff]   ;;  %239 = vst [vmem:[%s1996_s26 + $0xa8] sm:$0xff] %v238_v21   ;;  %v250_v24 = vld [vmem:[%s1991_s25 + $0x340] sm:$0xff]  }
  0x1c   : > { %243 = vst [vmem:[%s1996_s26 + $0xb0] sm:$0xff] %v242_v22   ;;  %247 = vst [vmem:[%s1996_s26 + $0xb8] sm:$0xff] %v246_v23   ;;  %v254_v25 = vld [vmem:[%s1991_s25 + $0x348] sm:$0xff]   ;;  %v258_v26 = vld [vmem:[%s1991_s25 + $0x350] sm:$0xff]  }
  0x1d   : > { %251 = vst [vmem:[%s1996_s26 + $0xc0] sm:$0xff] %v250_v24   ;;  %255 = vst [vmem:[%s1996_s26 + $0xc8] sm:$0xff] %v254_v25   ;;  %v262_v27 = vld [vmem:[%s1991_s25 + $0x358] sm:$0xff]   ;;  %v266_v28 = vld [vmem:[%s1991_s25 + $0x360] sm:$0xff]  }
  0x1e   : > { %259 = vst [vmem:[%s1996_s26 + $0xd0] sm:$0xff] %v258_v26   ;;  %v270_v29 = vld [vmem:[%s1991_s25 + $0x368] sm:$0xff]   ;;  %263 = vst [vmem:[%s1996_s26 + $0xd8] sm:$0xff] %v262_v27   ;;  %v274_v30 = vld [vmem:[%s1991_s25 + $0x4b0] sm:$0xff]  }
  0x1f   : > { %267 = vst [vmem:[%s1996_s26 + $0xe0] sm:$0xff] %v266_v28   ;;  %271 = vst [vmem:[%s1996_s26 + $0xe8] sm:$0xff] %v270_v29   ;;  %v278_v31 = vld [vmem:[%s1991_s25 + $0x4b8] sm:$0xff]   ;;  %v282_v32 = vld [vmem:[%s1991_s25 + $0x4c0] sm:$0xff]  }
  0x20   : > { %275 = vst [vmem:[%s1996_s26 + $0xf0] sm:$0xff] %v274_v30   ;;  %279 = vst [vmem:[%s1996_s26 + $0xf8] sm:$0xff] %v278_v31   ;;  %v286_v33 = vld [vmem:[%s1991_s25 + $0x4c8] sm:$0xff]   ;;  %v290_v34 = vld [vmem:[%s1991_s25 + $0x4d0] sm:$0xff]  }
  0x21   : > { %283 = vst [vmem:[%s1996_s26 + $0x100] sm:$0xff] %v282_v32   ;;  %v294_v35 = vld [vmem:[%s1991_s25 + $0x4d8] sm:$0xff]   ;;  %287 = vst [vmem:[%s1996_s26 + $0x108] sm:$0xff] %v286_v33   ;;  %v298_v36 = vld [vmem:[%s1991_s25 + $0x4e0] sm:$0xff]  }
  0x22   : > { %291 = vst [vmem:[%s1996_s26 + $0x110] sm:$0xff] %v290_v34   ;;  %295 = vst [vmem:[%s1996_s26 + $0x118] sm:$0xff] %v294_v35   ;;  %v302_v37 = vld [vmem:[%s1991_s25 + $0x4e8] sm:$0xff]   ;;  %v306_v38 = vld [vmem:[%s1991_s25 + $0x4f0] sm:$0xff]  }
  0x23   : > { %299 = vst [vmem:[%s1996_s26 + $0x120] sm:$0xff] %v298_v36   ;;  %303 = vst [vmem:[%s1996_s26 + $0x128] sm:$0xff] %v302_v37   ;;  %v310_v39 = vld [vmem:[%s1991_s25 + $0x4f8] sm:$0xff]  }
  0x24   : > { %307 = vst [vmem:[%s1996_s26 + $0x130] sm:$0xff] %v306_v38   ;;  %311 = vst [vmem:[%s1996_s26 + $0x138] sm:$0xff] %v310_v39  }
  0x25 PF: > { %p1585_p5 = scmp.ge.s32.totalorder %s1934_s14, 1  ;;  %p496_p6 = scmp.lt.s32.totalorder %s1934_s14, 6 }
  0x27   : > { %p497_p7 = pnand %p1585_p5, %p496_p6 }
  0x28   : > { %s503_s29 = sand.u32 (!%p497_p7), 1, %s1926_s12   ;;  %s527_s7 = smul.u32 (!%p497_p7), 20, %s1580_s15 }
  0x29   : > { %500 = sbr.rel (%p497_p7) target bundleno = 342 (0x156), region = 69 }
  0x2a   : > { %s1844_s30 = smul.u32 (!%p497_p7), 320, %s503_s29  ;;  %p528_p8 = scmp.lt.s32.totalorder (!%p497_p7), %s527_s7, 99 }
  0x2c   : > { %s2084_s6 = scalar_lea.vmem (!%p497_p7), [#allocation2], %s1844_s30 }
  0x2e   : > { %v1870_v40 = vld [vmem:[%s2351_s1 + $0x8] sm:$0x1f]   ;;  %vm950_vm0 = vcmask 1043456   ;;  %vm951_vm1 = vcmask 1044480   ;;  %v1936_v41 = vmov 65535   ;;  %v1871_v45 = vld [vmem:[%s2351_s1] sm:$0xff]  }
  0x2f   : > { %v952_v42 = vsel %vm950_vm0, 4294967295, %v1936_v41  ;;  %v1872_v46 = vld [vmem:[%s2084_s6] sm:$0xff]   ;;  %vm829_vm2 = vcmask 203776   ;;  %v1874_v48 = vld [vmem:[%s2084_s6 + $0x8] sm:$0xff]   ;;  %v1876_v50 = vld [vmem:[%s2084_s6 + $0x10] sm:$0xff]   ;;  %s2358_s7 = smov (!%p528_p8, %s527_s7), 99 }
  0x30   : > { %v953_v43 = vsel %vm951_vm1, %v952_v42, 0  ;;  %v1873_v47 = vld [vmem:[%s2084_s6 + $0xa0] sm:$0xff]   ;;  %1759 = vmatprep.mubr.msk.bf16.mxu0 %vm829_vm2, %v1872_v46  ;;  %v1875_v49 = vld [vmem:[%s2084_s6 + $0xa8] sm:$0xff]   ;;  %v1877_v51 = vld [vmem:[%s2084_s6 + $0xb0] sm:$0xff]   ;;  %s1586_s10 = sshll.u32 %s2358_s7, 2  ;;  %vm1497_vm3 = vcmask 257024  }
  0x31   : > { %v955_v44 = vand.u32 %v1870_v40, %v953_v43  ;;  %1799 = vmatprep.mubr.msk.bf16.mxu1 %vm829_vm2, %v1873_v47  ;;  %v1878_v52 = vld [vmem:[%s2084_s6 + $0x18] sm:$0xff]   ;;  %v1880_v54 = vld [vmem:[%s2084_s6 + $0x20] sm:$0xff]   ;;  %v1882_v56 = vld [vmem:[%s2084_s6 + $0x28] sm:$0xff]   ;;  %s2247_s14 = scalar_lea.vmem %s2353_s3, %s1586_s10 }
  0x32   : > { %v1879_v53 = vld [vmem:[%s2084_s6 + $0xb8] sm:$0xff]   ;;  %v1881_v55 = vld [vmem:[%s2084_s6 + $0xc0] sm:$0xff]   ;;  %v1883_v57 = vld [vmem:[%s2084_s6 + $0xc8] sm:$0xff]  }
  0x33   : > { %1755 = vmatprep.subr.bf16.mxu0 %v955_v44  ;;  %1839 = vmatprep.subr.bf16.mxu1 %v955_v44  ;;  %v1884_v58 = vld [vmem:[%s2084_s6 + $0x30] sm:$0xff]   ;;  %v1886_v60 = vld [vmem:[%s2084_s6 + $0x38] sm:$0xff]   ;;  %v1888_v62 = vld [vmem:[%s2084_s6 + $0x40] sm:$0xff]  }
  0x34   : > { %1756 = vmatpush3.bf16.msra.mxu0 %v955_v44  ;;  %1841 = vmatpush3.bf16.msra.mxu1 %v955_v44  ;;  %v1885_v59 = vld [vmem:[%s2084_s6 + $0xd0] sm:$0xff]   ;;  %v1887_v61 = vld [vmem:[%s2084_s6 + $0xd8] sm:$0xff]   ;;  %v1889_v63 = vld [vmem:[%s2084_s6 + $0xe0] sm:$0xff]  }
  0x35   : > { %1757 = vmatprep.subr.bf16.mxu0 %v1871_v45  ;;  %1840 = vmatprep.subr.bf16.mxu1 %v1871_v45  ;;  %v1890_v0 = vld [vmem:[%s2084_s6 + $0x48] sm:$0xff]   ;;  %v1892_v2 = vld [vmem:[%s2084_s6 + $0x50] sm:$0xff]   ;;  %v1894_v4 = vld [vmem:[%s2084_s6 + $0x58] sm:$0xff]  }
  0x36   : > { %v1891_v1 = vld [vmem:[%s2084_s6 + $0xe8] sm:$0xff]   ;;  %v1893_v3 = vld [vmem:[%s2084_s6 + $0xf0] sm:$0xff]   ;;  %v1895_v5 = vld [vmem:[%s2084_s6 + $0xf8] sm:$0xff]  }
  0x37   : > { %v1896_v6 = vld [vmem:[%s2084_s6 + $0x60] sm:$0xff]   ;;  %v1898_v8 = vld [vmem:[%s2084_s6 + $0x68] sm:$0xff]   ;;  %v1900_v10 = vld [vmem:[%s2084_s6 + $0x70] sm:$0xff]  }
  0x38   : > { %1758 = vmatpush3.bf16.msra.mxu0 %v1871_v45  ;;  %1842 = vmatpush3.bf16.msra.mxu1 %v1871_v45  ;;  %v1897_v7 = vld [vmem:[%s2084_s6 + $0x100] sm:$0xff]   ;;  %v1899_v9 = vld [vmem:[%s2084_s6 + $0x108] sm:$0xff]   ;;  %v1901_v11 = vld [vmem:[%s2084_s6 + $0x110] sm:$0xff]  }
  0x39   : > { %v1902_v12 = vld [vmem:[%s2084_s6 + $0x78] sm:$0xff]   ;;  %v1904_v14 = vld [vmem:[%s2084_s6 + $0x80] sm:$0xff]   ;;  %v1906_v16 = vld [vmem:[%s2084_s6 + $0x88] sm:$0xff]  }
  0x3a   : > { %v1903_v13 = vld [vmem:[%s2084_s6 + $0x118] sm:$0xff]   ;;  %v1905_v15 = vld [vmem:[%s2084_s6 + $0x120] sm:$0xff]   ;;  %v1907_v17 = vld [vmem:[%s2084_s6 + $0x128] sm:$0xff]  }
  0x3b   : > { %1760 = vmatmul.mubr.msk.bf16.vlgmr.msra.gmra.mxu0 %vm829_vm2, %v1874_v48  ;;  %1800 = vmatmul.mubr.msk.bf16.vlgmr.msra.gmra.mxu1 %vm829_vm2, %v1875_v49  ;;  %v1908_v18 = vld [vmem:[%s2084_s6 + $0x90] sm:$0xff]   ;;  %v1910_v20 = vld [vmem:[%s2084_s6 + $0x98] sm:$0xff]  }
  0x3c   : > { %1763 = vmatprep.mubr.msk.bf16.mxu0 %vm829_vm2, %v1876_v50  ;;  %1803 = vmatprep.mubr.msk.bf16.mxu1 %vm829_vm2, %v1877_v51  ;;  %v1909_v19 = vld [vmem:[%s2084_s6 + $0x130] sm:$0xff]   ;;  %v1911_v21 = vld [vmem:[%s2084_s6 + $0x138] sm:$0xff]  }
  0x43   : > { %1764 = vmatmul.mubr.msk.bf16.gmra.mxu0 %vm829_vm2, %v1878_v52  ;;  %1804 = vmatmul.mubr.msk.bf16.gmra.mxu1 %vm829_vm2, %v1879_v53 }
  0x44   : > { %1767 = vmatprep.mubr.msk.bf16.mxu0 %vm829_vm2, %v1880_v54  ;;  %1807 = vmatprep.mubr.msk.bf16.mxu1 %vm829_vm2, %v1881_v55 }
  0x4b   : > { %1768 = vmatmul.mubr.msk.bf16.gmra.mxu0 %vm829_vm2, %v1882_v56  ;;  %1808 = vmatmul.mubr.msk.bf16.gmra.mxu1 %vm829_vm2, %v1883_v57 }
  0x4c   : > { %1771 = vmatprep.mubr.msk.bf16.mxu0 %vm829_vm2, %v1884_v58  ;;  %1811 = vmatprep.mubr.msk.bf16.mxu1 %vm829_vm2, %v1885_v59 }
  0x53   : > { %1772 = vmatmul.mubr.msk.bf16.gmra.mxu0 %vm829_vm2, %v1886_v60  ;;  %1812 = vmatmul.mubr.msk.bf16.gmra.mxu1 %vm829_vm2, %v1887_v61 }
  0x54   : > { %1775 = vmatprep.mubr.msk.bf16.mxu0 %vm829_vm2, %v1888_v62  ;;  %1815 = vmatprep.mubr.msk.bf16.mxu1 %vm829_vm2, %v1889_v63 }
  0x5b   : > { %1776 = vmatmul.mubr.msk.bf16.gmra.mxu0 %vm829_vm2, %v1890_v0  ;;  %1816 = vmatmul.mubr.msk.bf16.gmra.mxu1 %vm829_vm2, %v1891_v1 }
  0x5c   : > { %1779 = vmatprep.mubr.msk.bf16.mxu0 %vm829_vm2, %v1892_v2  ;;  %1819 = vmatprep.mubr.msk.bf16.mxu1 %vm829_vm2, %v1893_v3  ;;  %v2239_v2 = vld [vmem:[%s2352_s2] ss:$0 sm:$0xff] }
  0x63   : > { %1780 = vmatmul.mubr.msk.bf16.gmra.mxu0 %vm829_vm2, %v1894_v4  ;;  %1820 = vmatmul.mubr.msk.bf16.gmra.mxu1 %vm829_vm2, %v1895_v5 }
  0x64   : > { %1783 = vmatprep.mubr.msk.bf16.mxu0 %vm829_vm2, %v1896_v6  ;;  %1823 = vmatprep.mubr.msk.bf16.mxu1 %vm829_vm2, %v1897_v7 }
  0x6b   : > { %1784 = vmatmul.mubr.msk.bf16.gmra.mxu0 %vm829_vm2, %v1898_v8  ;;  %1824 = vmatmul.mubr.msk.bf16.gmra.mxu1 %vm829_vm2, %v1899_v9 }
  0x6c   : > { %1787 = vmatprep.mubr.msk.bf16.mxu0 %vm829_vm2, %v1900_v10  ;;  %1827 = vmatprep.mubr.msk.bf16.mxu1 %vm829_vm2, %v1901_v11 }
  0x73   : > { %1788 = vmatmul.mubr.msk.bf16.gmra.mxu0 %vm829_vm2, %v1902_v12  ;;  %1828 = vmatmul.mubr.msk.bf16.gmra.mxu1 %vm829_vm2, %v1903_v13 }
  0x74   : > { %1791 = vmatprep.mubr.msk.bf16.mxu0 %vm829_vm2, %v1904_v14  ;;  %1831 = vmatprep.mubr.msk.bf16.mxu1 %vm829_vm2, %v1905_v15 }
  0x7b   : > { %1792 = vmatmul.mubr.msk.bf16.gmra.mxu0 %vm829_vm2, %v1906_v16  ;;  %1832 = vmatmul.mubr.msk.bf16.gmra.mxu1 %vm829_vm2, %v1907_v17 }
  0x7c   : > { %1795 = vmatprep.mubr.msk.bf16.mxu0 %vm829_vm2, %v1908_v18  ;;  %1835 = vmatprep.mubr.msk.bf16.mxu1 %vm829_vm2, %v1909_v19 }
  0x83   : > { %1796 = vmatmul.mubr.msk.bf16.gmra.mxu0 %vm829_vm2, %v1910_v20  ;;  %1836 = vmatmul.mubr.msk.bf16.gmra.mxu1 %vm829_vm2, %v1911_v21 }
  0xfb   : > { %v1761_v22 = vpop.f32.mrf.mxu0  ;;  %v1801_v23 = vpop.f32.mrf.mxu1 }
  0xfd   : > { %v991_v24 = vpop.f32.mrf.mxu0  ;;  %v1151_v25 = vpop.f32.mrf.mxu1 }
  0xff   : > { %v1762_v26 = vpop.f32.mrf.mxu0  ;;  %v1802_v27 = vpop.f32.mrf.mxu1 }
 0x101   : > { %v2166_v28 = vpop.f32.mrf.mxu0  ;;  %v2168_v29 = vpop.f32.mrf.mxu1 }
 0x103   : > { %v2170_v30 = vpop.f32.mrf.mxu0  ;;  %v2172_v31 = vpop.f32.mrf.mxu1 }
 0x105   : > { %v2174_v32 = vpop.f32.mrf.mxu0  ;;  %v2176_v33 = vpop.f32.mrf.mxu1 }
 0x107   : > { %v2178_v34 = vpop.f32.mrf.mxu0  ;;  %v2180_v35 = vpop.f32.mrf.mxu1 }
 0x109   : > { %v2182_v36 = vpop.f32.mrf.mxu0  ;;  %v2184_v37 = vpop.f32.mrf.mxu1 }
 0x10b   : > { %v2186_v38 = vpop.f32.mrf.mxu0  ;;  %v2188_v39 = vpop.f32.mrf.mxu1 }
 0x10d   : > { %v2190_v40 = vpop.f32.mrf.mxu0  ;;  %v2192_v41 = vpop.f32.mrf.mxu1 }
 0x10f   : > { %v2194_v42 = vpop.f32.mrf.mxu0  ;;  %v2196_v43 = vpop.f32.mrf.mxu1 }
 0x111   : > { %v2198_v44 = vpop.f32.mrf.mxu0  ;;  %v2200_v45 = vpop.f32.mrf.mxu1 }
 0x113   : > { %v2202_v46 = vpop.f32.mrf.mxu0  ;;  %v2204_v47 = vpop.f32.mrf.mxu1 }
 0x115   : > { %v2206_v48 = vpop.f32.mrf.mxu0  ;;  %v2208_v49 = vpop.f32.mrf.mxu1 }
 0x117   : > { %v2210_v50 = vpop.f32.mrf.mxu0  ;;  %v2212_v51 = vpop.f32.mrf.mxu1 }
 0x119   : > { %v2214_v52 = vpop.f32.mrf.mxu0  ;;  %v2216_v53 = vpop.f32.mrf.mxu1 }
 0x11b   : > { %v2218_v54 = vpop.f32.mrf.mxu0  ;;  %v2220_v55 = vpop.f32.mrf.mxu1 }
 0x11d   : > { %v2224_v56 = vpop.f32.mrf.mxu0  ;;  %v2226_v57 = vpop.f32.mrf.mxu1 }
 0x11f   : > { %v2228_v58 = vpop.f32.mrf.mxu0  ;;  %v2230_v59 = vpop.f32.mrf.mxu1 }
 0x121   : > { %v2232_v60 = vpop.f32.mrf.mxu0  ;;  %v2234_v61 = vpop.f32.mrf.mxu1 }
 0x123   : > { %v1781_v62 = vpop.f32.mrf.mxu0  ;;  %v1821_v63 = vpop.f32.mrf.mxu1 }
 0x124   : > { %v1312_v0 = vmax.f32 %v1761_v22, %v1781_v62  ;;  %v1332_v1 = vmax.f32 %v1801_v23, %v1821_v63 }
 0x125   : > { %v1071_v3 = vpop.f32.mrf.mxu0  ;;  %v1231_v4 = vpop.f32.mrf.mxu1 }
 0x126   : > { %v1352_v5 = vmax.f32 %v1312_v0, %v1332_v1  ;;  %v1310_v6 = vmax.f32 %v991_v24, %v1071_v3  ;;  %v1330_v7 = vmax.f32 %v1151_v25, %v1231_v4 }
 0x127   : > { %v1782_v8 = vpop.f32.mrf.mxu0  ;;  %v1822_v9 = vpop.f32.mrf.mxu1 }
 0x128   : > { %v1379_v10 = vadd.f32 %v2239_v2, %v1352_v5  ;;  %v1350_v11 = vmax.f32 %v1310_v6, %v1330_v7  ;;  %v1313_v12 = vmax.f32 %v1762_v26, %v1782_v8  ;;  %v1333_v13 = vmax.f32 %v1802_v27, %v1822_v9 }
 0x129   : > { %v1074_v14 = vpop.f32.mrf.mxu0  ;;  %v1234_v15 = vpop.f32.mrf.mxu1 }
 0x12a   : > { %v1399_v16 = vmax.f32 %v1379_v10, 0.0  ;;  %v1377_v17 = vadd.f32 %v2239_v2, %v1350_v11  ;;  %v1353_v18 = vmax.f32 %v1313_v12, %v1333_v13  ;;  %v1311_v19 = vmax.f32 %v2166_v28, %v1074_v14 }
 0x12b   : > { %v1331_v20 = vmax.f32 %v2168_v29, %v1234_v15  ;;  %v1785_v21 = vpop.f32.mrf.mxu0  ;;  %v1825_v22 = vpop.f32.mrf.mxu1 }
 0x12c   : > { %v1695_v23 = vpack.c.bf16 %v1399_v16, %v1399_v16  ;;  %v1397_v24 = vmax.f32 %v1377_v17, 0.0  ;;  %v1380_v25 = vadd.f32 %v2239_v2, %v1353_v18  ;;  %v1316_v26 = vmax.f32 %v2170_v30, %v1785_v21 }
 0x12d   : > { %v1351_v27 = vmax.f32 %v1311_v19, %v1331_v20  ;;  %v1336_v28 = vmax.f32 %v2172_v31, %v1825_v22  ;;  %v1087_v62 = vpop.f32.mrf.mxu0  ;;  %v1247_v63 = vpop.f32.mrf.mxu1 }
 0x12e   : > { %1500 = vst.msk [vmem:[%s2247_s14 + $0x8] sm:$0xf] %vm1497_vm3, %v1695_v23  ;;  %v1693_v0 = vpack.c.bf16 %v1397_v24, %v1397_v24  ;;  %v1400_v1 = vmax.f32 %v1380_v25, 0.0  ;;  %v1314_v29 = vmax.f32 %v2174_v32, %v1087_v62  ;;  %v1334_v3 = vmax.f32 %v2176_v33, %v1247_v63 }
 0x12f   : > { %v1378_v4 = vadd.f32 %v2239_v2, %v1351_v27  ;;  %v1356_v5 = vmax.f32 %v1316_v26, %v1336_v28  ;;  %v1786_v6 = vpop.f32.mrf.mxu0  ;;  %v1826_v7 = vpop.f32.mrf.mxu1 }
 0x130   : > { %1498 = vst.msk [vmem:[%s2247_s14] sm:$0xf] %vm1497_vm3, %v1693_v0  ;;  %v1696_v30 = vpack.c.bf16 %v1400_v1, %v1400_v1  ;;  %v1354_v31 = vmax.f32 %v1314_v29, %v1334_v3  ;;  %v1317_v8 = vmax.f32 %v2178_v34, %v1786_v6  ;;  %v1337_v9 = vmax.f32 %v2180_v35, %v1826_v7 }
 0x131   : > { %v1398_v10 = vmax.f32 %v1378_v4, 0.0  ;;  %v1383_v11 = vadd.f32 %v2239_v2, %v1356_v5  ;;  %v1090_v32 = vpop.f32.mrf.mxu0  ;;  %v1250_v12 = vpop.f32.mrf.mxu1 }
 0x132   : > { %1501 = vst.msk [vmem:[%s2247_s14 + $0xc] sm:$0xf] %vm1497_vm3, %v1696_v30  ;;  %v1381_v33 = vadd.f32 %v2239_v2, %v1354_v31  ;;  %v1357_v13 = vmax.f32 %v1317_v8, %v1337_v9  ;;  %v1315_v14 = vmax.f32 %v2182_v36, %v1090_v32  ;;  %v1335_v15 = vmax.f32 %v2184_v37, %v1250_v12 }
 0x133   : > { %v1694_v16 = vpack.c.bf16 %v1398_v10, %v1398_v10  ;;  %v1403_v17 = vmax.f32 %v1383_v11, 0.0  ;;  %v1789_v34 = vpop.f32.mrf.mxu0  ;;  %v1829_v35 = vpop.f32.mrf.mxu1 }
 0x134   : > { %v1401_v18 = vmax.f32 %v1381_v33, 0.0  ;;  %v1384_v19 = vadd.f32 %v2239_v2, %v1357_v13  ;;  %v1355_v20 = vmax.f32 %v1315_v14, %v1335_v15  ;;  %v1320_v21 = vmax.f32 %v2186_v38, %v1789_v34 }
 0x135   : > { %1499 = vst.msk [vmem:[%s2247_s14 + $0x4] sm:$0xf] %vm1497_vm3, %v1694_v16  ;;  %v1699_v22 = vpack.c.bf16 %v1403_v17, %v1403_v17  ;;  %v1340_v23 = vmax.f32 %v2188_v39, %v1829_v35  ;;  %v1103_v36 = vpop.f32.mrf.mxu0  ;;  %v1263_v24 = vpop.f32.mrf.mxu1 }
 0x136   : > { %v1697_v37 = vpack.c.bf16 %v1401_v18, %v1401_v18  ;;  %v1404_v25 = vmax.f32 %v1384_v19, 0.0  ;;  %v1382_v26 = vadd.f32 %v2239_v2, %v1355_v20  ;;  %v1318_v27 = vmax.f32 %v2190_v40, %v1103_v36 }
 0x137   : > { %1504 = vst.msk [vmem:[%s2247_s14 + $0x18] sm:$0xf] %vm1497_vm3, %v1699_v22  ;;  %v1360_v28 = vmax.f32 %v1320_v21, %v1340_v23  ;;  %v1338_v62 = vmax.f32 %v2192_v41, %v1263_v24  ;;  %v1790_v38 = vpop.f32.mrf.mxu0  ;;  %v1830_v63 = vpop.f32.mrf.mxu1 }
 0x138   : > { %1502 = vst.msk [vmem:[%s2247_s14 + $0x10] sm:$0xf] %vm1497_vm3, %v1697_v37  ;;  %v1700_v0 = vpack.c.bf16 %v1404_v25, %v1404_v25  ;;  %v1402_v39 = vmax.f32 %v1382_v26, 0.0  ;;  %v1321_v1 = vmax.f32 %v2194_v42, %v1790_v38  ;;  %v1341_v29 = vmax.f32 %v2196_v43, %v1830_v63 }
 0x139   : > { %v1387_v3 = vadd.f32 %v2239_v2, %v1360_v28  ;;  %v1358_v4 = vmax.f32 %v1318_v27, %v1338_v62  ;;  %v1106_v40 = vpop.f32.mrf.mxu0  ;;  %v1266_v5 = vpop.f32.mrf.mxu1 }
 0x13a   : > { %1505 = vst.msk [vmem:[%s2247_s14 + $0x1c] sm:$0xf] %vm1497_vm3, %v1700_v0  ;;  %v1698_v6 = vpack.c.bf16 %v1402_v39, %v1402_v39  ;;  %v1361_v41 = vmax.f32 %v1321_v1, %v1341_v29  ;;  %v1319_v7 = vmax.f32 %v2198_v44, %v1106_v40  ;;  %v1339_v30 = vmax.f32 %v2200_v45, %v1266_v5 }
 0x13b   : > { %v1407_v31 = vmax.f32 %v1387_v3, 0.0  ;;  %v1385_v8 = vadd.f32 %v2239_v2, %v1358_v4  ;;  %v1793_v42 = vpop.f32.mrf.mxu0  ;;  %v1833_v9 = vpop.f32.mrf.mxu1 }
 0x13c   : > { %1503 = vst.msk [vmem:[%s2247_s14 + $0x14] sm:$0xf] %vm1497_vm3, %v1698_v6  ;;  %v1388_v43 = vadd.f32 %v2239_v2, %v1361_v41  ;;  %v1359_v10 = vmax.f32 %v1319_v7, %v1339_v30  ;;  %v1324_v11 = vmax.f32 %v2202_v46, %v1793_v42  ;;  %v1344_v32 = vmax.f32 %v2204_v47, %v1833_v9 }
 0x13d   : > { %v1703_v12 = vpack.c.bf16 %v1407_v31, %v1407_v31  ;;  %v1405_v33 = vmax.f32 %v1385_v8, 0.0  ;;  %v1119_v44 = vpop.f32.mrf.mxu0  ;;  %v1279_v45 = vpop.f32.mrf.mxu1 }
 0x13e   : > { %v1408_v13 = vmax.f32 %v1388_v43, 0.0  ;;  %v1386_v14 = vadd.f32 %v2239_v2, %v1359_v10  ;;  %v1364_v15 = vmax.f32 %v1324_v11, %v1344_v32  ;;  %v1322_v16 = vmax.f32 %v2206_v48, %v1119_v44 }
 0x13f   : > { %1508 = vst.msk [vmem:[%s2247_s14 + $0x28] sm:$0xf] %vm1497_vm3, %v1703_v12  ;;  %v1701_v17 = vpack.c.bf16 %v1405_v33, %v1405_v33  ;;  %v1342_v34 = vmax.f32 %v2208_v49, %v1279_v45  ;;  %v1794_v46 = vpop.f32.mrf.mxu0  ;;  %v1834_v35 = vpop.f32.mrf.mxu1 }
 0x140   : > { %v1704_v47 = vpack.c.bf16 %v1408_v13, %v1408_v13  ;;  %v1406_v18 = vmax.f32 %v1386_v14, 0.0  ;;  %v1391_v19 = vadd.f32 %v2239_v2, %v1364_v15  ;;  %v1325_v20 = vmax.f32 %v2210_v50, %v1794_v46 }
 0x141   : > { %1506 = vst.msk [vmem:[%s2247_s14 + $0x20] sm:$0xf] %vm1497_vm3, %v1701_v17  ;;  %v1362_v21 = vmax.f32 %v1322_v16, %v1342_v34  ;;  %v1345_v22 = vmax.f32 %v2212_v51, %v1834_v35  ;;  %v1122_v48 = vpop.f32.mrf.mxu0  ;;  %v1282_v23 = vpop.f32.mrf.mxu1 }
 0x142   : > { %1509 = vst.msk [vmem:[%s2247_s14 + $0x2c] sm:$0xf] %vm1497_vm3, %v1704_v47  ;;  %v1702_v36 = vpack.c.bf16 %v1406_v18, %v1406_v18  ;;  %v1411_v49 = vmax.f32 %v1391_v19, 0.0  ;;  %v1323_v24 = vmax.f32 %v2214_v52, %v1122_v48  ;;  %v1343_v37 = vmax.f32 %v2216_v53, %v1282_v23 }
 0x143   : > { %v1389_v25 = vadd.f32 %v2239_v2, %v1362_v21  ;;  %v1365_v26 = vmax.f32 %v1325_v20, %v1345_v22  ;;  %v1797_v50 = vpop.f32.mrf.mxu0  ;;  %v1837_v27 = vpop.f32.mrf.mxu1 }
 0x144   : > { %1507 = vst.msk [vmem:[%s2247_s14 + $0x24] sm:$0xf] %vm1497_vm3, %v1702_v36  ;;  %v1707_v28 = vpack.c.bf16 %v1411_v49, %v1411_v49  ;;  %v1363_v51 = vmax.f32 %v1323_v24, %v1343_v37  ;;  %v1328_v62 = vmax.f32 %v2218_v54, %v1797_v50  ;;  %v1348_v38 = vmax.f32 %v2220_v55, %v1837_v27 }
 0x145   : > { %v1409_v63 = vmax.f32 %v1389_v25, 0.0  ;;  %v1392_v0 = vadd.f32 %v2239_v2, %v1365_v26  ;;  %v1135_v52 = vpop.f32.mrf.mxu0  ;;  %v1295_v39 = vpop.f32.mrf.mxu1 }
 0x146   : > { %1512 = vst.msk [vmem:[%s2247_s14 + $0x38] sm:$0xf] %vm1497_vm3, %v1707_v28  ;;  %v1390_v53 = vadd.f32 %v2239_v2, %v1363_v51  ;;  %v1368_v1 = vmax.f32 %v1328_v62, %v1348_v38  ;;  %v1326_v29 = vmax.f32 %v2224_v56, %v1135_v52  ;;  %v1346_v3 = vmax.f32 %v2226_v57, %v1295_v39 }
 0x147   : > { %v1705_v4 = vpack.c.bf16 %v1409_v63, %v1409_v63  ;;  %v1412_v40 = vmax.f32 %v1392_v0, 0.0  ;;  %v1798_v54 = vpop.f32.mrf.mxu0  ;;  %v1838_v55 = vpop.f32.mrf.mxu1 }
 0x148   : > { %v1410_v5 = vmax.f32 %v1390_v53, 0.0  ;;  %v1395_v6 = vadd.f32 %v2239_v2, %v1368_v1  ;;  %v1366_v41 = vmax.f32 %v1326_v29, %v1346_v3  ;;  %v1329_v7 = vmax.f32 %v2228_v58, %v1798_v54 }
 0x149   : > { %1510 = vst.msk [vmem:[%s2247_s14 + $0x30] sm:$0xf] %vm1497_vm3, %v1705_v4  ;;  %v1708_v30 = vpack.c.bf16 %v1412_v40, %v1412_v40  ;;  %v1349_v56 = vmax.f32 %v2230_v59, %v1838_v55  ;;  %v1138_v31 = vpop.f32.mrf.mxu0  ;;  %v1298_v57 = vpop.f32.mrf.mxu1 }
 0x14a   : > { %v1706_v8 = vpack.c.bf16 %v1410_v5, %v1410_v5  ;;  %v1415_v42 = vmax.f32 %v1395_v6, 0.0  ;;  %v1393_v9 = vadd.f32 %v2239_v2, %v1366_v41  ;;  %v1327_v43 = vmax.f32 %v2232_v60, %v1138_v31 }
 0x14b   : > { %1513 = vst.msk [vmem:[%s2247_s14 + $0x3c] sm:$0xf] %vm1497_vm3, %v1708_v30  ;;  %v1369_v10 = vmax.f32 %v1329_v7, %v1349_v56  ;;  %v1347_v58 = vmax.f32 %v2234_v61, %v1298_v57 }
 0x14c   : > { %1511 = vst.msk [vmem:[%s2247_s14 + $0x34] sm:$0xf] %vm1497_vm3, %v1706_v8  ;;  %v1711_v11 = vpack.c.bf16 %v1415_v42, %v1415_v42  ;;  %v1413_v59 = vmax.f32 %v1393_v9, 0.0 }
 0x14d   : > { %v1396_v32 = vadd.f32 %v2239_v2, %v1369_v10  ;;  %v1367_v12 = vmax.f32 %v1327_v43, %v1347_v58 }
 0x14e   : > { %1516 = vst.msk [vmem:[%s2247_s14 + $0x48] sm:$0xf] %vm1497_vm3, %v1711_v11  ;;  %v1709_v33 = vpack.c.bf16 %v1413_v59, %v1413_v59 }
 0x14f   : > { %v1416_v44 = vmax.f32 %v1396_v32, 0.0  ;;  %v1394_v60 = vadd.f32 %v2239_v2, %v1367_v12 }
 0x150   : > { %1514 = vst.msk [vmem:[%s2247_s14 + $0x40] sm:$0xf] %vm1497_vm3, %v1709_v33 }
 0x151   : > { %v1712_v45 = vpack.c.bf16 %v1416_v44, %v1416_v44  ;;  %v1414_v13 = vmax.f32 %v1394_v60, 0.0 }
 0x153   : > { %1517 = vst.msk [vmem:[%s2247_s14 + $0x4c] sm:$0xf] %vm1497_vm3, %v1712_v45  ;;  %v1710_v61 = vpack.c.bf16 %v1414_v13, %v1414_v13 }
 0x155   : > { %1515 = vst.msk [vmem:[%s2247_s14 + $0x44] sm:$0xf] %vm1497_vm3, %v1710_v61 }
 0x156 PF: > { %p10_p9 = scmp.ge.s32.totalorder %s1974_s16, 7   ;;  %s2354_s12 = smov %s1930_s13 }
 0x157   : > { %s2355_s13 = smov %s1983_s19  ;;  %s2356_s14 = smov %s1974_s16 }
 0x158   :  { %12 = sbr.rel (!%p10_p9) target bundleno = 2 (0x2), region = 108 }

// kernel: net_forward.4
= control target key start
LH: loop header
LB: loop body
LE: loop exit
PB: predicated region body
PF: predicated region fallthrough
CT: control target
= control target key end

     0   :  { %s3352_s12 = smov 0   ;;  %s3354_s13 = smov 0   ;;  %s4285_s0 = inlined_call_operand.vmem [shape: bf16[4,128,800], index: 0, kind: input, shape index: {}]   ;;  %s4286_s1 = inlined_call_operand.vmem [shape: bf16[800,64], index: 1, kind: input, shape index: {}]   ;;  %s4287_s2 = inlined_call_operand.vmem [shape: f32[1,64], index: 2, kind: input, shape index: {}]   ;;  %s4288_s3 = inlined_call_operand.vmem [shape: bf16[128,64], index: 3, kind: output, shape index: {}]  }
   0x1   :  { %s3356_s14 = smov 0  }
   0x2 LB: > { %s2394_s15 = sadd.s32 4294967295, %s3330_s14   ;;  %s3369_s16 = sadd.s32 1, %s3330_s14   ;;  %s3330_s14 = sphi %s3356_s14, %s4321_s14   ;;  %s3326_s13 = sphi %s3354_s13, %s4320_s13   ;;  %s3322_s12 = sphi %s3352_s12, %s4319_s12  }
   0x3   : > { %s17_s17 = ssub.s32 %s3330_s14, %s3369_s16  ;;  %s20_s18 = sadd.s32 1, %s3326_s13 }
   0x4   : > { %p18_p0 = scmp.eq.s32.totalorder %s17_s17, 0  ;;  %p27_p1 = scmp.ne.s32.totalorder %s3326_s13, %s3322_s12 }
   0x5   : > { %p28_p2 = scmp.eq.s32.totalorder %s3330_s14, 0  ;;  %p2397_p4 = scmp.ge.s32.totalorder %s3330_s14, 2 }
   0x6   : > { %s3378_s19 = scalar_select %p18_p0, %s3326_s13, %s20_s18  }
   0x7   : > { %p29_p3 = por %p28_p2, %p27_p1  ;;  %127 = sbr.rel (%p2397_p4) target bundleno = 86 (0x56), region = 24 }
   0xc   : > { %130 = sbr.rel (!%p29_p3) target bundleno = 86 (0x56), region = 28  ;;  %s132_s20 = sand.u32 (%p29_p3), 1, %s3326_s13  }
   0xd   : > { %s3072_s21 = smul.u32 (%p29_p3), 224, %s3330_s14 }
   0xe   : > { %s3071_s22 = smul.u32 (%p29_p3), 896, %s132_s20 }
   0xf   : > { %s3386_s25 = scalar_lea.vmem (%p29_p3), %s4285_s0, %s3072_s21 }
  0x10   : > { %v153_v0 = vld [vmem:[%s3386_s25] sm:$0xff] (%p29_p3)  ;;  %v155_v1 = vld [vmem:[%s3386_s25 + $0x8] sm:$0xff] (%p29_p3)  ;;  %v157_v2 = vld [vmem:[%s3386_s25 + $0x10] sm:$0xff] (%p29_p3)  ;;  %s3391_s26 = scalar_lea.vmem (%p29_p3), [#allocation2], %s3071_s22 }
  0x11   : > { %154 = vst [vmem:[%s3391_s26] sm:$0xff] %v153_v0  ;;  %156 = vst [vmem:[%s3391_s26 + $0x8] sm:$0xff] %v155_v1  ;;  %v159_v3 = vld [vmem:[%s3386_s25 + $0x1c] sm:$0xff]  ;;  %v161_v4 = vld [vmem:[%s3386_s25 + $0x24] sm:$0xff] }
  0x12   : > { %158 = vst [vmem:[%s3391_s26 + $0x10] sm:$0xff] %v157_v2  ;;  %v163_v5 = vld [vmem:[%s3386_s25 + $0x2c] sm:$0xff]  ;;  %160 = vst [vmem:[%s3391_s26 + $0x1c] sm:$0xff] %v159_v3  ;;  %v165_v6 = vld [vmem:[%s3386_s25 + $0x38] sm:$0xff] }
  0x13   : > { %162 = vst [vmem:[%s3391_s26 + $0x24] sm:$0xff] %v161_v4  ;;  %164 = vst [vmem:[%s3391_s26 + $0x2c] sm:$0xff] %v163_v5  ;;  %v167_v7 = vld [vmem:[%s3386_s25 + $0x40] sm:$0xff]  ;;  %v169_v8 = vld [vmem:[%s3386_s25 + $0x48] sm:$0xff] }
  0x14   : > { %166 = vst [vmem:[%s3391_s26 + $0x38] sm:$0xff] %v165_v6  ;;  %168 = vst [vmem:[%s3391_s26 + $0x40] sm:$0xff] %v167_v7  ;;  %v171_v9 = vld [vmem:[%s3386_s25 + $0x54] sm:$0xff]  ;;  %v173_v10 = vld [vmem:[%s3386_s25 + $0x5c] sm:$0xff] }
  0x15   : > { %170 = vst [vmem:[%s3391_s26 + $0x48] sm:$0xff] %v169_v8  ;;  %v175_v11 = vld [vmem:[%s3386_s25 + $0x64] sm:$0xff]  ;;  %172 = vst [vmem:[%s3391_s26 + $0x54] sm:$0xff] %v171_v9  ;;  %v177_v12 = vld [vmem:[%s3386_s25 + $0x70] sm:$0xff] }
  0x16   : > { %174 = vst [vmem:[%s3391_s26 + $0x5c] sm:$0xff] %v173_v10  ;;  %176 = vst [vmem:[%s3391_s26 + $0x64] sm:$0xff] %v175_v11  ;;  %v179_v13 = vld [vmem:[%s3386_s25 + $0x78] sm:$0xff]  ;;  %v181_v14 = vld [vmem:[%s3386_s25 + $0x80] sm:$0xff] }
  0x17   : > { %178 = vst [vmem:[%s3391_s26 + $0x70] sm:$0xff] %v177_v12  ;;  %180 = vst [vmem:[%s3391_s26 + $0x78] sm:$0xff] %v179_v13  ;;  %v183_v15 = vld [vmem:[%s3386_s25 + $0x8c] sm:$0xff]  ;;  %v185_v16 = vld [vmem:[%s3386_s25 + $0x94] sm:$0xff] }
  0x18   : > { %182 = vst [vmem:[%s3391_s26 + $0x80] sm:$0xff] %v181_v14  ;;  %v187_v17 = vld [vmem:[%s3386_s25 + $0x9c] sm:$0xff]  ;;  %184 = vst [vmem:[%s3391_s26 + $0x8c] sm:$0xff] %v183_v15  ;;  %v189_v18 = vld [vmem:[%s3386_s25 + $0xa8] sm:$0xff] }
  0x19   : > { %186 = vst [vmem:[%s3391_s26 + $0x94] sm:$0xff] %v185_v16  ;;  %188 = vst [vmem:[%s3391_s26 + $0x9c] sm:$0xff] %v187_v17  ;;  %v191_v19 = vld [vmem:[%s3386_s25 + $0xb0] sm:$0xff]  ;;  %v193_v20 = vld [vmem:[%s3386_s25 + $0xb8] sm:$0xff] }
  0x1a   : > { %190 = vst [vmem:[%s3391_s26 + $0xa8] sm:$0xff] %v189_v18  ;;  %192 = vst [vmem:[%s3391_s26 + $0xb0] sm:$0xff] %v191_v19  ;;  %v195_v21 = vld [vmem:[%s3386_s25 + $0xc4] sm:$0xff]  ;;  %v197_v22 = vld [vmem:[%s3386_s25 + $0xcc] sm:$0xff] }
  0x1b   : > { %194 = vst [vmem:[%s3391_s26 + $0xb8] sm:$0xff] %v193_v20  ;;  %v199_v23 = vld [vmem:[%s3386_s25 + $0xd4] sm:$0xff]  ;;  %196 = vst [vmem:[%s3391_s26 + $0xc4] sm:$0xff] %v195_v21  ;;  %v201_v24 = vld [vmem:[%s3386_s25 + $0x1c0] sm:$0xff] }
  0x1c   : > { %198 = vst [vmem:[%s3391_s26 + $0xcc] sm:$0xff] %v197_v22  ;;  %200 = vst [vmem:[%s3391_s26 + $0xd4] sm:$0xff] %v199_v23  ;;  %v203_v25 = vld [vmem:[%s3386_s25 + $0x1c8] sm:$0xff]  ;;  %v205_v26 = vld [vmem:[%s3386_s25 + $0x1d0] sm:$0xff] }
  0x1d   : > { %202 = vst [vmem:[%s3391_s26 + $0xe0] sm:$0xff] %v201_v24  ;;  %204 = vst [vmem:[%s3391_s26 + $0xe8] sm:$0xff] %v203_v25  ;;  %v207_v27 = vld [vmem:[%s3386_s25 + $0x1dc] sm:$0xff]  ;;  %v209_v28 = vld [vmem:[%s3386_s25 + $0x1e4] sm:$0xff] }
  0x1e   : > { %206 = vst [vmem:[%s3391_s26 + $0xf0] sm:$0xff] %v205_v26  ;;  %v211_v29 = vld [vmem:[%s3386_s25 + $0x1ec] sm:$0xff]  ;;  %208 = vst [vmem:[%s3391_s26 + $0xfc] sm:$0xff] %v207_v27  ;;  %v213_v30 = vld [vmem:[%s3386_s25 + $0x1f8] sm:$0xff] }
  0x1f   : > { %210 = vst [vmem:[%s3391_s26 + $0x104] sm:$0xff] %v209_v28  ;;  %212 = vst [vmem:[%s3391_s26 + $0x10c] sm:$0xff] %v211_v29  ;;  %v215_v31 = vld [vmem:[%s3386_s25 + $0x200] sm:$0xff]  ;;  %v217_v32 = vld [vmem:[%s3386_s25 + $0x208] sm:$0xff] }
  0x20   : > { %214 = vst [vmem:[%s3391_s26 + $0x118] sm:$0xff] %v213_v30  ;;  %216 = vst [vmem:[%s3391_s26 + $0x120] sm:$0xff] %v215_v31  ;;  %v219_v33 = vld [vmem:[%s3386_s25 + $0x214] sm:$0xff]  ;;  %v221_v34 = vld [vmem:[%s3386_s25 + $0x21c] sm:$0xff] }
  0x21   : > { %218 = vst [vmem:[%s3391_s26 + $0x128] sm:$0xff] %v217_v32  ;;  %v223_v35 = vld [vmem:[%s3386_s25 + $0x224] sm:$0xff]  ;;  %220 = vst [vmem:[%s3391_s26 + $0x134] sm:$0xff] %v219_v33  ;;  %v225_v36 = vld [vmem:[%s3386_s25 + $0x230] sm:$0xff] }
  0x22   : > { %222 = vst [vmem:[%s3391_s26 + $0x13c] sm:$0xff] %v221_v34  ;;  %224 = vst [vmem:[%s3391_s26 + $0x144] sm:$0xff] %v223_v35  ;;  %v227_v37 = vld [vmem:[%s3386_s25 + $0x238] sm:$0xff]  ;;  %v229_v38 = vld [vmem:[%s3386_s25 + $0x240] sm:$0xff] }
  0x23   : > { %226 = vst [vmem:[%s3391_s26 + $0x150] sm:$0xff] %v225_v36  ;;  %228 = vst [vmem:[%s3391_s26 + $0x158] sm:$0xff] %v227_v37  ;;  %v231_v39 = vld [vmem:[%s3386_s25 + $0x24c] sm:$0xff]  ;;  %v233_v40 = vld [vmem:[%s3386_s25 + $0x254] sm:$0xff] }
  0x24   : > { %230 = vst [vmem:[%s3391_s26 + $0x160] sm:$0xff] %v229_v38  ;;  %v235_v41 = vld [vmem:[%s3386_s25 + $0x25c] sm:$0xff]  ;;  %232 = vst [vmem:[%s3391_s26 + $0x16c] sm:$0xff] %v231_v39  ;;  %v237_v42 = vld [vmem:[%s3386_s25 + $0x268] sm:$0xff] }
  0x25   : > { %234 = vst [vmem:[%s3391_s26 + $0x174] sm:$0xff] %v233_v40  ;;  %236 = vst [vmem:[%s3391_s26 + $0x17c] sm:$0xff] %v235_v41  ;;  %v239_v43 = vld [vmem:[%s3386_s25 + $0x270] sm:$0xff]  ;;  %v241_v44 = vld [vmem:[%s3386_s25 + $0x278] sm:$0xff] }
  0x26   : > { %238 = vst [vmem:[%s3391_s26 + $0x188] sm:$0xff] %v237_v42  ;;  %240 = vst [vmem:[%s3391_s26 + $0x190] sm:$0xff] %v239_v43  ;;  %v243_v45 = vld [vmem:[%s3386_s25 + $0x284] sm:$0xff]  ;;  %v245_v46 = vld [vmem:[%s3386_s25 + $0x28c] sm:$0xff] }
  0x27   : > { %242 = vst [vmem:[%s3391_s26 + $0x198] sm:$0xff] %v241_v44  ;;  %v247_v47 = vld [vmem:[%s3386_s25 + $0x294] sm:$0xff]  ;;  %244 = vst [vmem:[%s3391_s26 + $0x1a4] sm:$0xff] %v243_v45  ;;  %v249_v48 = vld [vmem:[%s3386_s25 + $0x380] sm:$0xff] }
  0x28   : > { %246 = vst [vmem:[%s3391_s26 + $0x1ac] sm:$0xff] %v245_v46  ;;  %248 = vst [vmem:[%s3391_s26 + $0x1b4] sm:$0xff] %v247_v47  ;;  %v251_v49 = vld [vmem:[%s3386_s25 + $0x388] sm:$0xff]  ;;  %v253_v50 = vld [vmem:[%s3386_s25 + $0x390] sm:$0xff] }
  0x29   : > { %250 = vst [vmem:[%s3391_s26 + $0x1c0] sm:$0xff] %v249_v48  ;;  %252 = vst [vmem:[%s3391_s26 + $0x1c8] sm:$0xff] %v251_v49  ;;  %v255_v51 = vld [vmem:[%s3386_s25 + $0x39c] sm:$0xff]  ;;  %v257_v52 = vld [vmem:[%s3386_s25 + $0x3a4] sm:$0xff] }
  0x2a   : > { %254 = vst [vmem:[%s3391_s26 + $0x1d0] sm:$0xff] %v253_v50  ;;  %v259_v53 = vld [vmem:[%s3386_s25 + $0x3ac] sm:$0xff]  ;;  %256 = vst [vmem:[%s3391_s26 + $0x1dc] sm:$0xff] %v255_v51  ;;  %v261_v54 = vld [vmem:[%s3386_s25 + $0x3b8] sm:$0xff] }
  0x2b   : > { %258 = vst [vmem:[%s3391_s26 + $0x1e4] sm:$0xff] %v257_v52  ;;  %260 = vst [vmem:[%s3391_s26 + $0x1ec] sm:$0xff] %v259_v53  ;;  %v263_v55 = vld [vmem:[%s3386_s25 + $0x3c0] sm:$0xff]  ;;  %v265_v56 = vld [vmem:[%s3386_s25 + $0x3c8] sm:$0xff] }
  0x2c   : > { %262 = vst [vmem:[%s3391_s26 + $0x1f8] sm:$0xff] %v261_v54  ;;  %264 = vst [vmem:[%s3391_s26 + $0x200] sm:$0xff] %v263_v55  ;;  %v267_v57 = vld [vmem:[%s3386_s25 + $0x3d4] sm:$0xff]  ;;  %v269_v58 = vld [vmem:[%s3386_s25 + $0x3dc] sm:$0xff] }
  0x2d   : > { %266 = vst [vmem:[%s3391_s26 + $0x208] sm:$0xff] %v265_v56  ;;  %v271_v59 = vld [vmem:[%s3386_s25 + $0x3e4] sm:$0xff]  ;;  %268 = vst [vmem:[%s3391_s26 + $0x214] sm:$0xff] %v267_v57  ;;  %v273_v60 = vld [vmem:[%s3386_s25 + $0x3f0] sm:$0xff] }
  0x2e   : > { %270 = vst [vmem:[%s3391_s26 + $0x21c] sm:$0xff] %v269_v58  ;;  %272 = vst [vmem:[%s3391_s26 + $0x224] sm:$0xff] %v271_v59  ;;  %v275_v61 = vld [vmem:[%s3386_s25 + $0x3f8] sm:$0xff]  ;;  %v277_v62 = vld [vmem:[%s3386_s25 + $0x400] sm:$0xff] }
  0x2f   : > { %274 = vst [vmem:[%s3391_s26 + $0x230] sm:$0xff] %v273_v60  ;;  %276 = vst [vmem:[%s3391_s26 + $0x238] sm:$0xff] %v275_v61  ;;  %v279_v63 = vld [vmem:[%s3386_s25 + $0x40c] sm:$0xff]  ;;  %v281_v0 = vld [vmem:[%s3386_s25 + $0x414] sm:$0xff] }
  0x30   : > { %278 = vst [vmem:[%s3391_s26 + $0x240] sm:$0xff] %v277_v62  ;;  %v283_v1 = vld [vmem:[%s3386_s25 + $0x41c] sm:$0xff]  ;;  %280 = vst [vmem:[%s3391_s26 + $0x24c] sm:$0xff] %v279_v63  ;;  %v285_v2 = vld [vmem:[%s3386_s25 + $0x428] sm:$0xff] }
  0x31   : > { %282 = vst [vmem:[%s3391_s26 + $0x254] sm:$0xff] %v281_v0  ;;  %284 = vst [vmem:[%s3391_s26 + $0x25c] sm:$0xff] %v283_v1  ;;  %v287_v3 = vld [vmem:[%s3386_s25 + $0x430] sm:$0xff]  ;;  %v289_v4 = vld [vmem:[%s3386_s25 + $0x438] sm:$0xff] }
  0x32   : > { %286 = vst [vmem:[%s3391_s26 + $0x268] sm:$0xff] %v285_v2  ;;  %288 = vst [vmem:[%s3391_s26 + $0x270] sm:$0xff] %v287_v3  ;;  %v291_v5 = vld [vmem:[%s3386_s25 + $0x444] sm:$0xff]  ;;  %v293_v6 = vld [vmem:[%s3386_s25 + $0x44c] sm:$0xff] }
  0x33   : > { %290 = vst [vmem:[%s3391_s26 + $0x278] sm:$0xff] %v289_v4  ;;  %v295_v7 = vld [vmem:[%s3386_s25 + $0x454] sm:$0xff]  ;;  %292 = vst [vmem:[%s3391_s26 + $0x284] sm:$0xff] %v291_v5  ;;  %v297_v8 = vld [vmem:[%s3386_s25 + $0x540] sm:$0xff] }
  0x34   : > { %294 = vst [vmem:[%s3391_s26 + $0x28c] sm:$0xff] %v293_v6  ;;  %296 = vst [vmem:[%s3391_s26 + $0x294] sm:$0xff] %v295_v7  ;;  %v299_v9 = vld [vmem:[%s3386_s25 + $0x548] sm:$0xff]  ;;  %v301_v10 = vld [vmem:[%s3386_s25 + $0x550] sm:$0xff] }
  0x35   : > { %298 = vst [vmem:[%s3391_s26 + $0x2a0] sm:$0xff] %v297_v8  ;;  %300 = vst [vmem:[%s3391_s26 + $0x2a8] sm:$0xff] %v299_v9  ;;  %v303_v11 = vld [vmem:[%s3386_s25 + $0x55c] sm:$0xff]  ;;  %v305_v12 = vld [vmem:[%s3386_s25 + $0x564] sm:$0xff] }
  0x36   : > { %302 = vst [vmem:[%s3391_s26 + $0x2b0] sm:$0xff] %v301_v10  ;;  %v307_v13 = vld [vmem:[%s3386_s25 + $0x56c] sm:$0xff]  ;;  %304 = vst [vmem:[%s3391_s26 + $0x2bc] sm:$0xff] %v303_v11  ;;  %v309_v14 = vld [vmem:[%s3386_s25 + $0x578] sm:$0xff] }
  0x37   : > { %306 = vst [vmem:[%s3391_s26 + $0x2c4] sm:$0xff] %v305_v12  ;;  %308 = vst [vmem:[%s3391_s26 + $0x2cc] sm:$0xff] %v307_v13  ;;  %v311_v15 = vld [vmem:[%s3386_s25 + $0x580] sm:$0xff]  ;;  %v313_v16 = vld [vmem:[%s3386_s25 + $0x588] sm:$0xff] }
  0x38   : > { %310 = vst [vmem:[%s3391_s26 + $0x2d8] sm:$0xff] %v309_v14  ;;  %312 = vst [vmem:[%s3391_s26 + $0x2e0] sm:$0xff] %v311_v15  ;;  %v315_v17 = vld [vmem:[%s3386_s25 + $0x594] sm:$0xff]  ;;  %v317_v18 = vld [vmem:[%s3386_s25 + $0x59c] sm:$0xff] }
  0x39   : > { %314 = vst [vmem:[%s3391_s26 + $0x2e8] sm:$0xff] %v313_v16  ;;  %v319_v19 = vld [vmem:[%s3386_s25 + $0x5a4] sm:$0xff]  ;;  %316 = vst [vmem:[%s3391_s26 + $0x2f4] sm:$0xff] %v315_v17  ;;  %v321_v20 = vld [vmem:[%s3386_s25 + $0x5b0] sm:$0xff] }
  0x3a   : > { %318 = vst [vmem:[%s3391_s26 + $0x2fc] sm:$0xff] %v317_v18  ;;  %320 = vst [vmem:[%s3391_s26 + $0x304] sm:$0xff] %v319_v19  ;;  %v323_v21 = vld [vmem:[%s3386_s25 + $0x5b8] sm:$0xff]  ;;  %v325_v22 = vld [vmem:[%s3386_s25 + $0x5c0] sm:$0xff] }
  0x3b   : > { %322 = vst [vmem:[%s3391_s26 + $0x310] sm:$0xff] %v321_v20  ;;  %324 = vst [vmem:[%s3391_s26 + $0x318] sm:$0xff] %v323_v21  ;;  %v327_v23 = vld [vmem:[%s3386_s25 + $0x5cc] sm:$0xff]  ;;  %v329_v24 = vld [vmem:[%s3386_s25 + $0x5d4] sm:$0xff] }
  0x3c   : > { %326 = vst [vmem:[%s3391_s26 + $0x320] sm:$0xff] %v325_v22  ;;  %v331_v25 = vld [vmem:[%s3386_s25 + $0x5dc] sm:$0xff]  ;;  %328 = vst [vmem:[%s3391_s26 + $0x32c] sm:$0xff] %v327_v23  ;;  %v333_v26 = vld [vmem:[%s3386_s25 + $0x5e8] sm:$0xff] }
  0x3d   : > { %330 = vst [vmem:[%s3391_s26 + $0x334] sm:$0xff] %v329_v24  ;;  %332 = vst [vmem:[%s3391_s26 + $0x33c] sm:$0xff] %v331_v25  ;;  %v335_v27 = vld [vmem:[%s3386_s25 + $0x5f0] sm:$0xff]  ;;  %v337_v28 = vld [vmem:[%s3386_s25 + $0x5f8] sm:$0xff] }
  0x3e   : > { %334 = vst [vmem:[%s3391_s26 + $0x348] sm:$0xff] %v333_v26  ;;  %336 = vst [vmem:[%s3391_s26 + $0x350] sm:$0xff] %v335_v27  ;;  %v339_v29 = vld [vmem:[%s3386_s25 + $0x604] sm:$0xff]  ;;  %v341_v30 = vld [vmem:[%s3386_s25 + $0x60c] sm:$0xff] }
  0x3f   : > { %338 = vst [vmem:[%s3391_s26 + $0x358] sm:$0xff] %v337_v28  ;;  %v343_v31 = vld [vmem:[%s3386_s25 + $0x614] sm:$0xff]  ;;  %340 = vst [vmem:[%s3391_s26 + $0x364] sm:$0xff] %v339_v29  ;;  %v2405_v34 = vld [vmem:[%s3386_s25 + $0x50] sm:$0xf] }
  0x40   : > { %342 = vst [vmem:[%s3391_s26 + $0x36c] sm:$0xff] %v341_v30  ;;  %344 = vst [vmem:[%s3391_s26 + $0x374] sm:$0xff] %v343_v31  ;;  %v2401_v32 = vld [vmem:[%s3386_s25 + $0x18] sm:$0xf]  ;;  %v2403_v33 = vld [vmem:[%s3386_s25 + $0x34] sm:$0xf] }
  0x41   : > { %2402 = vst [vmem:[%s3391_s26 + $0x18] sm:$0xf] %v2401_v32  ;;  %2404 = vst [vmem:[%s3391_s26 + $0x34] sm:$0xf] %v2403_v33  ;;  %v2407_v35 = vld [vmem:[%s3386_s25 + $0x6c] sm:$0xf] }
  0x42   : > { %2406 = vst [vmem:[%s3391_s26 + $0x50] sm:$0xf] %v2405_v34  ;;  %v2409_v36 = vld [vmem:[%s3386_s25 + $0x88] sm:$0xf]  ;;  %v2411_v37 = vld [vmem:[%s3386_s25 + $0xa4] sm:$0xf] }
  0x43   : > { %2408 = vst [vmem:[%s3391_s26 + $0x6c] sm:$0xf] %v2407_v35  ;;  %2410 = vst [vmem:[%s3391_s26 + $0x88] sm:$0xf] %v2409_v36  ;;  %v2413_v38 = vld [vmem:[%s3386_s25 + $0xc0] sm:$0xf] }
  0x44   : > { %2412 = vst [vmem:[%s3391_s26 + $0xa4] sm:$0xf] %v2411_v37  ;;  %v2415_v39 = vld [vmem:[%s3386_s25 + $0xdc] sm:$0xf]  ;;  %v2417_v40 = vld [vmem:[%s3386_s25 + $0x1d8] sm:$0xf] }
  0x45   : > { %2414 = vst [vmem:[%s3391_s26 + $0xc0] sm:$0xf] %v2413_v38  ;;  %2416 = vst [vmem:[%s3391_s26 + $0xdc] sm:$0xf] %v2415_v39  ;;  %v2419_v41 = vld [vmem:[%s3386_s25 + $0x1f4] sm:$0xf] }
  0x46   : > { %2418 = vst [vmem:[%s3391_s26 + $0xf8] sm:$0xf] %v2417_v40  ;;  %v2421_v42 = vld [vmem:[%s3386_s25 + $0x210] sm:$0xf]  ;;  %v2423_v43 = vld [vmem:[%s3386_s25 + $0x22c] sm:$0xf] }
  0x47   : > { %2420 = vst [vmem:[%s3391_s26 + $0x114] sm:$0xf] %v2419_v41  ;;  %2422 = vst [vmem:[%s3391_s26 + $0x130] sm:$0xf] %v2421_v42  ;;  %v2425_v44 = vld [vmem:[%s3386_s25 + $0x248] sm:$0xf] }
  0x48   : > { %2424 = vst [vmem:[%s3391_s26 + $0x14c] sm:$0xf] %v2423_v43  ;;  %v2427_v45 = vld [vmem:[%s3386_s25 + $0x264] sm:$0xf]  ;;  %v2429_v46 = vld [vmem:[%s3386_s25 + $0x280] sm:$0xf] }
  0x49   : > { %2426 = vst [vmem:[%s3391_s26 + $0x168] sm:$0xf] %v2425_v44  ;;  %2428 = vst [vmem:[%s3391_s26 + $0x184] sm:$0xf] %v2427_v45  ;;  %v2431_v47 = vld [vmem:[%s3386_s25 + $0x29c] sm:$0xf] }
  0x4a   : > { %2430 = vst [vmem:[%s3391_s26 + $0x1a0] sm:$0xf] %v2429_v46  ;;  %v2433_v48 = vld [vmem:[%s3386_s25 + $0x398] sm:$0xf]  ;;  %v2435_v49 = vld [vmem:[%s3386_s25 + $0x3b4] sm:$0xf] }
  0x4b   : > { %2432 = vst [vmem:[%s3391_s26 + $0x1bc] sm:$0xf] %v2431_v47  ;;  %2434 = vst [vmem:[%s3391_s26 + $0x1d8] sm:$0xf] %v2433_v48  ;;  %v2437_v50 = vld [vmem:[%s3386_s25 + $0x3d0] sm:$0xf] }
  0x4c   : > { %2436 = vst [vmem:[%s3391_s26 + $0x1f4] sm:$0xf] %v2435_v49  ;;  %v2439_v51 = vld [vmem:[%s3386_s25 + $0x3ec] sm:$0xf]  ;;  %v2441_v52 = vld [vmem:[%s3386_s25 + $0x408] sm:$0xf] }
  0x4d   : > { %2438 = vst [vmem:[%s3391_s26 + $0x210] sm:$0xf] %v2437_v50  ;;  %2440 = vst [vmem:[%s3391_s26 + $0x22c] sm:$0xf] %v2439_v51  ;;  %v2443_v53 = vld [vmem:[%s3386_s25 + $0x424] sm:$0xf] }
  0x4e   : > { %2442 = vst [vmem:[%s3391_s26 + $0x248] sm:$0xf] %v2441_v52  ;;  %v2445_v54 = vld [vmem:[%s3386_s25 + $0x440] sm:$0xf]  ;;  %v2447_v55 = vld [vmem:[%s3386_s25 + $0x45c] sm:$0xf] }
  0x4f   : > { %2444 = vst [vmem:[%s3391_s26 + $0x264] sm:$0xf] %v2443_v53  ;;  %2446 = vst [vmem:[%s3391_s26 + $0x280] sm:$0xf] %v2445_v54  ;;  %v2449_v56 = vld [vmem:[%s3386_s25 + $0x558] sm:$0xf] }
  0x50   : > { %2448 = vst [vmem:[%s3391_s26 + $0x29c] sm:$0xf] %v2447_v55  ;;  %v2451_v57 = vld [vmem:[%s3386_s25 + $0x574] sm:$0xf]  ;;  %v2453_v58 = vld [vmem:[%s3386_s25 + $0x590] sm:$0xf] }
  0x51   : > { %2450 = vst [vmem:[%s3391_s26 + $0x2b8] sm:$0xf] %v2449_v56  ;;  %2452 = vst [vmem:[%s3391_s26 + $0x2d4] sm:$0xf] %v2451_v57  ;;  %v2455_v59 = vld [vmem:[%s3386_s25 + $0x5ac] sm:$0xf] }
  0x52   : > { %2454 = vst [vmem:[%s3391_s26 + $0x2f0] sm:$0xf] %v2453_v58  ;;  %v2457_v60 = vld [vmem:[%s3386_s25 + $0x5c8] sm:$0xf]  ;;  %v2459_v61 = vld [vmem:[%s3386_s25 + $0x5e4] sm:$0xf] }
  0x53   : > { %2456 = vst [vmem:[%s3391_s26 + $0x30c] sm:$0xf] %v2455_v59  ;;  %2458 = vst [vmem:[%s3391_s26 + $0x328] sm:$0xf] %v2457_v60  ;;  %v2461_v62 = vld [vmem:[%s3386_s25 + $0x600] sm:$0xf] }
  0x54   : > { %2460 = vst [vmem:[%s3391_s26 + $0x344] sm:$0xf] %v2459_v61  ;;  %v2463_v63 = vld [vmem:[%s3386_s25 + $0x61c] sm:$0xf]  ;;  %2462 = vst [vmem:[%s3391_s26 + $0x360] sm:$0xf] %v2461_v62 }
  0x55   : > { %2464 = vst [vmem:[%s3391_s26 + $0x37c] sm:$0xf] %v2463_v63 }
  0x56 PF: > { %p2465_p5 = scmp.ge.s32.totalorder %s3330_s14, 1  ;;  %p421_p6 = scmp.lt.s32.totalorder %s3330_s14, 3 }
  0x58   : > { %p422_p7 = pnand %p2465_p5, %p421_p6 }
  0x5a   : > { %425 = sbr.rel (%p422_p7) target bundleno = 560 (0x230), region = 54 }
  0x5f   : > { %v3098_v0 = vld [vmem:[%s4286_s1 + $0x78] sm:$0xff]   ;;  %v3100_v2 = vld [vmem:[%s4286_s1 + $0x70] sm:$0xff]   ;;  %v3102_v4 = vld [vmem:[%s4286_s1 + $0x68] sm:$0xff]   ;;  %s428_s17 = sand.u32 1, %s3322_s12   ;;  %vm1547_vm0 = vcmask 261120   ;;  %vm2319_vm1 = vcmask 519168  }
  0x60   : > { %v3099_v1 = vld [vmem:[%s4286_s1 + $0x38] sm:$0xff]   ;;  %2665 = vmatprep.subr.bf16.mxu0 %v3098_v0  ;;  %3055 = vmatprep.subr.bf16.mxu1 %v3098_v0  ;;  %v3101_v3 = vld [vmem:[%s4286_s1 + $0x30] sm:$0xff]   ;;  %v3103_v5 = vld [vmem:[%s4286_s1 + $0x28] sm:$0xff]   ;;  %s3073_s21 = smul.u32 896, %s428_s17 }
  0x61   : > { %2666 = vmatpush3.bf16.msra.mxu0 %v3099_v1  ;;  %3063 = vmatpush3.bf16.msra.mxu1 %v3099_v1  ;;  %v3104_v6 = vld [vmem:[%s4286_s1 + $0x60] sm:$0xff]   ;;  %v3106_v8 = vld [vmem:[%s4286_s1 + $0x58] sm:$0xff]   ;;  %v3108_v10 = vld [vmem:[%s4286_s1 + $0x50] sm:$0xff]  }
  0x62   : > { %2667 = vmatprep.subr.bf16.mxu0 %v3100_v2  ;;  %3056 = vmatprep.subr.bf16.mxu1 %v3100_v2  ;;  %v3105_v7 = vld [vmem:[%s4286_s1 + $0x20] sm:$0xff]   ;;  %v3107_v9 = vld [vmem:[%s4286_s1 + $0x18] sm:$0xff]   ;;  %s3682_s29 = scalar_lea.vmem [#allocation2], %s3073_s21  ;;  %v3109_v13 = vld [vmem:[%s4286_s1 + $0x10] sm:$0xff]  }
  0x63   : > { %v3116_v11 = vld [vmem:[%s3682_s29 + $0x4] ss:$28 sps:$4 sm:$0xff]   ;;  %v3110_v14 = vld [vmem:[%s4286_s1 + $0x48] sm:$0xff]   ;;  %v3120_v18 = vld [vmem:[%s4286_s1 + $0xf8] sm:$0xff]  }
  0x64   : > { %v3119_v12 = vld [vmem:[%s3682_s29 + $0x2a4] ss:$28 sps:$4 sm:$0xff]   ;;  %1628 = vmatprep.mubr.bf16.mxu0 %v3116_v11  ;;  %v3111_v15 = vld [vmem:[%s4286_s1 + $0x8] sm:$0xff]   ;;  %v3121_v21 = vld [vmem:[%s4286_s1 + $0x178] sm:$0xff]  }
  0x65   : > { %2668 = vmatpush3.bf16.msra.mxu0 %v3101_v3  ;;  %3064 = vmatpush3.bf16.msra.mxu1 %v3101_v3  ;;  %v3112_v16 = vld [vmem:[%s4286_s1 + $0x40] sm:$0xff]   ;;  %v3122_v22 = vld [vmem:[%s4286_s1 + $0xb8] sm:$0xff]   ;;  %v3124_v24 = vld [vmem:[%s4286_s1 + $0xf0] sm:$0xff]  }
  0x66   : > { %2669 = vmatprep.subr.bf16.mxu0 %v3102_v4  ;;  %3057 = vmatprep.subr.bf16.mxu1 %v3102_v4  ;;  %v3113_v17 = vld [vmem:[%s4286_s1] sm:$0xff]   ;;  %v3123_v23 = vld [vmem:[%s4286_s1 + $0x138] sm:$0xff]   ;;  %v3135_v27 = vld [vmem:[%s4286_s1 + $0x170] sm:$0xff]  }
  0x67   : > { %1724 = vmatprep.mubr.bf16.mxu1 %v3119_v12  ;;  %v3114_v19 = vld [vmem:[%s3682_s29] ss:$28 sps:$4 sm:$0xff]   ;;  %v3125_v28 = vld [vmem:[%s4286_s1 + $0xb0] sm:$0xff]   ;;  %v3132_v32 = vld [vmem:[%s4286_s1 + $0xe8] sm:$0xff]  }
  0x68   : > { %v3117_v20 = vld [vmem:[%s3682_s29 + $0x2a0] ss:$28 sps:$4 sm:$0xff]   ;;  %v3137_v29 = vld [vmem:[%s4286_s1 + $0x130] sm:$0xff]   ;;  %v3133_v33 = vld [vmem:[%s4286_s1 + $0xa8] sm:$0xff]  }
  0x69   : > { %2670 = vmatpush3.bf16.msra.mxu0 %v3103_v5  ;;  %3065 = vmatpush3.bf16.msra.mxu1 %v3103_v5  ;;  %v3126_v25 = vld [vmem:[%s3682_s29 + $0x3c] ss:$28 sps:$4 sm:$0xff]   ;;  %v3134_v34 = vld [vmem:[%s4286_s1 + $0xe0] sm:$0xff]   ;;  %v3138_v35 = vld [vmem:[%s3682_s29 + $0x74] ss:$28 sps:$4 sm:$0xff]  }
  0x6a   : > { %2671 = vmatprep.subr.bf16.mxu0 %v3104_v6  ;;  %3058 = vmatprep.subr.bf16.mxu1 %v3104_v6  ;;  %v3128_v26 = vld [vmem:[%s3682_s29 + $0x2dc] ss:$28 sps:$4 sm:$0xff]   ;;  %v3140_v36 = vld [vmem:[%s3682_s29 + $0x314] ss:$28 sps:$4 sm:$0xff]   ;;  %v3136_v37 = vld [vmem:[%s4286_s1 + $0xa0] sm:$0xff]  }
  0x6b   : > { %v3130_v30 = vld [vmem:[%s3682_s29 + $0x38] ss:$28 sps:$4 sm:$0xff]   ;;  %v3142_v39 = vld [vmem:[%s3682_s29 + $0x70] ss:$28 sps:$4 sm:$0xff]   ;;  %v3152_v49 = vld [vmem:[%s3682_s29 + $0xa8] ss:$28 sps:$4 sm:$0xff]  }
  0x6c   : > { %v3131_v31 = vld [vmem:[%s3682_s29 + $0x2d8] ss:$28 sps:$4 sm:$0xff]   ;;  %v3143_v40 = vld [vmem:[%s3682_s29 + $0x310] ss:$28 sps:$4 sm:$0xff]   ;;  %v3153_v50 = vld [vmem:[%s3682_s29 + $0x348] ss:$28 sps:$4 sm:$0xff]  }
  0x6d   : > { %2672 = vmatpush3.bf16.msra.mxu0 %v3105_v7  ;;  %3066 = vmatpush3.bf16.msra.mxu1 %v3105_v7  ;;  %v3144_v38 = vld [vmem:[%s4286_s1 + $0xd8] sm:$0xff]   ;;  %v3155_v41 = vld [vmem:[%s4286_s1 + $0x168] sm:$0xff]   ;;  %v3146_v43 = vld [vmem:[%s4286_s1 + $0xd0] sm:$0xff]  }
  0x6e   : > { %2673 = vmatprep.subr.bf16.mxu0 %v3106_v8  ;;  %3059 = vmatprep.subr.bf16.mxu1 %v3106_v8  ;;  %v3145_v42 = vld [vmem:[%s4286_s1 + $0x98] sm:$0xff]   ;;  %v3157_v44 = vld [vmem:[%s4286_s1 + $0x128] sm:$0xff]   ;;  %v3147_v47 = vld [vmem:[%s4286_s1 + $0x90] sm:$0xff]  }
  0x6f   : > { %v3148_v45 = vld [vmem:[%s3682_s29 + $0xac] ss:$28 sps:$4 sm:$0xff]   ;;  %v3166_v51 = vld [vmem:[%s4286_s1 + $0x160] sm:$0xff]   ;;  %v3181_v60 = vld [vmem:[%s4286_s1 + $0x158] sm:$0xff]  }
  0x70   : > { %v3150_v46 = vld [vmem:[%s3682_s29 + $0x34c] ss:$28 sps:$4 sm:$0xff]   ;;  %v3168_v53 = vld [vmem:[%s4286_s1 + $0x120] sm:$0xff]   ;;  %v3182_v61 = vld [vmem:[%s4286_s1 + $0x118] sm:$0xff]  }
  0x71   : > { %2674 = vmatpush3.bf16.msra.mxu0 %v3107_v9  ;;  %3067 = vmatpush3.bf16.msra.mxu1 %v3107_v9  ;;  %v3154_v48 = vld [vmem:[%s4286_s1 + $0xc8] sm:$0xff]   ;;  %v3160_v54 = vld [vmem:[%s3682_s29 + $0xe4] ss:$28 sps:$4 sm:$0xff]   ;;  %v3169_v63 = vld [vmem:[%s3682_s29 + $0x11c] ss:$28 sps:$4 sm:$0xff]  }
  0x72   : > { %2675 = vmatprep.subr.bf16.mxu0 %v3108_v10  ;;  %3060 = vmatprep.subr.bf16.mxu1 %v3108_v10  ;;  %v3156_v52 = vld [vmem:[%s4286_s1 + $0x88] sm:$0xff]   ;;  %v3158_v55 = vld [vmem:[%s4286_s1 + $0xc0] sm:$0xff]   ;;  %v3189_v1 = vld [vmem:[%s4286_s1 + $0x150] sm:$0xff]  }
  0x73   : > { %v3164_v56 = vld [vmem:[%s3682_s29 + $0xc] ss:$28 sps:$4 sm:$0xff]   ;;  %v3159_v57 = vld [vmem:[%s4286_s1 + $0x80] sm:$0xff]   ;;  %v3190_v2 = vld [vmem:[%s4286_s1 + $0x110] sm:$0xff]  }
  0x74   : > { %v3167_v58 = vld [vmem:[%s4286_s1 + $0x188] sm:$0xff]   ;;  %v3165_v62 = vld [vmem:[%s3682_s29 + $0xe0] ss:$28 sps:$4 sm:$0xff]   ;;  %v3173_v3 = vld [vmem:[%s3682_s29 + $0x118] ss:$28 sps:$4 sm:$0xff]  }
  0x75   : > { %2676 = vmatpush3.bf16.msra.mxu0 %v3109_v13  ;;  %3068 = vmatpush3.bf16.msra.mxu1 %v3109_v13  ;;  %v3162_v59 = vld [vmem:[%s3682_s29 + $0x8] ss:$28 sps:$4 sm:$0xff]   ;;  %v3174_v4 = vld [vmem:[%s3682_s29 + $0x40] ss:$28 sps:$4 sm:$0xff]   ;;  %v3175_v5 = vld [vmem:[%s3682_s29 + $0x154] ss:$28 sps:$4 sm:$0xff]  }
  0x76   : > { %2677 = vmatprep.subr.bf16.mxu0 %v3110_v14  ;;  %3061 = vmatprep.subr.bf16.mxu1 %v3110_v14  ;;  %v3171_v0 = vld [vmem:[%s3682_s29 + $0x44] ss:$28 sps:$4 sm:$0xff]   ;;  %v3177_v6 = vld [vmem:[%s3682_s29 + $0x7c] ss:$28 sps:$4 sm:$0xff]   ;;  %v3203_v7 = vld [vmem:[%s4286_s1 + $0x148] sm:$0xff]  }
  0x77   : > { %v3204_v8 = vld [vmem:[%s4286_s1 + $0x108] sm:$0xff]   ;;  %v3180_v10 = vld [vmem:[%s3682_s29 + $0x78] ss:$28 sps:$4 sm:$0xff]   ;;  %v3211_v12 = vld [vmem:[%s4286_s1 + $0x140] sm:$0xff]  }
  0x78   : > { %v3179_v9 = vld [vmem:[%s3682_s29 + $0x150] ss:$28 sps:$4 sm:$0xff]   ;;  %v3212_v13 = vld [vmem:[%s4286_s1 + $0x100] sm:$0xff]  }
  0x79   : > { %2678 = vmatpush3.bf16.msra.mxu0 %v3111_v15  ;;  %3069 = vmatpush3.bf16.msra.mxu1 %v3111_v15  ;;  %v3183_v11 = vld [vmem:[%s3682_s29 + $0x18c] ss:$28 sps:$4 sm:$0xff]   ;;  %v3185_v14 = vld [vmem:[%s3682_s29 + $0xb4] ss:$28 sps:$4 sm:$0xff]   ;;  %v3225_v15 = vld [vmem:[%s4286_s1 + $0x180] sm:$0xff]  }
  0x7a   : > { %2679 = vmatprep.subr.bf16.mxu0 %v3112_v16  ;;  %3062 = vmatprep.subr.bf16.mxu1 %v3112_v16  ;;  %v3187_v16 = vld [vmem:[%s3682_s29 + $0x188] ss:$28 sps:$4 sm:$0xff]  }
  0x7d   : > { %2680 = vmatpush3.bf16.msra.mxu0 %v3113_v17  ;;  %3070 = vmatpush3.bf16.msra.mxu1 %v3113_v17  ;;  %v3188_v17 = vld [vmem:[%s3682_s29 + $0xb0] ss:$28 sps:$4 sm:$0xff]  }
  0x7e   : > { %2777 = vmatprep.subr.bf16.mxu1 %v3120_v18  ;;  %2889 = vmatprep.subr.bf16.mxu0 %v3121_v21  ;;  %v3191_v18 = vld [vmem:[%s3682_s29 + $0x1c4] ss:$28 sps:$4 sm:$0xff]  }
  0x7f   : > { %v3196_v21 = vld [vmem:[%s3682_s29 + $0xe8] ss:$28 sps:$4 sm:$0xff]  }
  0x80   : > { %1629 = vmatmul.mubr.bf16.vlgmr.msra.gmra.mxu0 %v3114_v19  ;;  %1725 = vmatmul.mubr.bf16.vlgmr.msra.gmra.mxu1 %v3117_v20  ;;  %v3193_v19 = vld [vmem:[%s3682_s29 + $0xec] ss:$28 sps:$4 sm:$0xff]   ;;  %v3195_v20 = vld [vmem:[%s3682_s29 + $0x1c0] ss:$28 sps:$4 sm:$0xff]  }
  0x81   : > { %2778 = vmatpush3.bf16.msra.mxu1 %v3122_v22  ;;  %2890 = vmatpush3.bf16.msra.mxu0 %v3123_v23  ;;  %v3197_v22 = vld [vmem:[%s3682_s29 + $0x1fc] ss:$28 sps:$4 sm:$0xff]   ;;  %v3199_v23 = vld [vmem:[%s3682_s29 + $0x124] ss:$28 sps:$4 sm:$0xff]  }
  0x82   : > { %2779 = vmatprep.subr.bf16.mxu1 %v3124_v24  ;;  %1636 = vmatprep.mubr.bf16.mxu0 %v3126_v25  ;;  %v3201_v24 = vld [vmem:[%s3682_s29 + $0x1f8] ss:$28 sps:$4 sm:$0xff]   ;;  %v3202_v25 = vld [vmem:[%s3682_s29 + $0x120] ss:$28 sps:$4 sm:$0xff]  }
  0x83   : > { %1732 = vmatprep.mubr.bf16.mxu1 %v3128_v26  ;;  %2891 = vmatprep.subr.bf16.mxu0 %v3135_v27  ;;  %v3205_v26 = vld [vmem:[%s3682_s29 + $0x234] ss:$28 sps:$4 sm:$0xff]   ;;  %v3207_v27 = vld [vmem:[%s3682_s29 + $0x15c] ss:$28 sps:$4 sm:$0xff]  }
  0x85   : > { %2780 = vmatpush3.bf16.msra.mxu1 %v3125_v28  ;;  %2892 = vmatpush3.bf16.msra.mxu0 %v3137_v29  ;;  %v3209_v28 = vld [vmem:[%s3682_s29 + $0x230] ss:$28 sps:$4 sm:$0xff]   ;;  %v3210_v29 = vld [vmem:[%s3682_s29 + $0x158] ss:$28 sps:$4 sm:$0xff]  }
  0x86   : > { %2781 = vmatprep.subr.bf16.mxu1 %v3132_v32  ;;  %2893 = vmatprep.subr.bf16.mxu0 %v3155_v41  ;;  %v3217_v32 = vld [vmem:[%s3682_s29 + $0x268] ss:$28 sps:$4 sm:$0xff]  }
  0x87   : > { %v3231_v41 = vld [vmem:[%s3682_s29 + $0x48] ss:$28 sps:$4 sm:$0xff]  }
  0x88   : > { %1637 = vmatmul.mubr.bf16.gmra.mxu0 %v3130_v30  ;;  %1733 = vmatmul.mubr.bf16.gmra.mxu1 %v3131_v31  ;;  %v3213_v30 = vld [vmem:[%s3682_s29 + $0x26c] ss:$28 sps:$4 sm:$0xff]   ;;  %v3215_v31 = vld [vmem:[%s3682_s29 + $0x194] ss:$28 sps:$4 sm:$0xff]  }
  0x89   : > { %2782 = vmatpush3.bf16.msra.mxu1 %v3133_v33  ;;  %1644 = vmatprep.mubr.bf16.mxu0 %v3138_v35  ;;  %v3218_v33 = vld [vmem:[%s3682_s29 + $0x190] ss:$28 sps:$4 sm:$0xff]  }
  0x8a   : > { %2783 = vmatprep.subr.bf16.mxu1 %v3134_v34  ;;  %1740 = vmatprep.mubr.bf16.mxu1 %v3140_v36  ;;  %v3219_v34 = vld [vmem:[%s3682_s29 + $0x1cc] ss:$28 sps:$4 sm:$0xff]   ;;  %v3223_v35 = vld [vmem:[%s3682_s29 + $0x14] ss:$28 sps:$4 sm:$0xff]  }
  0x8b   : > { %2894 = vmatpush3.bf16.msra.mxu0 %v3157_v44  ;;  %v3221_v36 = vld [vmem:[%s3682_s29 + $0x10] ss:$28 sps:$4 sm:$0xff]   ;;  %v3236_v44 = vld [vmem:[%s3682_s29 + $0x238] ss:$28 sps:$4 sm:$0xff]  }
  0x8c   : > { %2895 = vmatprep.subr.bf16.mxu0 %v3166_v51  ;;  %v3246_v51 = vld [vmem:[%s3682_s29 + $0xf4] ss:$28 sps:$4 sm:$0xff]  }
  0x8d   : > { %2784 = vmatpush3.bf16.msra.mxu1 %v3136_v37  ;;  %v3224_v37 = vld [vmem:[%s3682_s29 + $0x1c8] ss:$28 sps:$4 sm:$0xff]  }
  0x8e   : > { %2785 = vmatprep.subr.bf16.mxu1 %v3144_v38  ;;  %v3226_v38 = vld [vmem:[%s3682_s29 + $0x204] ss:$28 sps:$4 sm:$0xff]  }
  0x8f   : > { %2896 = vmatpush3.bf16.msra.mxu0 %v3168_v53  ;;  %v3249_v53 = vld [vmem:[%s3682_s29 + $0xf0] ss:$28 sps:$4 sm:$0xff]  }
  0x90   : > { %1645 = vmatmul.mubr.bf16.gmra.mxu0 %v3142_v39  ;;  %1741 = vmatmul.mubr.bf16.gmra.mxu1 %v3143_v40  ;;  %v3228_v39 = vld [vmem:[%s3682_s29 + $0x4c] ss:$28 sps:$4 sm:$0xff]   ;;  %v3230_v40 = vld [vmem:[%s3682_s29 + $0x200] ss:$28 sps:$4 sm:$0xff]  }
  0x91   : > { %2786 = vmatpush3.bf16.msra.mxu1 %v3145_v42  ;;  %1652 = vmatprep.mubr.bf16.mxu0 %v3148_v45  ;;  %v3232_v42 = vld [vmem:[%s3682_s29 + $0x23c] ss:$28 sps:$4 sm:$0xff]  }
  0x92   : > { %2787 = vmatprep.subr.bf16.mxu1 %v3146_v43  ;;  %1748 = vmatprep.mubr.bf16.mxu1 %v3150_v46  ;;  %v3234_v43 = vld [vmem:[%s3682_s29 + $0x84] ss:$28 sps:$4 sm:$0xff]   ;;  %v3238_v46 = vld [vmem:[%s3682_s29 + $0x274] ss:$28 sps:$4 sm:$0xff]  }
  0x93   : > { %2897 = vmatprep.subr.bf16.mxu0 %v3181_v60  ;;  %v3237_v45 = vld [vmem:[%s3682_s29 + $0x80] ss:$28 sps:$4 sm:$0xff]   ;;  %v3260_v60 = vld [vmem:[%s3682_s29 + $0x318] ss:$28 sps:$4 sm:$0xff]  }
  0x94   : > { %2898 = vmatpush3.bf16.msra.mxu0 %v3182_v61  ;;  %v3261_v61 = vld [vmem:[%s3682_s29 + $0x160] ss:$28 sps:$4 sm:$0xff]  }
  0x95   : > { %2788 = vmatpush3.bf16.msra.mxu1 %v3147_v47  ;;  %2899 = vmatprep.subr.bf16.mxu0 %v3189_v1  ;;  %v3240_v47 = vld [vmem:[%s3682_s29 + $0xbc] ss:$28 sps:$4 sm:$0xff]  }
  0x96   : > { %2789 = vmatprep.subr.bf16.mxu1 %v3154_v48  ;;  %v3242_v48 = vld [vmem:[%s3682_s29 + $0x270] ss:$28 sps:$4 sm:$0xff]   ;;  %v3267_v1 = vld [vmem:[%s3682_s29 + $0x198] ss:$28 sps:$4 sm:$0xff]  }
  0x98   : > { %1653 = vmatmul.mubr.bf16.gmra.mxu0 %v3152_v49  ;;  %1749 = vmatmul.mubr.bf16.gmra.mxu1 %v3153_v50  ;;  %v3243_v49 = vld [vmem:[%s3682_s29 + $0xb8] ss:$28 sps:$4 sm:$0xff]   ;;  %v3244_v50 = vld [vmem:[%s3682_s29 + $0x2ac] ss:$28 sps:$4 sm:$0xff]  }
  0x99   : > { %2790 = vmatpush3.bf16.msra.mxu1 %v3156_v52  ;;  %1660 = vmatprep.mubr.bf16.mxu0 %v3160_v54  ;;  %v3248_v52 = vld [vmem:[%s3682_s29 + $0x2a8] ss:$28 sps:$4 sm:$0xff]  }
  0x9a   : > { %2791 = vmatprep.subr.bf16.mxu1 %v3158_v55  ;;  %1789 = vmatprep.mubr.bf16.mxu1 %v3164_v56  ;;  %v3250_v54 = vld [vmem:[%s3682_s29 + $0x2e4] ss:$28 sps:$4 sm:$0xff]   ;;  %v3252_v55 = vld [vmem:[%s3682_s29 + $0x12c] ss:$28 sps:$4 sm:$0xff]  }
  0x9b   : > { %2900 = vmatpush3.bf16.msra.mxu0 %v3190_v2  ;;  %v3254_v56 = vld [vmem:[%s3682_s29 + $0x2e0] ss:$28 sps:$4 sm:$0xff]   ;;  %v3268_v2 = vld [vmem:[%s3682_s29 + $0x1d4] ss:$28 sps:$4 sm:$0xff]  }
  0x9c   : > { %2901 = vmatprep.subr.bf16.mxu0 %v3203_v7  ;;  %v3275_v7 = vld [vmem:[%s3682_s29 + $0x88] ss:$28 sps:$4 sm:$0xff]  }
  0x9d   : > { %2792 = vmatpush3.bf16.msra.mxu1 %v3159_v57  ;;  %v3255_v57 = vld [vmem:[%s3682_s29 + $0x128] ss:$28 sps:$4 sm:$0xff]  }
  0x9e   : > { %3019 = vmatprep.subr.bf16.mxu1 %v3167_v58 }
  0x9f   : > { %2902 = vmatpush3.bf16.msra.mxu0 %v3204_v8  ;;  %v3276_v8 = vld [vmem:[%s3682_s29 + $0x208] ss:$28 sps:$4 sm:$0xff]  }
  0xa0   : > { %1661 = vmatmul.mubr.bf16.gmra.mxu0 %v3165_v62  ;;  %1790 = vmatmul.mubr.bf16.vlgmr.msra.gmra.mxu1 %v3162_v59  ;;  %v3258_v59 = vld [vmem:[%s3682_s29 + $0x164] ss:$28 sps:$4 sm:$0xff]   ;;  %v3262_v62 = vld [vmem:[%s3682_s29 + $0x354] ss:$28 sps:$4 sm:$0xff]  }
  0xa1   : > { %3020 = vmatpush3.bf16.msra.mxu1 %v3167_v58  ;;  %1668 = vmatprep.mubr.bf16.mxu0 %v3169_v63  ;;  %v3256_v58 = vld [vmem:[%s3682_s29 + $0x31c] ss:$28 sps:$4 sm:$0xff]  }
  0xa2   : > { %1797 = vmatprep.mubr.bf16.mxu1 %v3171_v0  ;;  %2903 = vmatprep.subr.bf16.mxu0 %v3211_v12  ;;  %v3264_v63 = vld [vmem:[%s3682_s29 + $0x19c] ss:$28 sps:$4 sm:$0xff]   ;;  %v3266_v0 = vld [vmem:[%s3682_s29 + $0x350] ss:$28 sps:$4 sm:$0xff]  }
  0xa3   : > { %2904 = vmatpush3.bf16.msra.mxu0 %v3212_v13  ;;  %3021 = vmatprep.subr.bf16.mxu1 %v3225_v15  ;;  %v3281_v12 = vld [vmem:[%s3682_s29 + $0x240] ss:$28 sps:$4 sm:$0xff]   ;;  %v3282_v13 = vld [vmem:[%s3682_s29 + $0x130] ss:$28 sps:$4 sm:$0xff]  }
  0xa5   : > { %3022 = vmatpush3.bf16.msra.mxu1 %v3225_v15  ;;  %v3285_v15 = vld [vmem:[%s3682_s29 + $0x168] ss:$28 sps:$4 sm:$0xff]  }
  0xa8   : > { %1669 = vmatmul.mubr.bf16.gmra.mxu0 %v3173_v3  ;;  %1798 = vmatmul.mubr.bf16.gmra.mxu1 %v3174_v4  ;;  %v3270_v3 = vld [vmem:[%s3682_s29 + $0x18] ss:$28 sps:$4 sm:$0xff]   ;;  %v3271_v4 = vld [vmem:[%s3682_s29 + $0x1d0] ss:$28 sps:$4 sm:$0xff]  }
  0xa9   : > { %1676 = vmatprep.mubr.bf16.mxu0 %v3175_v5  ;;  %1805 = vmatprep.mubr.bf16.mxu1 %v3177_v6  ;;  %v3272_v5 = vld [vmem:[%s3682_s29 + $0x50] ss:$28 sps:$4 sm:$0xff]  }
  0xaa   : > { %v3273_v6 = vld [vmem:[%s3682_s29 + $0x20c] ss:$28 sps:$4 sm:$0xff]  }
  0xb0   : > { %1677 = vmatmul.mubr.bf16.gmra.mxu0 %v3179_v9  ;;  %1806 = vmatmul.mubr.bf16.gmra.mxu1 %v3180_v10  ;;  %v3277_v9 = vld [vmem:[%s3682_s29 + $0xc0] ss:$28 sps:$4 sm:$0xff]  }
  0xb1   : > { %1684 = vmatprep.mubr.bf16.mxu0 %v3183_v11  ;;  %1813 = vmatprep.mubr.bf16.mxu1 %v3185_v14  ;;  %v3278_v10 = vld [vmem:[%s3682_s29 + $0x244] ss:$28 sps:$4 sm:$0xff]   ;;  %v3280_v11 = vld [vmem:[%s3682_s29 + $0xf8] ss:$28 sps:$4 sm:$0xff]  }
  0xb2   : > { %v3283_v14 = vld [vmem:[%s3682_s29 + $0x27c] ss:$28 sps:$4 sm:$0xff]  }
  0xb8   : > { %1685 = vmatmul.mubr.bf16.gmra.mxu0 %v3187_v16  ;;  %1814 = vmatmul.mubr.bf16.gmra.mxu1 %v3188_v17  ;;  %v3286_v16 = vld [vmem:[%s3682_s29 + $0x278] ss:$28 sps:$4 sm:$0xff]   ;;  %v3287_v17 = vld [vmem:[%s3682_s29 + $0x1a0] ss:$28 sps:$4 sm:$0xff]  }
  0xb9   : > { %1692 = vmatprep.mubr.bf16.mxu0 %v3191_v18  ;;  %1821 = vmatprep.mubr.bf16.mxu1 %v3193_v19  ;;  %v3288_v18 = vld [vmem:[%s3682_s29 + $0x2b4] ss:$28 sps:$4 sm:$0xff]  }
  0xba   : > { %v3290_v19 = vld [vmem:[%s3682_s29 + $0x1d8] ss:$28 sps:$4 sm:$0xff]  }
  0xc0   : > { %1693 = vmatmul.mubr.bf16.gmra.mxu0 %v3195_v20  ;;  %1822 = vmatmul.mubr.bf16.gmra.mxu1 %v3196_v21  ;;  %v3291_v20 = vld [vmem:[%s3682_s29 + $0x2b0] ss:$28 sps:$4 sm:$0xff]  }
  0xc1   : > { %1700 = vmatprep.mubr.bf16.mxu0 %v3197_v22  ;;  %1829 = vmatprep.mubr.bf16.mxu1 %v3199_v23  ;;  %v3292_v21 = vld [vmem:[%s3682_s29 + $0x210] ss:$28 sps:$4 sm:$0xff]   ;;  %v3295_v23 = vld [vmem:[%s3682_s29 + $0x248] ss:$28 sps:$4 sm:$0xff]  }
  0xc2   : > { %v3293_v22 = vld [vmem:[%s3682_s29 + $0x2ec] ss:$28 sps:$4 sm:$0xff]  }
  0xc8   : > { %1701 = vmatmul.mubr.bf16.gmra.mxu0 %v3201_v24  ;;  %1830 = vmatmul.mubr.bf16.gmra.mxu1 %v3202_v25 }
  0xc9   : > { %1708 = vmatprep.mubr.bf16.mxu0 %v3205_v26  ;;  %1837 = vmatprep.mubr.bf16.mxu1 %v3207_v27 }
  0xd0   : > { %1709 = vmatmul.mubr.bf16.gmra.mxu0 %v3209_v28  ;;  %1838 = vmatmul.mubr.bf16.gmra.mxu1 %v3210_v29 }
  0xd1   : > { %1716 = vmatprep.mubr.bf16.mxu0 %v3213_v30  ;;  %1845 = vmatprep.mubr.bf16.mxu1 %v3215_v31 }
  0xd8   : > { %1717 = vmatmul.mubr.bf16.gmra.mxu0 %v3217_v32  ;;  %1846 = vmatmul.mubr.bf16.gmra.mxu1 %v3218_v33  ;;  %v3296_v32 = vld [vmem:[%s3682_s29 + $0x2e8] ss:$28 sps:$4 sm:$0xff]   ;;  %v3297_v33 = vld [vmem:[%s3682_s29 + $0x280] ss:$28 sps:$4 sm:$0xff]  }
  0xd9   : > { %1853 = vmatprep.mubr.bf16.mxu1 %v3219_v34  ;;  %1950 = vmatprep.mubr.bf16.mxu0 %v3223_v35  ;;  %v3298_v34 = vld [vmem:[%s3682_s29 + $0x324] ss:$28 sps:$4 sm:$0xff]   ;;  %v3300_v35 = vld [vmem:[%s3682_s29 + $0x2b8] ss:$28 sps:$4 sm:$0xff]  }
  0xe0   : > { %1854 = vmatmul.mubr.bf16.gmra.mxu1 %v3224_v37  ;;  %1951 = vmatmul.mubr.bf16.vlgmr.msra.gmra.mxu0 %v3221_v36 }
  0xe1   : > { %1861 = vmatprep.mubr.bf16.mxu1 %v3226_v38  ;;  %1958 = vmatprep.mubr.bf16.mxu0 %v3228_v39 }
  0xe8   : > { %1862 = vmatmul.mubr.bf16.gmra.mxu1 %v3230_v40  ;;  %1959 = vmatmul.mubr.bf16.gmra.mxu0 %v3231_v41 }
  0xe9   : > { %1869 = vmatprep.mubr.bf16.mxu1 %v3232_v42  ;;  %1966 = vmatprep.mubr.bf16.mxu0 %v3234_v43 }
  0xf0   : > { %1870 = vmatmul.mubr.bf16.gmra.mxu1 %v3236_v44  ;;  %1967 = vmatmul.mubr.bf16.gmra.mxu0 %v3237_v45 }
  0xf1   : > { %1877 = vmatprep.mubr.bf16.mxu1 %v3238_v46  ;;  %1974 = vmatprep.mubr.bf16.mxu0 %v3240_v47 }
  0xf8   : > { %1878 = vmatmul.mubr.bf16.gmra.mxu1 %v3242_v48  ;;  %1975 = vmatmul.mubr.bf16.gmra.mxu0 %v3243_v49  ;;  %v3301_v48 = vld [vmem:[%s3682_s29 + $0x320] ss:$28 sps:$4 sm:$0xff]   ;;  %v3302_v49 = vld [vmem:[%s3682_s29 + $0x2f0] ss:$28 sps:$4 sm:$0xff]  }
  0xf9   : > { %1885 = vmatprep.mubr.bf16.mxu1 %v3244_v50  ;;  %1982 = vmatprep.mubr.bf16.mxu0 %v3246_v51  ;;  %v3303_v50 = vld [vmem:[%s3682_s29 + $0x35c] ss:$28 sps:$4 sm:$0xff]   ;;  %v3305_v51 = vld [vmem:[%s3682_s29 + $0x328] ss:$28 sps:$4 sm:$0xff]  }
 0x100   : > { %1886 = vmatmul.mubr.bf16.gmra.mxu1 %v3248_v52  ;;  %1983 = vmatmul.mubr.bf16.gmra.mxu0 %v3249_v53 }
 0x101   : > { %1893 = vmatprep.mubr.bf16.mxu1 %v3250_v54  ;;  %1990 = vmatprep.mubr.bf16.mxu0 %v3252_v55 }
 0x108   : > { %1894 = vmatmul.mubr.bf16.gmra.mxu1 %v3254_v56  ;;  %1991 = vmatmul.mubr.bf16.gmra.mxu0 %v3255_v57 }
 0x109   : > { %1901 = vmatprep.mubr.bf16.mxu1 %v3256_v58  ;;  %1998 = vmatprep.mubr.bf16.mxu0 %v3258_v59 }
 0x110   : > { %1902 = vmatmul.mubr.bf16.gmra.mxu1 %v3260_v60  ;;  %1999 = vmatmul.mubr.bf16.gmra.mxu0 %v3261_v61 }
 0x111   : > { %1909 = vmatprep.mubr.bf16.mxu1 %v3262_v62  ;;  %2006 = vmatprep.mubr.bf16.mxu0 %v3264_v63 }
 0x118   : > { %1910 = vmatmul.mubr.bf16.gmra.mxu1 %v3266_v0  ;;  %2007 = vmatmul.mubr.bf16.gmra.mxu0 %v3267_v1  ;;  %v3306_v0 = vld [vmem:[%s3682_s29 + $0x358] ss:$28 sps:$4 sm:$0xff]   ;;  %v3307_v1 = vld [vmem:[%s3682_s29 + $0x360] ss:$28 sps:$4 sm:$0xff]   ;;  %s2466_s29 = sshll.u32 %s2394_s15, 3 }
 0x119   : > { %2014 = vmatprep.mubr.bf16.mxu0 %v3268_v2  ;;  %3023 = vmatprep.mubr.msk.bf16.mxu1 %vm1547_vm0, %v3270_v3  ;;  %p453_p8 = scmp.lt.s32.totalorder %s2466_s29, 15 }
 0x11b   : > { %s4323_s29 = smov (!%p453_p8, %s2466_s29), 15 }
 0x11c   : > { %s2467_s24 = sshll.u32 %s4323_s29, 2 }
 0x11d   : > { %s4225_s26 = scalar_lea.vmem %s4288_s3, %s2467_s24 }
 0x120   : > { %2015 = vmatmul.mubr.bf16.gmra.mxu0 %v3271_v4  ;;  %3024 = vmatmul.mubr.msk.bf16.vlgmr.msra.gmra.mxu1 %vm1547_vm0, %v3272_v5 }
 0x121   : > { %2022 = vmatprep.mubr.bf16.mxu0 %v3273_v6  ;;  %3027 = vmatprep.mubr.msk.bf16.mxu1 %vm1547_vm0, %v3275_v7 }
 0x128   : > { %2023 = vmatmul.mubr.bf16.gmra.mxu0 %v3276_v8  ;;  %3028 = vmatmul.mubr.msk.bf16.gmra.mxu1 %vm1547_vm0, %v3277_v9 }
 0x129   : > { %2030 = vmatprep.mubr.bf16.mxu0 %v3278_v10  ;;  %3031 = vmatprep.mubr.msk.bf16.mxu1 %vm1547_vm0, %v3280_v11 }
 0x130   : > { %2031 = vmatmul.mubr.bf16.gmra.mxu0 %v3281_v12  ;;  %3032 = vmatmul.mubr.msk.bf16.gmra.mxu1 %vm1547_vm0, %v3282_v13 }
 0x131   : > { %2038 = vmatprep.mubr.bf16.mxu0 %v3283_v14  ;;  %3035 = vmatprep.mubr.msk.bf16.mxu1 %vm1547_vm0, %v3285_v15 }
 0x138   : > { %2039 = vmatmul.mubr.bf16.gmra.mxu0 %v3286_v16  ;;  %3036 = vmatmul.mubr.msk.bf16.gmra.mxu1 %vm1547_vm0, %v3287_v17 }
 0x139   : > { %2046 = vmatprep.mubr.bf16.mxu0 %v3288_v18  ;;  %3039 = vmatprep.mubr.msk.bf16.mxu1 %vm1547_vm0, %v3290_v19 }
 0x140   : > { %v2681_v24 = vpop.f32.mrf.mxu0  ;;  %v2753_v25 = vpop.f32.mrf.mxu1  ;;  %2047 = vmatmul.mubr.bf16.gmra.mxu0 %v3291_v20  ;;  %3040 = vmatmul.mubr.msk.bf16.gmra.mxu1 %vm1547_vm0, %v3292_v21 }
 0x141   : > { %2054 = vmatprep.mubr.bf16.mxu0 %v3293_v22  ;;  %3043 = vmatprep.mubr.msk.bf16.mxu1 %vm1547_vm0, %v3295_v23 }
 0x142   : > { %v2682_v26 = vpop.f32.mrf.mxu0  ;;  %v2754_v27 = vpop.f32.mrf.mxu1 }
 0x143   : > { %v3914_v28 = vadd.f32 %v2682_v26, %v2681_v24  ;;  %v3916_v29 = vadd.f32 %v2754_v27, %v2753_v25 }
 0x144   : > { %v2684_v30 = vpop.f32.mrf.mxu0  ;;  %v2756_v31 = vpop.f32.mrf.mxu1 }
 0x146   : > { %v2685_v36 = vpop.f32.mrf.mxu0  ;;  %v2757_v37 = vpop.f32.mrf.mxu1 }
 0x147   : > { %v3922_v38 = vadd.f32 %v2685_v36, %v2684_v30  ;;  %v3924_v39 = vadd.f32 %v2757_v37, %v2756_v31 }
 0x148   : > { %v2687_v40 = vpop.f32.mrf.mxu0  ;;  %v2759_v41 = vpop.f32.mrf.mxu1  ;;  %2055 = vmatmul.mubr.bf16.gmra.mxu0 %v3296_v32  ;;  %3044 = vmatmul.mubr.msk.bf16.gmra.mxu1 %vm1547_vm0, %v3297_v33 }
 0x149   : > { %2062 = vmatprep.mubr.bf16.mxu0 %v3298_v34  ;;  %3047 = vmatprep.mubr.msk.bf16.mxu1 %vm1547_vm0, %v3300_v35 }
 0x14a   : > { %v2688_v42 = vpop.f32.mrf.mxu0  ;;  %v2760_v43 = vpop.f32.mrf.mxu1 }
 0x14b   : > { %v3928_v44 = vadd.f32 %v2688_v42, %v2687_v40  ;;  %v3930_v45 = vadd.f32 %v2760_v43, %v2759_v41 }
 0x14c   : > { %v2690_v46 = vpop.f32.mrf.mxu0  ;;  %v2762_v47 = vpop.f32.mrf.mxu1 }
 0x14e   : > { %v2691_v52 = vpop.f32.mrf.mxu0  ;;  %v2763_v53 = vpop.f32.mrf.mxu1 }
 0x14f   : > { %v3936_v54 = vadd.f32 %v2691_v52, %v2690_v46  ;;  %v3938_v55 = vadd.f32 %v2763_v53, %v2762_v47 }
 0x150   : > { %v2693_v56 = vpop.f32.mrf.mxu0  ;;  %v2765_v57 = vpop.f32.mrf.mxu1  ;;  %2063 = vmatmul.mubr.bf16.gmra.mxu0 %v3301_v48  ;;  %3048 = vmatmul.mubr.msk.bf16.gmra.mxu1 %vm1547_vm0, %v3302_v49 }
 0x151   : > { %2070 = vmatprep.mubr.bf16.mxu0 %v3303_v50  ;;  %3051 = vmatprep.mubr.msk.bf16.mxu1 %vm1547_vm0, %v3305_v51 }
 0x152   : > { %v2694_v58 = vpop.f32.mrf.mxu0  ;;  %v2766_v59 = vpop.f32.mrf.mxu1 }
 0x153   : > { %v2695_v60 = vadd.f32 %v2694_v58, %v2693_v56  ;;  %v3942_v61 = vadd.f32 %v2766_v59, %v2765_v57 }
 0x154   : > { %v2696_v62 = vpop.f32.mrf.mxu0  ;;  %v2768_v63 = vpop.f32.mrf.mxu1 }
 0x156   : > { %v2697_v2 = vpop.f32.mrf.mxu0  ;;  %v2769_v3 = vpop.f32.mrf.mxu1 }
 0x157   : > { %v2698_v4 = vadd.f32 %v2697_v2, %v2696_v62  ;;  %v3946_v5 = vadd.f32 %v2769_v3, %v2768_v63 }
 0x158   : > { %v2699_v6 = vpop.f32.mrf.mxu0  ;;  %v2771_v7 = vpop.f32.mrf.mxu1  ;;  %2071 = vmatmul.mubr.bf16.gmra.mxu0 %v3306_v0  ;;  %3052 = vmatmul.mubr.msk.bf16.gmra.mxu1 %vm1547_vm0, %v3307_v1 }
 0x15a   : > { %v2700_v8 = vpop.f32.mrf.mxu0  ;;  %v2772_v9 = vpop.f32.mrf.mxu1 }
 0x15b   : > { %v2701_v10 = vadd.f32 %v2700_v8, %v2699_v6  ;;  %v3949_v11 = vadd.f32 %v2772_v9, %v2771_v7 }
 0x15c   : > { %v2702_v12 = vpop.f32.mrf.mxu0  ;;  %v2774_v13 = vpop.f32.mrf.mxu1 }
 0x15e   : > { %v2703_v14 = vpop.f32.mrf.mxu0  ;;  %v2775_v15 = vpop.f32.mrf.mxu1 }
 0x15f   : > { %v2704_v16 = vadd.f32 %v2703_v14, %v2702_v12  ;;  %v3951_v17 = vadd.f32 %v2775_v15, %v2774_v13 }
 0x160   : > { %v2705_v18 = vpop.f32.mrf.mxu0  ;;  %v2793_v19 = vpop.f32.mrf.mxu1 }
 0x162   : > { %v2706_v20 = vpop.f32.mrf.mxu0  ;;  %v2794_v21 = vpop.f32.mrf.mxu1 }
 0x163   : > { %v2707_v22 = vadd.f32 %v2706_v20, %v2705_v18  ;;  %v2795_v23 = vadd.f32 %v2794_v21, %v2793_v19 }
 0x164   : > { %v2708_v24 = vpop.f32.mrf.mxu0  ;;  %v2796_v25 = vpop.f32.mrf.mxu1 }
 0x165   : > { %v3954_v26 = vadd.f32 %v2795_v23, %v3914_v28 }
 0x166   : > { %v2709_v27 = vpop.f32.mrf.mxu0  ;;  %v2797_v30 = vpop.f32.mrf.mxu1 }
 0x167   : > { %v2710_v31 = vadd.f32 %v2709_v27, %v2708_v24  ;;  %v2798_v32 = vadd.f32 %v2797_v30, %v2796_v25 }
 0x168   : > { %v2711_v33 = vpop.f32.mrf.mxu0  ;;  %v2799_v34 = vpop.f32.mrf.mxu1 }
 0x169   : > { %v3957_v35 = vadd.f32 %v2798_v32, %v3922_v38 }
 0x16a   : > { %v2712_v36 = vpop.f32.mrf.mxu0  ;;  %v2800_v37 = vpop.f32.mrf.mxu1 }
 0x16b   : > { %v2713_v40 = vadd.f32 %v2712_v36, %v2711_v33  ;;  %v2801_v41 = vadd.f32 %v2800_v37, %v2799_v34 }
 0x16c   : > { %v2714_v42 = vpop.f32.mrf.mxu0  ;;  %v2802_v43 = vpop.f32.mrf.mxu1 }
 0x16d   : > { %v3960_v46 = vadd.f32 %v2801_v41, %v3928_v44 }
 0x16e   : > { %v2715_v28 = vpop.f32.mrf.mxu0  ;;  %v2803_v47 = vpop.f32.mrf.mxu1 }
 0x16f   : > { %v2716_v48 = vadd.f32 %v2715_v28, %v2714_v42  ;;  %v2804_v49 = vadd.f32 %v2803_v47, %v2802_v43 }
 0x170   : > { %v2717_v50 = vpop.f32.mrf.mxu0  ;;  %v2805_v51 = vpop.f32.mrf.mxu1 }
 0x171   : > { %v3963_v52 = vadd.f32 %v2804_v49, %v3936_v54 }
 0x172   : > { %v2718_v38 = vpop.f32.mrf.mxu0  ;;  %v2806_v53 = vpop.f32.mrf.mxu1 }
 0x173   : > { %v2719_v56 = vadd.f32 %v2718_v38, %v2717_v50  ;;  %v2807_v57 = vadd.f32 %v2806_v53, %v2805_v51 }
 0x174   : > { %v2720_v58 = vpop.f32.mrf.mxu0  ;;  %v2808_v59 = vpop.f32.mrf.mxu1 }
 0x175   : > { %v3965_v62 = vadd.f32 %v2807_v57, %v2695_v60 }
 0x176   : > { %v2721_v63 = vpop.f32.mrf.mxu0  ;;  %v2809_v44 = vpop.f32.mrf.mxu1 }
 0x177   : > { %v2722_v0 = vadd.f32 %v2721_v63, %v2720_v58  ;;  %v2810_v1 = vadd.f32 %v2809_v44, %v2808_v59 }
 0x178   : > { %v2723_v2 = vpop.f32.mrf.mxu0  ;;  %v2811_v3 = vpop.f32.mrf.mxu1 }
 0x179   : > { %v3967_v6 = vadd.f32 %v2810_v1, %v2698_v4 }
 0x17a   : > { %v2724_v7 = vpop.f32.mrf.mxu0  ;;  %v2812_v8 = vpop.f32.mrf.mxu1 }
 0x17b   : > { %v2725_v54 = vadd.f32 %v2724_v7, %v2723_v2  ;;  %v2813_v9 = vadd.f32 %v2812_v8, %v2811_v3 }
 0x17c   : > { %v2726_v12 = vpop.f32.mrf.mxu0  ;;  %v2814_v13 = vpop.f32.mrf.mxu1 }
 0x17d   : > { %v3969_v14 = vadd.f32 %v2813_v9, %v2701_v10 }
 0x17e   : > { %v2727_v15 = vpop.f32.mrf.mxu0  ;;  %v2815_v18 = vpop.f32.mrf.mxu1 }
 0x17f   : > { %v2728_v60 = vadd.f32 %v2727_v15, %v2726_v12  ;;  %v2816_v19 = vadd.f32 %v2815_v18, %v2814_v13 }
 0x180   : > { %v2729_v20 = vpop.f32.mrf.mxu0  ;;  %v2817_v21 = vpop.f32.mrf.mxu1 }
 0x181   : > { %v3971_v23 = vadd.f32 %v2816_v19, %v2704_v16 }
 0x182   : > { %v2730_v24 = vpop.f32.mrf.mxu0  ;;  %v2818_v25 = vpop.f32.mrf.mxu1 }
 0x183   : > { %v2731_v4 = vadd.f32 %v2730_v24, %v2729_v20  ;;  %v2819_v27 = vadd.f32 %v2818_v25, %v2817_v21 }
 0x184   : > { %v2732_v30 = vpop.f32.mrf.mxu0  ;;  %v2820_v32 = vpop.f32.mrf.mxu1 }
 0x185   : > { %v3973_v33 = vadd.f32 %v2819_v27, %v2707_v22 }
 0x186   : > { %v2733_v34 = vpop.f32.mrf.mxu0  ;;  %v2821_v36 = vpop.f32.mrf.mxu1 }
 0x187   : > { %v2734_v10 = vadd.f32 %v2733_v34, %v2732_v30  ;;  %v2822_v37 = vadd.f32 %v2821_v36, %v2820_v32 }
 0x188   : > { %v2735_v41 = vpop.f32.mrf.mxu0  ;;  %v2823_v42 = vpop.f32.mrf.mxu1 }
 0x189   : > { %v3975_v43 = vadd.f32 %v2822_v37, %v2710_v31 }
 0x18a   : > { %v2736_v28 = vpop.f32.mrf.mxu0  ;;  %v2824_v47 = vpop.f32.mrf.mxu1 }
 0x18b   : > { %v2737_v16 = vadd.f32 %v2736_v28, %v2735_v41  ;;  %v2825_v49 = vadd.f32 %v2824_v47, %v2823_v42 }
 0x18c   : > { %v2738_v50 = vpop.f32.mrf.mxu0  ;;  %v2826_v51 = vpop.f32.mrf.mxu1 }
 0x18d   : > { %v3977_v38 = vadd.f32 %v2825_v49, %v2713_v40 }
 0x18e   : > { %v2739_v53 = vpop.f32.mrf.mxu0  ;;  %v2827_v57 = vpop.f32.mrf.mxu1 }
 0x18f   : > { %v3979_v22 = vadd.f32 %v2739_v53, %v2738_v50  ;;  %v2828_v58 = vadd.f32 %v2827_v57, %v2826_v51 }
 0x190   : > { %v2741_v59 = vpop.f32.mrf.mxu0  ;;  %v2829_v63 = vpop.f32.mrf.mxu1 }
 0x191   : > { %v3981_v44 = vadd.f32 %v2828_v58, %v2716_v48 }
 0x192   : > { %v2742_v1 = vpop.f32.mrf.mxu0  ;;  %v2830_v31 = vpop.f32.mrf.mxu1 }
 0x193   : > { %v3983_v2 = vadd.f32 %v2742_v1, %v2741_v59  ;;  %v2831_v3 = vadd.f32 %v2830_v31, %v2829_v63 }
 0x194   : > { %v2744_v7 = vpop.f32.mrf.mxu0  ;;  %v2832_v8 = vpop.f32.mrf.mxu1 }
 0x195   : > { %v3985_v9 = vadd.f32 %v2831_v3, %v2719_v56 }
 0x196   : > { %v2745_v40 = vpop.f32.mrf.mxu0  ;;  %v2833_v12 = vpop.f32.mrf.mxu1 }
 0x197   : > { %v3987_v13 = vadd.f32 %v2745_v40, %v2744_v7  ;;  %v2834_v15 = vadd.f32 %v2833_v12, %v2832_v8 }
 0x198   : > { %v2747_v18 = vpop.f32.mrf.mxu0  ;;  %v2835_v19 = vpop.f32.mrf.mxu1 }
 0x199   : > { %v3989_v20 = vadd.f32 %v2834_v15, %v2722_v0 }
 0x19a   : > { %v2748_v48 = vpop.f32.mrf.mxu0  ;;  %v2836_v21 = vpop.f32.mrf.mxu1 }
 0x19b   : > { %v3991_v24 = vadd.f32 %v2748_v48, %v2747_v18  ;;  %v2837_v25 = vadd.f32 %v2836_v21, %v2835_v19 }
 0x19c   : > { %v2750_v27 = vpop.f32.mrf.mxu0  ;;  %v2838_v30 = vpop.f32.mrf.mxu1 }
 0x19d   : > { %v3993_v32 = vadd.f32 %v2837_v25, %v2725_v54 }
 0x19e   : > { %v2751_v56 = vpop.f32.mrf.mxu0  ;;  %v2839_v34 = vpop.f32.mrf.mxu1 }
 0x19f   : > { %v3995_v36 = vadd.f32 %v2751_v56, %v2750_v27  ;;  %v2840_v37 = vadd.f32 %v2839_v34, %v2838_v30 }
 0x1a0   : > { %v2841_v41 = vpop.f32.mrf.mxu1  ;;  %v2905_v42 = vpop.f32.mrf.mxu0 }
 0x1a1   : > { %v3997_v28 = vadd.f32 %v2840_v37, %v2728_v60 }
 0x1a2   : > { %v2842_v0 = vpop.f32.mrf.mxu1  ;;  %v2906_v47 = vpop.f32.mrf.mxu0 }
 0x1a3   : > { %v2843_v49 = vadd.f32 %v2842_v0, %v2841_v41  ;;  %v2907_v50 = vadd.f32 %v2906_v47, %v2905_v42 }
 0x1a4   : > { %v2844_v51 = vpop.f32.mrf.mxu1  ;;  %v2908_v53 = vpop.f32.mrf.mxu0 }
 0x1a5   : > { %v3999_v57 = vadd.f32 %v2843_v49, %v2731_v4  ;;  %v4002_v54 = vadd.f32 %v2907_v50, %v3954_v26 }
 0x1a6   : > { %v2845_v58 = vpop.f32.mrf.mxu1  ;;  %v2909_v59 = vpop.f32.mrf.mxu0 }
 0x1a7   : > { %v2846_v63 = vadd.f32 %v2845_v58, %v2844_v51  ;;  %v2910_v1 = vadd.f32 %v2909_v59, %v2908_v53 }
 0x1a8   : > { %v2847_v31 = vpop.f32.mrf.mxu1  ;;  %v2911_v3 = vpop.f32.mrf.mxu0 }
 0x1a9   : > { %v4004_v7 = vadd.f32 %v2846_v63, %v2734_v10  ;;  %v4007_v60 = vadd.f32 %v2910_v1, %v3957_v35 }
 0x1aa   : > { %v2848_v8 = vpop.f32.mrf.mxu1  ;;  %v2912_v40 = vpop.f32.mrf.mxu0 }
 0x1ab   : > { %v2849_v12 = vadd.f32 %v2848_v8, %v2847_v31  ;;  %v2913_v15 = vadd.f32 %v2912_v40, %v2911_v3 }
 0x1ac   : > { %v2850_v4 = vpop.f32.mrf.mxu1  ;;  %v2914_v18 = vpop.f32.mrf.mxu0 }
 0x1ad   : > { %v4009_v19 = vadd.f32 %v2849_v12, %v2737_v16  ;;  %v4012_v26 = vadd.f32 %v2913_v15, %v3960_v46 }
 0x1ae   : > { %v2851_v48 = vpop.f32.mrf.mxu1  ;;  %v2915_v21 = vpop.f32.mrf.mxu0 }
 0x1af   : > { %v2852_v25 = vadd.f32 %v2851_v48, %v2850_v4  ;;  %v2916_v27 = vadd.f32 %v2915_v21, %v2914_v18 }
 0x1b0   : > { %v2853_v10 = vpop.f32.mrf.mxu1  ;;  %v2917_v30 = vpop.f32.mrf.mxu0 }
 0x1b1   : > { %v4015_v35 = vadd.f32 %v2852_v25, %v3979_v22  ;;  %v4018_v56 = vadd.f32 %v2916_v27, %v3963_v52 }
 0x1b2   : > { %v2854_v34 = vpop.f32.mrf.mxu1  ;;  %v2918_v37 = vpop.f32.mrf.mxu0 }
 0x1b3   : > { %v2855_v41 = vadd.f32 %v2854_v34, %v2853_v10  ;;  %v2919_v16 = vadd.f32 %v2918_v37, %v2917_v30 }
 0x1b4   : > { %v2856_v42 = vpop.f32.mrf.mxu1  ;;  %v2920_v0 = vpop.f32.mrf.mxu0 }
 0x1b5   : > { %v4021_v46 = vadd.f32 %v2855_v41, %v3983_v2  ;;  %v4024_v47 = vadd.f32 %v2919_v16, %v3965_v62 }
 0x1b6   : > { %v2857_v49 = vpop.f32.mrf.mxu1  ;;  %v2921_v50 = vpop.f32.mrf.mxu0 }
 0x1b7   : > { %v2858_v51 = vadd.f32 %v2857_v49, %v2856_v42  ;;  %v2922_v22 = vadd.f32 %v2921_v50, %v2920_v0 }
 0x1b8   : > { %v2859_v53 = vpop.f32.mrf.mxu1  ;;  %v2923_v58 = vpop.f32.mrf.mxu0 }
 0x1b9   : > { %v4027_v52 = vadd.f32 %v2858_v51, %v3987_v13  ;;  %v4030_v59 = vadd.f32 %v2922_v22, %v3967_v6 }
 0x1ba   : > { %v2860_v63 = vpop.f32.mrf.mxu1  ;;  %v2924_v1 = vpop.f32.mrf.mxu0 }
 0x1bb   : > { %v2861_v31 = vadd.f32 %v2860_v63, %v2859_v53  ;;  %v2925_v2 = vadd.f32 %v2924_v1, %v2923_v58 }
 0x1bc   : > { %v2862_v3 = vpop.f32.mrf.mxu1  ;;  %v2926_v8 = vpop.f32.mrf.mxu0 }
 0x1bd   : > { %v4033_v62 = vadd.f32 %v2861_v31, %v3991_v24  ;;  %v4036_v40 = vadd.f32 %v2925_v2, %v3969_v14 }
 0x1be   : > { %v2863_v12 = vpop.f32.mrf.mxu1  ;;  %v2927_v15 = vpop.f32.mrf.mxu0 }
 0x1bf   : > { %v2864_v4 = vadd.f32 %v2863_v12, %v2862_v3  ;;  %v2928_v13 = vadd.f32 %v2927_v15, %v2926_v8 }
 0x1c0   : > { %v2865_v18 = vpop.f32.mrf.mxu1  ;;  %v2929_v48 = vpop.f32.mrf.mxu0 }
 0x1c1   : > { %v4039_v6 = vadd.f32 %v2864_v4, %v3995_v36  ;;  %v4042_v21 = vadd.f32 %v2928_v13, %v3971_v23 }
 0x1c2   : > { %v2866_v25 = vpop.f32.mrf.mxu1  ;;  %v2930_v27 = vpop.f32.mrf.mxu0 }
 0x1c3   : > { %v2867_v10 = vadd.f32 %v2866_v25, %v2865_v18  ;;  %v2931_v24 = vadd.f32 %v2930_v27, %v2929_v48 }
 0x1c4   : > { %v2868_v30 = vpop.f32.mrf.mxu1  ;;  %v2932_v34 = vpop.f32.mrf.mxu0 }
 0x1c5   : > { %v4045_v14 = vadd.f32 %v2867_v10, %v3916_v29  ;;  %v4048_v37 = vadd.f32 %v2931_v24, %v3973_v33 }
 0x1c6   : > { %v2869_v41 = vpop.f32.mrf.mxu1  ;;  %v2933_v16 = vpop.f32.mrf.mxu0 }
 0x1c7   : > { %v2870_v42 = vadd.f32 %v2869_v41, %v2868_v30  ;;  %v2934_v36 = vadd.f32 %v2933_v16, %v2932_v34 }
 0x1c8   : > { %v2871_v0 = vpop.f32.mrf.mxu1  ;;  %v2935_v49 = vpop.f32.mrf.mxu0 }
 0x1c9   : > { %v4051_v23 = vadd.f32 %v2870_v42, %v3924_v39  ;;  %v4054_v50 = vadd.f32 %v2934_v36, %v3975_v43 }
 0x1ca   : > { %v2872_v51 = vpop.f32.mrf.mxu1  ;;  %v2936_v22 = vpop.f32.mrf.mxu0 }
 0x1cb   : > { %v2873_v53 = vadd.f32 %v2872_v51, %v2871_v0  ;;  %v2937_v29 = vadd.f32 %v2936_v22, %v2935_v49 }
 0x1cc   : > { %v2874_v58 = vpop.f32.mrf.mxu1  ;;  %v2938_v63 = vpop.f32.mrf.mxu0 }
 0x1cd   : > { %v4057_v33 = vadd.f32 %v2873_v53, %v3930_v45  ;;  %v1993_v1 = vadd.f32 %v2937_v29, %v3977_v38 }
 0x1ce   : > { %v2875_v31 = vpop.f32.mrf.mxu1  ;;  %v2939_v2 = vpop.f32.mrf.mxu0 }
 0x1cf   : > { %v2876_v3 = vadd.f32 %v2875_v31, %v2874_v58  ;;  %v2940_v8 = vadd.f32 %v2939_v2, %v2938_v63 }
 0x1d0   : > { %v2877_v39 = vpop.f32.mrf.mxu1  ;;  %v2941_v12 = vpop.f32.mrf.mxu0 }
 0x1d1   : > { %v4061_v43 = vadd.f32 %v2876_v3, %v3938_v55  ;;  %v1996_v15 = vadd.f32 %v2940_v8, %v3981_v44 }
 0x1d2   : > { %v2878_v4 = vpop.f32.mrf.mxu1  ;;  %v2942_v13 = vpop.f32.mrf.mxu0 }
 0x1d3   : > { %v2879_v18 = vadd.f32 %v2878_v4, %v2877_v39  ;;  %v2943_v48 = vadd.f32 %v2942_v13, %v2941_v12 }
 0x1d4   : > { %v2880_v25 = vpop.f32.mrf.mxu1  ;;  %v2944_v45 = vpop.f32.mrf.mxu0 }
 0x1d5   : > { %v4065_v27 = vadd.f32 %v2879_v18, %v3942_v61  ;;  %v4068_v38 = vadd.f32 %v2943_v48, %v3985_v9 }
 0x1d6   : > { %v2881_v10 = vpop.f32.mrf.mxu1  ;;  %v2945_v24 = vpop.f32.mrf.mxu0 }
 0x1d7   : > { %v2882_v30 = vadd.f32 %v2881_v10, %v2880_v25  ;;  %v2946_v34 = vadd.f32 %v2945_v24, %v2944_v45 }
 0x1d8   : > { %v2883_v55 = vpop.f32.mrf.mxu1  ;;  %v2947_v41 = vpop.f32.mrf.mxu0 }
 0x1d9   : > { %v4071_v44 = vadd.f32 %v2882_v30, %v3946_v5  ;;  %v4074_v16 = vadd.f32 %v2946_v34, %v3989_v20 }
 0x1da   : > { %v2884_v42 = vpop.f32.mrf.mxu1  ;;  %v2948_v36 = vpop.f32.mrf.mxu0 }
 0x1db   : > { %v2885_v0 = vadd.f32 %v2884_v42, %v2883_v55  ;;  %v2949_v61 = vadd.f32 %v2948_v36, %v2947_v41 }
 0x1dc   : > { %v2886_v49 = vpop.f32.mrf.mxu1  ;;  %v2950_v51 = vpop.f32.mrf.mxu0 }
 0x1dd   : > { %v4077_v9 = vadd.f32 %v2885_v0, %v3949_v11  ;;  %v2009_v22 = vadd.f32 %v2949_v61, %v3993_v32 }
 0x1de   : > { %v2887_v53 = vpop.f32.mrf.mxu1  ;;  %v2951_v29 = vpop.f32.mrf.mxu0 }
 0x1df   : > { %v2888_v58 = vadd.f32 %v2887_v53, %v2886_v49  ;;  %v2952_v63 = vadd.f32 %v2951_v29, %v2950_v51 }
 0x1e0   : > { %v4080_v5 = vpop.f32.mrf.mxu0  ;;  %v3025_v31 = vpop.f32.mrf.mxu1 }
 0x1e1   : > { %v4083_v20 = vadd.f32 %v2888_v58, %v3951_v17  ;;  %v2012_v2 = vadd.f32 %v2952_v63, %v3997_v28  ;;  %v4097_v30 = vadd.f32 %v3025_v31, %v4012_v26 }
 0x1e2   : > { %v4086_v3 = vpop.f32.mrf.mxu0  ;;  %v2113_v8 = vpop.f32.mrf.mxu1 }
 0x1e3   : > { %4295 = vst [vmem:[#allocation3_spill] sm:$0xff] %v4083_v20  ;;  %v4104_v42 = vadd.f32 %v2113_v8, %v4002_v54 }
 0x1e4   : > { %v4088_v39 = vpop.f32.mrf.mxu0  ;;  %v3026_v11 = vpop.f32.mrf.mxu1 }
 0x1e5   : > { %v4114_v26 = vadd.f32 %v3026_v11, %v4018_v56 }
 0x1e6   : > { %v4090_v12 = vpop.f32.mrf.mxu0  ;;  %v2116_v32 = vpop.f32.mrf.mxu1 }
 0x1e7   : > { %v4123_v29 = vadd.f32 %v2116_v32, %v4007_v60 }
 0x1e8   : > { %v2959_v4 = vpop.f32.mrf.mxu0  ;;  %v3029_v13 = vpop.f32.mrf.mxu1 }
 0x1e9   : > { %v4133_v31 = vadd.f32 %v3029_v13, %v4036_v40 }
 0x1ea   : > { %v2960_v18 = vpop.f32.mrf.mxu0  ;;  %v2129_v48 = vpop.f32.mrf.mxu1 }
 0x1eb   : > { %4296 = vst [vmem:[#allocation4_spill] sm:$0xff] %v4133_v31  ;;  %v4142_v32 = vadd.f32 %v2129_v48, %v4024_v47 }
 0x1ec   : > { %v4092_v25 = vpop.f32.mrf.mxu0  ;;  %v3030_v45 = vpop.f32.mrf.mxu1 }
 0x1ed   : > { %v4152_v13 = vadd.f32 %v3030_v45, %v4042_v21  ;;  %v2955_v45 = vadd.f32 %v4086_v3, %v4080_v5 }
 0x1ee   : > { %v2963_v17 = vpop.f32.mrf.mxu0  ;;  %v2132_v10 = vpop.f32.mrf.mxu1 }
 0x1ef   : > { %4298 = vst [vmem:[#allocation6_spill] sm:$0xff] %v4152_v13  ;;  %v4161_v48 = vadd.f32 %v2132_v10, %v4030_v59  ;;  %v2017_v5 = vadd.f32 %v2955_v45, %v3999_v57 }
 0x1f0   : > { %v4094_v24 = vpop.f32.mrf.mxu0  ;;  %v3033_v28 = vpop.f32.mrf.mxu1 }
 0x1f1   : > { %v4099_v34 = vadd.f32 %v3033_v28, %v1993_v1  ;;  %4300 = vst [vmem:[#allocation8_spill] sm:$0xff] %v4161_v48 }
 0x1f2   : > { %v4101_v55 = vpop.f32.mrf.mxu0  ;;  %v2145_v41 = vpop.f32.mrf.mxu1 }
 0x1f3   : > { %v4109_v0 = vadd.f32 %v2145_v41, %v4048_v37  ;;  %v2967_v57 = vadd.f32 %v4101_v55, %v4094_v24 }
 0x1f4   : > { %v4111_v61 = vpop.f32.mrf.mxu0  ;;  %v3034_v49 = vpop.f32.mrf.mxu1 }
 0x1f5   : > { %v4118_v51 = vadd.f32 %v3034_v49, %v1996_v15 }
 0x1f6   : > { %v4120_v53 = vpop.f32.mrf.mxu0  ;;  %v2148_v54 = vpop.f32.mrf.mxu1 }
 0x1f7   : > { %v4128_v58 = vadd.f32 %v2148_v54, %v4054_v50 }
 0x1f8   : > { %v4130_v63 = vpop.f32.mrf.mxu0  ;;  %v3037_v56 = vpop.f32.mrf.mxu1 }
 0x1f9   : > { %v4137_v8 = vadd.f32 %v3037_v56, %v2009_v22 }
 0x1fa   : > { %v4139_v11 = vpop.f32.mrf.mxu0  ;;  %v2161_v60 = vpop.f32.mrf.mxu1 }
 0x1fb   : > { %4297 = vst [vmem:[#allocation5_spill] sm:$0xff] %v4137_v8  ;;  %v4147_v28 = vadd.f32 %v2161_v60, %v4068_v38 }
 0x1fc   : > { %v4149_v41 = vpop.f32.mrf.mxu0  ;;  %v3038_v40 = vpop.f32.mrf.mxu1 }
 0x1fd   : > { %v4156_v49 = vadd.f32 %v3038_v40, %v2012_v2 }
 0x1fe   : > { %v4158_v54 = vpop.f32.mrf.mxu0  ;;  %v2164_v47 = vpop.f32.mrf.mxu1 }
 0x1ff   : > { %4299 = vst [vmem:[#allocation7_spill] sm:$0xff] %v4156_v49  ;;  %v4166_v56 = vadd.f32 %v2164_v47, %v4074_v16  ;;  %v2961_v16 = vadd.f32 %v2960_v18, %v2959_v4  ;;  %v2958_v18 = vadd.f32 %v4090_v12, %v4088_v39 }
 0x200   : > { %v2977_v60 = vpop.f32.mrf.mxu0  ;;  %v3041_v21 = vpop.f32.mrf.mxu1 }
 0x201   : > { %4301 = vst [vmem:[#allocation9_spill] sm:$0xff] %v4166_v56  ;;  %v2964_v56 = vadd.f32 %v2963_v17, %v4092_v25  ;;  %v2025_v31 = vadd.f32 %v2961_v16, %v4009_v19  ;;  %v2020_v12 = vadd.f32 %v2958_v18, %v4004_v7  ;;  %v2973_v7 = vadd.f32 %v4139_v11, %v4130_v63 }
 0x202   : > { %v2978_v2 = vpop.f32.mrf.mxu0  ;;  %v2177_v40 = vpop.f32.mrf.mxu1  ;;  %v2033_v16 = vadd.f32 %v2967_v57, %v4021_v46 }
 0x203   : > { %v2979_v13 = vadd.f32 %v2978_v2, %v2977_v60  ;;  %v2028_v17 = vadd.f32 %v2964_v56, %v4015_v35  ;;  %v4200_v35 = vld [vmem:[%s4287_s2] ss:$0 sm:$0xff] }
 0x204   : > { %v2980_v50 = vpop.f32.mrf.mxu0  ;;  %v3042_v22 = vpop.f32.mrf.mxu1 }
 0x205   : > { %v2049_v25 = vadd.f32 %v2979_v13, %v4045_v14 }
 0x206   : > { %v2981_v15 = vpop.f32.mrf.mxu0  ;;  %v2180_v37 = vpop.f32.mrf.mxu1 }
 0x207   : > { %v2982_v60 = vadd.f32 %v2981_v15, %v2980_v50  ;;  %v2189_v15 = vadd.f32 %v3042_v22, %v2028_v17  ;;  %v4303_v50 = vmax.f32 %v4097_v30, %v4099_v34  ;;  %v4304_v30 = vmax.f32 %v4104_v42, %v4109_v0 }
 0x208   : > { %v2983_v59 = vpop.f32.mrf.mxu0  ;;  %v4170_v10 = vpop.f32.mrf.mxu1 }
 0x209   : > { %v2052_v56 = vadd.f32 %v2982_v60, %v4051_v23  ;;  %v4305_v23 = vmax.f32 %v4114_v26, %v4118_v51 }
 0x20a   : > { %v2984_v1 = vpop.f32.mrf.mxu0  ;;  %v4172_v38 = vpop.f32.mrf.mxu1 }
 0x20b   : > { %v2985_v47 = vadd.f32 %v2984_v1, %v2983_v59 }
 0x20c   : > { %v2986_v36 = vpop.f32.mrf.mxu0  ;;  %v4174_v49 = vpop.f32.mrf.mxu1 }
 0x20d   : > { %4302 = vst [vmem:[#allocation10_spill] sm:$0xff] %v4174_v49  ;;  %v2057_v4 = vadd.f32 %v2985_v47, %v4057_v33  ;;  %v2186_v49 = vadd.f32 %v3041_v21, %v2025_v31 }
 0x20e   : > { %v2987_v48 = vpop.f32.mrf.mxu0  ;;  %v4181_v8 = vpop.f32.mrf.mxu1 }
 0x20f   : > { %v2988_v20 = vadd.f32 %v2987_v48, %v2986_v36  ;;  %v2178_v36 = vadd.f32 %v2177_v40, %v2017_v5  ;;  %v2181_v40 = vadd.f32 %v2180_v37, %v2020_v12 }
 0x210   : > { %v2989_v1 = vpop.f32.mrf.mxu0  ;;  %v3049_v59 = vpop.f32.mrf.mxu1 }
 0x211   : > { %v2218_v3 = vadd.f32 %v3049_v59, %v2057_v4  ;;  %v2060_v39 = vadd.f32 %v2988_v20, %v4061_v43  ;;  %v2970_v20 = vadd.f32 %v4120_v53, %v4111_v61 }
 0x212   : > { %v2990_v2 = vpop.f32.mrf.mxu0  ;;  %v2209_v19 = vpop.f32.mrf.mxu1 }
 0x213   : > { %v2250_v33 = vmax.f32 %v2186_v49, %v2218_v3  ;;  %v2210_v48 = vadd.f32 %v2209_v19, %v2049_v25  ;;  %v2991_v24 = vadd.f32 %v2990_v2, %v2989_v1  ;;  %v2041_v1 = vadd.f32 %v2973_v7, %v4033_v62 }
 0x214   : > { %v2992_v14 = vpop.f32.mrf.mxu0  ;;  %v3050_v31 = vpop.f32.mrf.mxu1  ;;  %v2036_v42 = vadd.f32 %v2970_v20, %v4027_v52  ;;  %v2976_v62 = vadd.f32 %v4158_v54, %v4149_v41  ;;  %v2194_v52 = vadd.f32 %v4172_v38, %v2033_v16  ;;  %v4306_v25 = vmax.f32 %v4123_v29, %v4128_v58  ;;  %v4309_v7 = vld [vmem:[#allocation10_spill] sm:$0xff] }
 0x215   : > { %v2258_v13 = vmax.f32 %v4303_v50, %v2250_v33  ;;  %v2248_v49 = vmax.f32 %v2178_v36, %v2210_v48  ;;  %v2221_v43 = vadd.f32 %v3050_v31, %v2060_v39  ;;  %v2065_v37 = vadd.f32 %v2991_v24, %v4065_v27  ;;  %v4308_v50 = vld [vmem:[#allocation3_spill] sm:$0xff] }
 0x216   : > { %v2993_v55 = vpop.f32.mrf.mxu0  ;;  %v2212_v21 = vpop.f32.mrf.mxu1  ;;  %v2202_v41 = vadd.f32 %v4170_v10, %v2041_v1  ;;  %v2197_v54 = vadd.f32 %v4181_v8, %v2036_v42  ;;  %v2044_v10 = vadd.f32 %v2976_v62, %v4039_v6  ;;  %v4314_v6 = vld [vmem:[#allocation9_spill] sm:$0xff] }
 0x217   : > { %v2273_v22 = vadd.f32 %v4200_v35, %v2258_v13  ;;  %v2256_v34 = vmax.f32 %v4304_v30, %v2248_v49  ;;  %v2251_v45 = vmax.f32 %v2189_v15, %v2221_v43  ;;  %v2213_v61 = vadd.f32 %v2212_v21, %v2052_v56  ;;  %v4311_v56 = vld [vmem:[#allocation5_spill] sm:$0xff] }
 0x218   : > { %v2995_v53 = vpop.f32.mrf.mxu0  ;;  %v3053_v63 = vpop.f32.mrf.mxu1  ;;  %v2994_v18 = vadd.f32 %v2993_v55, %v2992_v14  ;;  %v2205_v24 = vadd.f32 %v4309_v7, %v2044_v10  ;;  %v4310_v55 = vld [vmem:[#allocation4_spill] sm:$0xff] }
 0x219   : > { %v2281_v11 = vmax.f32 %v2273_v22, 0.0  ;;  %v2271_v47 = vadd.f32 %v4200_v35, %v2256_v34  ;;  %v2259_v4 = vmax.f32 %v4305_v23, %v2251_v45  ;;  %v2249_v46 = vmax.f32 %v2181_v40, %v2213_v61 }
 0x21a   : > { %v2996_v0 = vpop.f32.mrf.mxu0  ;;  %v2225_v59 = vpop.f32.mrf.mxu1  ;;  %v2068_v48 = vadd.f32 %v2994_v18, %v4071_v44  ;;  %v4307_v44 = vmax.f32 %v4142_v32, %v4147_v28  ;;  %v4312_v21 = vmax.f32 %v4310_v55, %v4311_v56  ;;  %v4313_v28 = vld [vmem:[#allocation8_spill] sm:$0xff] }
 0x21b   : > { %v2659_v5 = vpack.c.bf16 %v2281_v11, %v2281_v11  ;;  %v2279_v3 = vmax.f32 %v2271_v47, 0.0  ;;  %v2274_v26 = vadd.f32 %v4200_v35, %v2259_v4  ;;  %v2997_v51 = vadd.f32 %v2996_v0, %v2995_v53  ;;  %v4316_v11 = vld [vmem:[#allocation6_spill] sm:$0xff]  ;;  %v4317_v47 = vld [vmem:[#allocation7_spill] sm:$0xff] }
 0x21c   : > { %v2257_v17 = vmax.f32 %v4306_v25, %v2249_v46  ;;  %v2226_v60 = vadd.f32 %v2225_v59, %v2065_v37  ;;  %v2998_v2 = vpop.f32.mrf.mxu0  ;;  %v3054_v19 = vpop.f32.mrf.mxu1  ;;  %v4315_v30 = vmax.f32 %v4313_v28, %v4314_v6  ;;  %v4318_v23 = vmax.f32 %v4316_v11, %v4317_v47 }
 0x21d   : > { %2322 = vst.msk [vmem:[%s4225_s26 + $0x8] sm:$0xf] %vm2319_vm1, %v2659_v5  ;;  %v2657_v27 = vpack.c.bf16 %v2279_v3, %v2279_v3  ;;  %v2282_v36 = vmax.f32 %v2274_v26, 0.0  ;;  %v2073_v33 = vadd.f32 %v2997_v51, %v4077_v9 }
 0x21e   : > { %v2272_v29 = vadd.f32 %v4200_v35, %v2257_v17  ;;  %v2252_v58 = vmax.f32 %v2194_v52, %v2226_v60  ;;  %v2999_v38 = vpop.f32.mrf.mxu0  ;;  %v2228_v39 = vpop.f32.mrf.mxu1 }
 0x21f   : > { %2320 = vst.msk [vmem:[%s4225_s26] sm:$0xf] %vm2319_vm1, %v2657_v27  ;;  %v2660_v57 = vpack.c.bf16 %v2282_v36, %v2282_v36  ;;  %v2234_v12 = vadd.f32 %v3053_v63, %v2073_v33  ;;  %v3000_v14 = vadd.f32 %v2999_v38, %v2998_v2  ;;  %v2229_v31 = vadd.f32 %v2228_v39, %v2068_v48 }
 0x220   : > { %v2280_v9 = vmax.f32 %v2272_v29, 0.0  ;;  %v2260_v15 = vmax.f32 %v4307_v44, %v2252_v58 }
 0x221   : > { %2323 = vst.msk [vmem:[%s4225_s26 + $0xc] sm:$0xf] %vm2319_vm1, %v2660_v57  ;;  %v2254_v8 = vmax.f32 %v2202_v41, %v2234_v12  ;;  %v2076_v13 = vadd.f32 %v3000_v14, %v4308_v50  ;;  %v2253_v49 = vmax.f32 %v2197_v54, %v2229_v31 }
 0x222   : > { %v2658_v43 = vpack.c.bf16 %v2280_v9, %v2280_v9  ;;  %v2275_v20 = vadd.f32 %v4200_v35, %v2260_v15 }
 0x223   : > { %v2262_v22 = vmax.f32 %v4312_v21, %v2254_v8  ;;  %v2237_v32 = vadd.f32 %v3054_v19, %v2076_v13  ;;  %v2261_v34 = vmax.f32 %v4315_v30, %v2253_v49 }
 0x224   : > { %2321 = vst.msk [vmem:[%s4225_s26 + $0x4] sm:$0xf] %vm2319_vm1, %v2658_v43  ;;  %v2283_v45 = vmax.f32 %v2275_v20, 0.0 }
 0x225   : > { %v2277_v40 = vadd.f32 %v4200_v35, %v2262_v22  ;;  %v2255_v16 = vmax.f32 %v2205_v24, %v2237_v32  ;;  %v2276_v61 = vadd.f32 %v4200_v35, %v2261_v34 }
 0x226   : > { %v2661_v53 = vpack.c.bf16 %v2283_v45, %v2283_v45 }
 0x227   : > { %v2285_v63 = vmax.f32 %v2277_v40, 0.0  ;;  %v2263_v4 = vmax.f32 %v4318_v23, %v2255_v16  ;;  %v2284_v18 = vmax.f32 %v2276_v61, 0.0 }
 0x228   : > { %2324 = vst.msk [vmem:[%s4225_s26 + $0x10] sm:$0xf] %vm2319_vm1, %v2661_v53 }
 0x229   : > { %v2663_v1 = vpack.c.bf16 %v2285_v63, %v2285_v63  ;;  %v2278_v42 = vadd.f32 %v4200_v35, %v2263_v4  ;;  %v2662_v46 = vpack.c.bf16 %v2284_v18, %v2284_v18 }
 0x22b   : > { %2326 = vst.msk [vmem:[%s4225_s26 + $0x18] sm:$0xf] %vm2319_vm1, %v2663_v1  ;;  %v2286_v0 = vmax.f32 %v2278_v42, 0.0  ;;  %2325 = vst.msk [vmem:[%s4225_s26 + $0x14] sm:$0xf] %vm2319_vm1, %v2662_v46 }
 0x22d   : > { %v2664_v37 = vpack.c.bf16 %v2286_v0, %v2286_v0 }
 0x22f   : > { %2327 = vst.msk [vmem:[%s4225_s26 + $0x1c] sm:$0xf] %vm2319_vm1, %v2664_v37 }
 0x230 PF: > { %p10_p9 = scmp.ge.s32.totalorder %s3369_s16, 4   ;;  %s4319_s12 = smov %s3326_s13 }
 0x231   : > { %s4320_s13 = smov %s3378_s19  ;;  %s4321_s14 = smov %s3369_s16 }
 0x232   :  { %12 = sbr.rel (!%p10_p9) target bundleno = 2 (0x2), region = 99 }

// kernel: net_forward.5
= control target key start
LH: loop header
LB: loop body
LE: loop exit
PB: predicated region body
PF: predicated region fallthrough
CT: control target
= control target key end

     0   :  { %vm3986_vm0 = vmmov 0   ;;  %s5672_s0 = inlined_call_operand.vmem [shape: bf16[4,8,1600], index: 0, kind: input, shape index: {}]   ;;  %s5673_s1 = inlined_call_operand.vmem [shape: bf16[1600,128], index: 1, kind: input, shape index: {}]   ;;  %s5674_s2 = inlined_call_operand.vmem [shape: f32[1,128], index: 2, kind: input, shape index: {}]   ;;  %s5675_s3 = inlined_call_operand.vmem [shape: f32[4,128,32], index: 3, kind: input, shape index: {}]   ;;  %s5676_s4 = inlined_call_operand.vmem [shape: f32[1,32], index: 4, kind: input, shape index: {}]   ;;  %s5677_s5 = inlined_call_operand.vmem [shape: f32[32,2], index: 5, kind: input, shape index: {}]   ;;  %s5678_s6 = inlined_call_operand.vmem [shape: f32[1,2], index: 6, kind: input, shape index: {}]   ;;  %s5679_s7 = inlined_call_operand.hbm [shape: f32[2,2], index: 7, kind: output, shape index: {}]  }
   0x1   :  { %v4031_v0 = vld [vmem:[%s5673_s1 + $0x78] sm:$0xff]   ;;  %v4054_v4 = vld [vmem:[%s5673_s1 + $0x70] sm:$0xff]   ;;  %v4078_v8 = vld [vmem:[%s5673_s1 + $0x68] sm:$0xff]  }
   0x2   :  { %v4036_v1 = vld [vmem:[%s5673_s1 + $0xf8] sm:$0xff]   ;;  %2890 = vmatprep.subr.bf16.mxu0 %v4031_v0  ;;  %v4060_v5 = vld [vmem:[%s5673_s1 + $0xf0] sm:$0xff]   ;;  %v4084_v9 = vld [vmem:[%s5673_s1 + $0xe8] sm:$0xff]  }
   0x3   :  { %v4042_v2 = vld [vmem:[%s5673_s1 + $0x38] sm:$0xff]   ;;  %2912 = vmatprep.subr.bf16.mxu1 %v4036_v1  ;;  %v4066_v6 = vld [vmem:[%s5673_s1 + $0x30] sm:$0xff]   ;;  %v4090_v10 = vld [vmem:[%s5673_s1 + $0x28] sm:$0xff]  }
   0x4   :  { %v4048_v3 = vld [vmem:[%s5673_s1 + $0xb8] sm:$0xff]   ;;  %2891 = vmatpush3.bf16.msra.mxu0 %v4042_v2  ;;  %v4072_v7 = vld [vmem:[%s5673_s1 + $0xb0] sm:$0xff]   ;;  %v4096_v11 = vld [vmem:[%s5673_s1 + $0xa8] sm:$0xff]  }
   0x5   :  { %2913 = vmatpush3.bf16.msra.mxu1 %v4048_v3  ;;  %2892 = vmatprep.subr.bf16.mxu0 %v4054_v4  ;;  %v4102_v12 = vld [vmem:[%s5673_s1 + $0x60] sm:$0xff]   ;;  %v4126_v16 = vld [vmem:[%s5673_s1 + $0x58] sm:$0xff]   ;;  %v4150_v20 = vld [vmem:[%s5673_s1 + $0x50] sm:$0xff]  }
   0x6   :  { %2914 = vmatprep.subr.bf16.mxu1 %v4060_v5  ;;  %v4108_v13 = vld [vmem:[%s5673_s1 + $0xe0] sm:$0xff]   ;;  %v4132_v17 = vld [vmem:[%s5673_s1 + $0xd8] sm:$0xff]   ;;  %v4156_v21 = vld [vmem:[%s5673_s1 + $0xd0] sm:$0xff]  }
   0x7   :  { %v4114_v14 = vld [vmem:[%s5673_s1 + $0x20] sm:$0xff]   ;;  %v4138_v18 = vld [vmem:[%s5673_s1 + $0x18] sm:$0xff]   ;;  %v4162_v22 = vld [vmem:[%s5673_s1 + $0x10] sm:$0xff]  }
   0x8   :  { %2893 = vmatpush3.bf16.msra.mxu0 %v4066_v6  ;;  %v4120_v15 = vld [vmem:[%s5673_s1 + $0xa0] sm:$0xff]   ;;  %v4144_v19 = vld [vmem:[%s5673_s1 + $0x98] sm:$0xff]   ;;  %v4168_v23 = vld [vmem:[%s5673_s1 + $0x90] sm:$0xff]  }
   0x9   :  { %2915 = vmatpush3.bf16.msra.mxu1 %v4072_v7  ;;  %2894 = vmatprep.subr.bf16.mxu0 %v4078_v8  ;;  %v4174_v24 = vld [vmem:[%s5673_s1 + $0x48] sm:$0xff]   ;;  %v4198_v28 = vld [vmem:[%s5673_s1 + $0x40] sm:$0xff]   ;;  %v4229_v38 = vld [vmem:[%s5673_s1 + $0x178] sm:$0xff]  }
   0xa   :  { %2916 = vmatprep.subr.bf16.mxu1 %v4084_v9  ;;  %v4180_v25 = vld [vmem:[%s5673_s1 + $0xc8] sm:$0xff]   ;;  %v4204_v29 = vld [vmem:[%s5673_s1 + $0xc0] sm:$0xff]   ;;  %v4234_v39 = vld [vmem:[%s5673_s1 + $0x1f8] sm:$0xff]  }
   0xb   :  { %v4186_v26 = vld [vmem:[%s5673_s1 + $0x8] sm:$0xff]   ;;  %v4210_v30 = vld [vmem:[%s5673_s1] sm:$0xff]   ;;  %v4239_v40 = vld [vmem:[%s5673_s1 + $0x138] sm:$0xff]  }
   0xc   :  { %2895 = vmatpush3.bf16.msra.mxu0 %v4090_v10  ;;  %v4192_v27 = vld [vmem:[%s5673_s1 + $0x88] sm:$0xff]   ;;  %v4216_v31 = vld [vmem:[%s5673_s1 + $0x80] sm:$0xff]   ;;  %v4244_v41 = vld [vmem:[%s5673_s1 + $0x1b8] sm:$0xff]  }
   0xd   :  { %2917 = vmatpush3.bf16.msra.mxu1 %v4096_v11  ;;  %2896 = vmatprep.subr.bf16.mxu0 %v4102_v12  ;;  %v228_v32 = vld [vmem:[%s5672_s0] sm:$0xff]  ;;  %v229_v33 = vld [vmem:[%s5672_s0 + $0x8] sm:$0xff]  ;;  %v4251_v42 = vld [vmem:[%s5673_s1 + $0x170] sm:$0xff]  }
   0xe   :  { %2918 = vmatprep.subr.bf16.mxu1 %v4108_v13  ;;  %v2661_v34 = vcombine.low %v228_v32, %v228_v32  ;;  %v2662_v35 = vcombine.high %v228_v32, %v228_v32  ;;  %v2663_v36 = vcombine.low %v229_v33, %v229_v33  ;;  %v2664_v37 = vcombine.high %v229_v33, %v229_v33  ;;  %v4258_v43 = vld [vmem:[%s5673_s1 + $0x1f0] sm:$0xff]   ;;  %v4275_v46 = vld [vmem:[%s5673_s1 + $0x168] sm:$0xff]   ;;  %v4299_v50 = vld [vmem:[%s5673_s1 + $0x160] sm:$0xff]  }
   0xf   :  { %v4264_v44 = vld [vmem:[%s5673_s1 + $0x130] sm:$0xff]   ;;  %v4282_v47 = vld [vmem:[%s5673_s1 + $0x1e8] sm:$0xff]   ;;  %v4306_v51 = vld [vmem:[%s5673_s1 + $0x1e0] sm:$0xff]  }
  0x10   :  { %2897 = vmatpush3.bf16.msra.mxu0 %v4114_v14  ;;  %916 = vmatprep.mubr.bf16.mxu0 %v2662_v35  ;;  %v4270_v45 = vld [vmem:[%s5673_s1 + $0x1b0] sm:$0xff]   ;;  %v4288_v48 = vld [vmem:[%s5673_s1 + $0x128] sm:$0xff]   ;;  %v4312_v52 = vld [vmem:[%s5673_s1 + $0x120] sm:$0xff]  }
  0x11   :  { %2919 = vmatpush3.bf16.msra.mxu1 %v4120_v15  ;;  %2898 = vmatprep.subr.bf16.mxu0 %v4126_v16  ;;  %v4294_v49 = vld [vmem:[%s5673_s1 + $0x1a8] sm:$0xff]   ;;  %v4318_v53 = vld [vmem:[%s5673_s1 + $0x1a0] sm:$0xff]   ;;  %v4323_v54 = vld [vmem:[%s5673_s1 + $0x158] sm:$0xff]  }
  0x12   :  { %2920 = vmatprep.subr.bf16.mxu1 %v4132_v17  ;;  %956 = vmatprep.mubr.bf16.mxu1 %v2664_v37  ;;  %5796 = vst [vmem:[#allocation5_spill] sm:$0xff] %v4318_v53  ;;  %v4330_v55 = vld [vmem:[%s5673_s1 + $0x1d8] sm:$0xff]   ;;  %v4347_v58 = vld [vmem:[%s5673_s1 + $0x150] sm:$0xff]   ;;  %v4371_v62 = vld [vmem:[%s5673_s1 + $0x148] sm:$0xff]  }
  0x13   :  { %5797 = vst [vmem:[#allocation6_spill] sm:$0xff] %v4330_v55  ;;  %v4336_v56 = vld [vmem:[%s5673_s1 + $0x118] sm:$0xff]   ;;  %v4354_v59 = vld [vmem:[%s5673_s1 + $0x1d0] sm:$0xff]   ;;  %v4378_v63 = vld [vmem:[%s5673_s1 + $0x1c8] sm:$0xff]  }
  0x14   :  { %2899 = vmatpush3.bf16.msra.mxu0 %v4138_v18  ;;  %v4342_v57 = vld [vmem:[%s5673_s1 + $0x198] sm:$0xff]   ;;  %5799 = vst [vmem:[#allocation8_spill] sm:$0xff] %v4354_v59  ;;  %v4360_v60 = vld [vmem:[%s5673_s1 + $0x110] sm:$0xff]   ;;  %5801 = vst [vmem:[#allocation10_spill] sm:$0xff] %v4378_v63 }
  0x15   :  { %2921 = vmatpush3.bf16.msra.mxu1 %v4144_v19  ;;  %2900 = vmatprep.subr.bf16.mxu0 %v4150_v20  ;;  %5798 = vst [vmem:[#allocation7_spill] sm:$0xff] %v4342_v57  ;;  %v4366_v61 = vld [vmem:[%s5673_s1 + $0x190] sm:$0xff]   ;;  %v4384_v32 = vld [vmem:[%s5673_s1 + $0x108] sm:$0xff]   ;;  %v4402_v35 = vld [vmem:[%s5673_s1 + $0x1c0] sm:$0xff]  }
  0x16   :  { %2922 = vmatprep.subr.bf16.mxu1 %v4156_v21  ;;  %5800 = vst [vmem:[#allocation9_spill] sm:$0xff] %v4366_v61  ;;  %v4390_v33 = vld [vmem:[%s5673_s1 + $0x188] sm:$0xff]   ;;  %5803 = vst [vmem:[#allocation12_spill] sm:$0xff] %v4402_v35  ;;  %v4414_v37 = vld [vmem:[%s5673_s1 + $0x180] sm:$0xff]  }
  0x17   :  { %5802 = vst [vmem:[#allocation11_spill] sm:$0xff] %v4390_v33  ;;  %5805 = vst [vmem:[#allocation14_spill] sm:$0xff] %v4414_v37 }
  0x18   :  { %2901 = vmatpush3.bf16.msra.mxu0 %v4162_v22 }
  0x19   :  { %2923 = vmatpush3.bf16.msra.mxu1 %v4168_v23  ;;  %2902 = vmatprep.subr.bf16.mxu0 %v4174_v24 }
  0x1a   :  { %2924 = vmatprep.subr.bf16.mxu1 %v4180_v25 }
  0x1c   :  { %2903 = vmatpush3.bf16.msra.mxu0 %v4186_v26 }
  0x1d   :  { %2925 = vmatpush3.bf16.msra.mxu1 %v4192_v27  ;;  %2904 = vmatprep.subr.bf16.mxu0 %v4198_v28 }
  0x1e   :  { %2926 = vmatprep.subr.bf16.mxu1 %v4204_v29 }
  0x20   :  { %2905 = vmatpush3.bf16.msra.mxu0 %v4210_v30 }
  0x21   :  { %2927 = vmatpush3.bf16.msra.mxu1 %v4216_v31  ;;  %2934 = vmatprep.subr.bf16.mxu0 %v4229_v38 }
  0x22   :  { %2956 = vmatprep.subr.bf16.mxu1 %v4234_v39 }
  0x23   :  { %917 = vmatmul.mubr.bf16.vlgmr.msra.gmra.mxu0 %v2661_v34  ;;  %v4395_v34 = vld [vmem:[%s5673_s1 + $0x140] sm:$0xff]  }
  0x24   :  { %957 = vmatmul.mubr.bf16.vlgmr.msra.gmra.mxu1 %v2663_v36  ;;  %2935 = vmatpush3.bf16.msra.mxu0 %v4239_v40  ;;  %v4408_v36 = vld [vmem:[%s5673_s1 + $0x100] sm:$0xff]  }
  0x25   :  { %2957 = vmatpush3.bf16.msra.mxu1 %v4244_v41  ;;  %2936 = vmatprep.subr.bf16.mxu0 %v4251_v42  ;;  %5804 = vst [vmem:[#allocation13_spill] sm:$0xff] %v4408_v36 }
  0x26   :  { %2958 = vmatprep.subr.bf16.mxu1 %v4258_v43 }
  0x28   :  { %2937 = vmatpush3.bf16.msra.mxu0 %v4264_v44 }
  0x29   :  { %2959 = vmatpush3.bf16.msra.mxu1 %v4270_v45  ;;  %2938 = vmatprep.subr.bf16.mxu0 %v4275_v46 }
  0x2a   :  { %2960 = vmatprep.subr.bf16.mxu1 %v4282_v47 }
  0x2c   :  { %2939 = vmatpush3.bf16.msra.mxu0 %v4288_v48 }
  0x2d   :  { %2961 = vmatpush3.bf16.msra.mxu1 %v4294_v49  ;;  %2940 = vmatprep.subr.bf16.mxu0 %v4299_v50 }
  0x2e   :  { %2962 = vmatprep.subr.bf16.mxu1 %v4306_v51 }
  0x30   :  { %2941 = vmatpush3.bf16.msra.mxu0 %v4312_v52 }
  0x31   :  { %2963 = vmatpush3.bf16.msra.mxu1 %v4318_v53  ;;  %2942 = vmatprep.subr.bf16.mxu0 %v4323_v54  ;;  %v5760_v53 = vmov 0.0  }
  0x32   :  { %2964 = vmatprep.subr.bf16.mxu1 %v4330_v55  ;;  %v4427_v55 = vld [vmem:[%s5673_s1 + $0x278] sm:$0xff]  }
  0x33   :  { %5806 = vst [vmem:[#allocation15_spill] sm:$0xff] %v4427_v55 }
  0x34   :  { %2943 = vmatpush3.bf16.msra.mxu0 %v4336_v56 }
  0x35   :  { %2965 = vmatpush3.bf16.msra.mxu1 %v4342_v57  ;;  %2944 = vmatprep.subr.bf16.mxu0 %v4347_v58 }
  0x36   :  { %2966 = vmatprep.subr.bf16.mxu1 %v4354_v59  ;;  %v231_v59 = vld [vmem:[%s5672_s0 + $0x18] sm:$0xff] }
  0x37   :  { %v2668_v57 = vcombine.high %v231_v59, %v231_v59 }
  0x38   :  { %2945 = vmatpush3.bf16.msra.mxu0 %v4360_v60 }
  0x39   :  { %2967 = vmatpush3.bf16.msra.mxu1 %v4366_v61  ;;  %2946 = vmatprep.subr.bf16.mxu0 %v4371_v62 }
  0x3a   :  { %2968 = vmatprep.subr.bf16.mxu1 %v4378_v63  ;;  %1036 = vmatprep.mubr.bf16.mxu1 %v2668_v57  ;;  %v4450_v57 = vld [vmem:[%s5673_s1 + $0x270] sm:$0xff]  }
  0x3b   :  { %5810 = vst [vmem:[#allocation19_spill] sm:$0xff] %v4450_v57 }
  0x3c   :  { %2947 = vmatpush3.bf16.msra.mxu0 %v4384_v32 }
  0x3d   :  { %2969 = vmatpush3.bf16.msra.mxu1 %v4390_v33  ;;  %2948 = vmatprep.subr.bf16.mxu0 %v4395_v34  ;;  %v230_v33 = vld [vmem:[%s5672_s0 + $0x10] sm:$0xff] }
  0x3e   :  { %2970 = vmatprep.subr.bf16.mxu1 %v4402_v35  ;;  %v2665_v63 = vcombine.low %v230_v33, %v230_v33  ;;  %v2666_v61 = vcombine.high %v230_v33, %v230_v33  ;;  %v2667_v35 = vcombine.low %v231_v59, %v231_v59  ;;  %v4432_v33 = vld [vmem:[%s5673_s1 + $0x2f8] sm:$0xff]  }
  0x3f   :  { %5807 = vst [vmem:[#allocation16_spill] sm:$0xff] %v4432_v33  ;;  %v4444_v59 = vld [vmem:[%s5673_s1 + $0x2b8] sm:$0xff]  }
  0x40   :  { %2949 = vmatpush3.bf16.msra.mxu0 %v4408_v36  ;;  %996 = vmatprep.mubr.bf16.mxu0 %v2666_v61  ;;  %5809 = vst [vmem:[#allocation18_spill] sm:$0xff] %v4444_v59  ;;  %v4456_v61 = vld [vmem:[%s5673_s1 + $0x2f0] sm:$0xff]  }
  0x41   :  { %2971 = vmatpush3.bf16.msra.mxu1 %v4414_v37  ;;  %2978 = vmatprep.subr.bf16.mxu0 %v4427_v55  ;;  %v4438_v37 = vld [vmem:[%s5673_s1 + $0x238] sm:$0xff]   ;;  %5811 = vst [vmem:[#allocation20_spill] sm:$0xff] %v4456_v61 }
  0x42   :  { %5808 = vst [vmem:[#allocation17_spill] sm:$0xff] %v4438_v37  ;;  %3000 = vmatprep.subr.bf16.mxu1 %v4432_v33  ;;  %v4480_v33 = vld [vmem:[%s5673_s1 + $0x2e8] sm:$0xff]  }
  0x43   :  { %997 = vmatmul.mubr.bf16.vlgmr.msra.gmra.mxu0 %v2665_v63  ;;  %v4462_v63 = vld [vmem:[%s5673_s1 + $0x230] sm:$0xff]   ;;  %5815 = vst [vmem:[#allocation24_spill] sm:$0xff] %v4480_v33 }
  0x44   :  { %1037 = vmatmul.mubr.bf16.vlgmr.msra.gmra.mxu1 %v2667_v35  ;;  %2979 = vmatpush3.bf16.msra.mxu0 %v4438_v37  ;;  %5812 = vst [vmem:[#allocation21_spill] sm:$0xff] %v4462_v63  ;;  %v4468_v35 = vld [vmem:[%s5673_s1 + $0x2b0] sm:$0xff]  }
  0x45   :  { %3001 = vmatpush3.bf16.msra.mxu1 %v4444_v59  ;;  %2980 = vmatprep.subr.bf16.mxu0 %v4450_v57  ;;  %5813 = vst [vmem:[#allocation22_spill] sm:$0xff] %v4468_v35  ;;  %v4474_v59 = vld [vmem:[%s5673_s1 + $0x268] sm:$0xff]  }
  0x46   :  { %3002 = vmatprep.subr.bf16.mxu1 %v4456_v61  ;;  %5814 = vst [vmem:[#allocation23_spill] sm:$0xff] %v4474_v59  ;;  %v4486_v61 = vld [vmem:[%s5673_s1 + $0x228] sm:$0xff]  }
  0x47   :  { %5816 = vst [vmem:[#allocation25_spill] sm:$0xff] %v4486_v61 }
  0x48   :  { %2981 = vmatpush3.bf16.msra.mxu0 %v4462_v63  ;;  %v4492_v63 = vld [vmem:[%s5673_s1 + $0x2a8] sm:$0xff]  }
  0x49   :  { %3003 = vmatpush3.bf16.msra.mxu1 %v4468_v35  ;;  %2982 = vmatprep.subr.bf16.mxu0 %v4474_v59  ;;  %5817 = vst [vmem:[#allocation26_spill] sm:$0xff] %v4492_v63  ;;  %v4498_v35 = vld [vmem:[%s5673_s1 + $0x260] sm:$0xff]  }
  0x4a   :  { %3004 = vmatprep.subr.bf16.mxu1 %v4480_v33  ;;  %5818 = vst [vmem:[#allocation27_spill] sm:$0xff] %v4498_v35  ;;  %v4504_v59 = vld [vmem:[%s5673_s1 + $0x2e0] sm:$0xff]  }
  0x4b   :  { %5819 = vst [vmem:[#allocation28_spill] sm:$0xff] %v4504_v59  ;;  %v4510_v33 = vld [vmem:[%s5673_s1 + $0x220] sm:$0xff]  }
  0x4c   :  { %2983 = vmatpush3.bf16.msra.mxu0 %v4486_v61  ;;  %5820 = vst [vmem:[#allocation29_spill] sm:$0xff] %v4510_v33  ;;  %v4516_v61 = vld [vmem:[%s5673_s1 + $0x2a0] sm:$0xff]  }
  0x4d   :  { %3005 = vmatpush3.bf16.msra.mxu1 %v4492_v63  ;;  %2984 = vmatprep.subr.bf16.mxu0 %v4498_v35  ;;  %5821 = vst [vmem:[#allocation30_spill] sm:$0xff] %v4516_v61  ;;  %v4522_v63 = vld [vmem:[%s5673_s1 + $0x258] sm:$0xff]  }
  0x4e   :  { %3006 = vmatprep.subr.bf16.mxu1 %v4504_v59  ;;  %5822 = vst [vmem:[#allocation31_spill] sm:$0xff] %v4522_v63  ;;  %v4528_v35 = vld [vmem:[%s5673_s1 + $0x2d8] sm:$0xff]  }
  0x4f   :  { %5823 = vst [vmem:[#allocation32_spill] sm:$0xff] %v4528_v35  ;;  %v4534_v59 = vld [vmem:[%s5673_s1 + $0x218] sm:$0xff]  }
  0x50   :  { %2985 = vmatpush3.bf16.msra.mxu0 %v4510_v33  ;;  %5824 = vst [vmem:[#allocation33_spill] sm:$0xff] %v4534_v59  ;;  %v4540_v33 = vld [vmem:[%s5673_s1 + $0x298] sm:$0xff]  }
  0x51   :  { %3007 = vmatpush3.bf16.msra.mxu1 %v4516_v61  ;;  %2986 = vmatprep.subr.bf16.mxu0 %v4522_v63  ;;  %5825 = vst [vmem:[#allocation34_spill] sm:$0xff] %v4540_v33  ;;  %v4546_v61 = vld [vmem:[%s5673_s1 + $0x250] sm:$0xff]  }
  0x52   :  { %3008 = vmatprep.subr.bf16.mxu1 %v4528_v35  ;;  %5826 = vst [vmem:[#allocation35_spill] sm:$0xff] %v4546_v61  ;;  %v4552_v63 = vld [vmem:[%s5673_s1 + $0x2d0] sm:$0xff]  }
  0x53   :  { %5827 = vst [vmem:[#allocation36_spill] sm:$0xff] %v4552_v63  ;;  %v4558_v35 = vld [vmem:[%s5673_s1 + $0x210] sm:$0xff]  }
  0x54   :  { %2987 = vmatpush3.bf16.msra.mxu0 %v4534_v59  ;;  %5828 = vst [vmem:[#allocation37_spill] sm:$0xff] %v4558_v35  ;;  %v4564_v59 = vld [vmem:[%s5673_s1 + $0x290] sm:$0xff]  }
  0x55   :  { %3009 = vmatpush3.bf16.msra.mxu1 %v4540_v33  ;;  %2988 = vmatprep.subr.bf16.mxu0 %v4546_v61  ;;  %5829 = vst [vmem:[#allocation38_spill] sm:$0xff] %v4564_v59  ;;  %v4570_v33 = vld [vmem:[%s5673_s1 + $0x248] sm:$0xff]  }
  0x56   :  { %3010 = vmatprep.subr.bf16.mxu1 %v4552_v63  ;;  %5830 = vst [vmem:[#allocation39_spill] sm:$0xff] %v4570_v33  ;;  %v4576_v61 = vld [vmem:[%s5673_s1 + $0x2c8] sm:$0xff]  }
  0x57   :  { %5831 = vst [vmem:[#allocation40_spill] sm:$0xff] %v4576_v61  ;;  %v4582_v63 = vld [vmem:[%s5673_s1 + $0x208] sm:$0xff]  }
  0x58   :  { %2989 = vmatpush3.bf16.msra.mxu0 %v4558_v35  ;;  %5832 = vst [vmem:[#allocation41_spill] sm:$0xff] %v4582_v63  ;;  %v4588_v35 = vld [vmem:[%s5673_s1 + $0x288] sm:$0xff]  }
  0x59   :  { %3011 = vmatpush3.bf16.msra.mxu1 %v4564_v59  ;;  %2990 = vmatprep.subr.bf16.mxu0 %v4570_v33  ;;  %5833 = vst [vmem:[#allocation42_spill] sm:$0xff] %v4588_v35  ;;  %v4594_v59 = vld [vmem:[%s5673_s1 + $0x240] sm:$0xff]  }
  0x5a   :  { %3012 = vmatprep.subr.bf16.mxu1 %v4576_v61  ;;  %5834 = vst [vmem:[#allocation43_spill] sm:$0xff] %v4594_v59  ;;  %v4600_v33 = vld [vmem:[%s5673_s1 + $0x2c0] sm:$0xff]  }
  0x5b   :  { %5835 = vst [vmem:[#allocation44_spill] sm:$0xff] %v4600_v33  ;;  %v4606_v61 = vld [vmem:[%s5673_s1 + $0x200] sm:$0xff]  }
  0x5c   :  { %2991 = vmatpush3.bf16.msra.mxu0 %v4582_v63  ;;  %5836 = vst [vmem:[#allocation45_spill] sm:$0xff] %v4606_v61  ;;  %v4612_v63 = vld [vmem:[%s5673_s1 + $0x280] sm:$0xff]  }
  0x5d   :  { %3013 = vmatpush3.bf16.msra.mxu1 %v4588_v35  ;;  %2992 = vmatprep.subr.bf16.mxu0 %v4594_v59  ;;  %5837 = vst [vmem:[#allocation46_spill] sm:$0xff] %v4612_v63  ;;  %v232_v35 = vld [vmem:[%s5672_s0 + $0x20] sm:$0xff]  ;;  %v233_v59 = vld [vmem:[%s5672_s0 + $0x28] sm:$0xff] }
  0x5e   :  { %3014 = vmatprep.subr.bf16.mxu1 %v4600_v33  ;;  %v2669_v57 = vcombine.low %v232_v35, %v232_v35  ;;  %v2670_v37 = vcombine.high %v232_v35, %v232_v35  ;;  %v2671_v55 = vcombine.low %v233_v59, %v233_v59  ;;  %v2672_v36 = vcombine.high %v233_v59, %v233_v59  ;;  %v4624_v33 = vld [vmem:[%s5673_s1 + $0x318] sm:$0xff]   ;;  %v4633_v59 = vld [vmem:[%s5673_s1 + $0x310] sm:$0xff]  }
  0x5f   :  { %5838 = vst [vmem:[#allocation47_spill] sm:$0xff] %v4624_v33  ;;  %5839 = vst [vmem:[#allocation48_spill] sm:$0xff] %v4633_v59  ;;  %v2775_v35 = vld [vmem:[%s5672_s0 + $0x34] sm:$0xff] }
  0x60   :  { %2993 = vmatpush3.bf16.msra.mxu0 %v4606_v61  ;;  %1076 = vmatprep.mubr.bf16.mxu0 %v2670_v37 }
  0x61   :  { %3015 = vmatpush3.bf16.msra.mxu1 %v4612_v63  ;;  %3511 = vmatprep.subr.bf16.mxu0 %v5760_v53 }
  0x62   :  { %1116 = vmatprep.mubr.bf16.mxu1 %v2672_v36  ;;  %3027 = vmatprep.subr.bf16.mxu1 %v4031_v0  ;;  %v2783_v36 = vcombine.high %v2775_v35, %v2775_v35  ;;  %v4647_v0 = vld [vmem:[%s5673_s1 + $0x308] sm:$0xff]  }
  0x63   :  { %1077 = vmatmul.mubr.bf16.vlgmr.msra.gmra.mxu0 %v2669_v57  ;;  %5840 = vst [vmem:[#allocation49_spill] sm:$0xff] %v4647_v0 }
  0x64   :  { %1117 = vmatmul.mubr.bf16.vlgmr.msra.gmra.mxu1 %v2671_v55  ;;  %3512 = vmatpush3.bf16.msra.mxu0 %v4624_v33 }
  0x65   :  { %3028 = vmatpush3.bf16.msra.mxu1 %v4042_v2  ;;  %3513 = vmatprep.subr.bf16.mxu0 %v5760_v53 }
  0x66   :  { %3029 = vmatprep.subr.bf16.mxu1 %v4054_v4  ;;  %3519 = vmatprep.mubr.msk.bf16.mxu0 %vm3986_vm0, %v5760_v53 }
  0x67   :  { %1252 = vmatprep.mubr.bf16.mxu1 %v2783_v36 }
  0x68   :  { %3514 = vmatpush3.bf16.msra.mxu0 %v4633_v59 }
  0x69   :  { %12 = vsyncpa [#allocation3], 0  ;;  %3030 = vmatpush3.bf16.msra.mxu1 %v4066_v6  ;;  %3515 = vmatprep.subr.bf16.mxu0 %v5760_v53  ;;  %v4656_v2 = vld [vmem:[%s5673_s1 + $0x300] sm:$0xff]   ;;  %v3825_v6 = vld [vmem:[%s5672_s0 + $0x30] ss:$0 sps:$4 sm:$0xff]   ;;  %vm880_vm1 = vcmask 523264  }
  0x6a   :  { %3031 = vmatprep.subr.bf16.mxu1 %v4078_v8  ;;  %5841 = vst [vmem:[#allocation50_spill] sm:$0xff] %v4656_v2  ;;  %v2776_v4 = vld [vmem:[%s5672_s0 + $0x3c] sm:$0xff]  ;;  %v5857_v37 = vld [vmem:[#allocation27_spill] sm:$0xff]  ;;  %vm2560_vm2 = vcmask 261120   ;;  %vm2634_vm3 = vcmask 9216  }
  0x6b   :  { %v2785_v8 = vcombine.high %v2776_v4, %v2776_v4  ;;  %v2780_v55 = vld [vmem:[%s5672_s0 + $0x5c] sm:$0xff] }
  0x6c   :  { %3516 = vmatpush3.bf16.msra.mxu0 %v4647_v0  ;;  %v2793_v36 = vcombine.high %v2780_v55, %v2780_v55 }
  0x6d   :  { %3032 = vmatpush3.bf16.msra.mxu1 %v4090_v10  ;;  %3517 = vmatprep.subr.bf16.mxu0 %v5760_v53  ;;  %v5870_v53 = vld [vmem:[#allocation26_spill] sm:$0xff] }
  0x6e   :  { %3033 = vmatprep.subr.bf16.mxu1 %v4102_v12  ;;  %v5842_v12 = vld [vmem:[#allocation5_spill] sm:$0xff] }
  0x70   :  { %3518 = vmatpush3.bf16.msra.mxu0 %v4656_v2 }
  0x71   :  { %3034 = vmatpush3.bf16.msra.mxu1 %v4114_v14  ;;  %3049 = vmatprep.subr.bf16.mxu0 %v4036_v1  ;;  %v2777_v1 = vld [vmem:[%s5672_s0 + $0x44] sm:$0xff] }
  0x72   :  { %3035 = vmatprep.subr.bf16.mxu1 %v4126_v16  ;;  %v5843_v14 = vld [vmem:[#allocation13_spill] sm:$0xff]  ;;  %v5845_v16 = vld [vmem:[#allocation15_spill] sm:$0xff] }
  0x73   :  { %3520 = vmatmul.mubr.msk.bf16.vlgmr.msra.gmra.mxu0 %vm880_vm1, %v3825_v6  ;;  %v5860_v6 = vld [vmem:[#allocation16_spill] sm:$0xff] }
  0x74   :  { %3050 = vmatpush3.bf16.msra.mxu0 %v4048_v3  ;;  %1292 = vmatprep.mubr.bf16.mxu0 %v2785_v8  ;;  %v2782_v3 = vcombine.low %v2775_v35, %v2775_v35  ;;  %v5858_v35 = vld [vmem:[#allocation14_spill] sm:$0xff]  ;;  %v5861_v8 = vld [vmem:[#allocation31_spill] sm:$0xff] }
  0x75   :  { %3036 = vmatpush3.bf16.msra.mxu1 %v4138_v18  ;;  %3051 = vmatprep.subr.bf16.mxu0 %v4060_v5  ;;  %v2787_v5 = vcombine.high %v2777_v1, %v2777_v1  ;;  %v5846_v18 = vld [vmem:[#allocation7_spill] sm:$0xff] }
  0x76   :  { %3037 = vmatprep.subr.bf16.mxu1 %v4150_v20  ;;  %v5848_v20 = vld [vmem:[#allocation8_spill] sm:$0xff] }
  0x78   :  { %3052 = vmatpush3.bf16.msra.mxu0 %v4072_v7  ;;  %v2778_v7 = vld [vmem:[%s5672_s0 + $0x4c] sm:$0xff] }
  0x79   :  { %3038 = vmatpush3.bf16.msra.mxu1 %v4162_v22  ;;  %3053 = vmatprep.subr.bf16.mxu0 %v4084_v9  ;;  %v2784_v9 = vcombine.low %v2776_v4, %v2776_v4  ;;  %v2789_v10 = vcombine.high %v2778_v7, %v2778_v7  ;;  %v5850_v22 = vld [vmem:[#allocation9_spill] sm:$0xff]  ;;  %v2788_v57 = vcombine.low %v2778_v7, %v2778_v7  ;;  %v5866_v7 = vld [vmem:[#allocation22_spill] sm:$0xff] }
  0x7a   :  { %3039 = vmatprep.subr.bf16.mxu1 %v4174_v24  ;;  %v5852_v24 = vld [vmem:[#allocation10_spill] sm:$0xff]  ;;  %v5859_v4 = vld [vmem:[#allocation29_spill] sm:$0xff] }
  0x7c   :  { %3054 = vmatpush3.bf16.msra.mxu0 %v4096_v11  ;;  %v2779_v11 = vld [vmem:[%s5672_s0 + $0x54] sm:$0xff] }
  0x7d   :  { %3040 = vmatpush3.bf16.msra.mxu1 %v4186_v26  ;;  %3055 = vmatprep.subr.bf16.mxu0 %v4108_v13  ;;  %v2786_v13 = vcombine.low %v2777_v1, %v2777_v1  ;;  %v5854_v26 = vld [vmem:[#allocation11_spill] sm:$0xff]  ;;  %v5862_v1 = vld [vmem:[#allocation18_spill] sm:$0xff] }
  0x7e   :  { %3041 = vmatprep.subr.bf16.mxu1 %v4198_v28  ;;  %v5856_v28 = vld [vmem:[#allocation12_spill] sm:$0xff] }
  0x80   :  { %3056 = vmatpush3.bf16.msra.mxu0 %v4120_v15  ;;  %v5844_v15 = vld [vmem:[#allocation6_spill] sm:$0xff] }
  0x81   :  { %3042 = vmatpush3.bf16.msra.mxu1 %v4210_v30  ;;  %3057 = vmatprep.subr.bf16.mxu0 %v4132_v17  ;;  %v2791_v17 = vcombine.high %v2779_v11, %v2779_v11 }
  0x82   :  { %3071 = vmatprep.subr.bf16.mxu1 %v4229_v38 }
  0x84   :  { %1253 = vmatmul.mubr.bf16.vlgmr.msra.gmra.mxu1 %v2782_v3  ;;  %3058 = vmatpush3.bf16.msra.mxu0 %v4144_v19  ;;  %v5847_v19 = vld [vmem:[#allocation17_spill] sm:$0xff] }
  0x85   :  { %3072 = vmatpush3.bf16.msra.mxu1 %v4239_v40  ;;  %3059 = vmatprep.subr.bf16.mxu0 %v4156_v21  ;;  %v5849_v21 = vld [vmem:[#allocation19_spill] sm:$0xff]  ;;  %v5863_v3 = vld [vmem:[#allocation33_spill] sm:$0xff] }
  0x86   :  { %3073 = vmatprep.subr.bf16.mxu1 %v4251_v42  ;;  %1332 = vmatprep.mubr.bf16.mxu1 %v2787_v5  ;;  %v5864_v5 = vld [vmem:[#allocation20_spill] sm:$0xff] }
  0x88   :  { %3060 = vmatpush3.bf16.msra.mxu0 %v4168_v23  ;;  %v5851_v23 = vld [vmem:[#allocation21_spill] sm:$0xff] }
  0x89   :  { %3074 = vmatpush3.bf16.msra.mxu1 %v4264_v44  ;;  %3061 = vmatprep.subr.bf16.mxu0 %v4180_v25  ;;  %v5853_v25 = vld [vmem:[#allocation23_spill] sm:$0xff] }
  0x8a   :  { %3075 = vmatprep.subr.bf16.mxu1 %v4275_v46 }
  0x8c   :  { %3062 = vmatpush3.bf16.msra.mxu0 %v4192_v27  ;;  %v5855_v27 = vld [vmem:[#allocation25_spill] sm:$0xff] }
  0x8d   :  { %3076 = vmatpush3.bf16.msra.mxu1 %v4288_v48  ;;  %3063 = vmatprep.subr.bf16.mxu0 %v4204_v29 }
  0x8e   :  { %3077 = vmatprep.subr.bf16.mxu1 %v4299_v50 }
  0x90   :  { %3064 = vmatpush3.bf16.msra.mxu0 %v4216_v31 }
  0x91   :  { %3078 = vmatpush3.bf16.msra.mxu1 %v4312_v52  ;;  %3093 = vmatprep.subr.bf16.mxu0 %v4234_v39 }
  0x92   :  { %3079 = vmatprep.subr.bf16.mxu1 %v4323_v54 }
  0x93   :  { %1293 = vmatmul.mubr.bf16.vlgmr.msra.gmra.mxu0 %v2784_v9  ;;  %v5865_v9 = vld [vmem:[#allocation35_spill] sm:$0xff] }
  0x94   :  { %3094 = vmatpush3.bf16.msra.mxu0 %v4244_v41  ;;  %1372 = vmatprep.mubr.bf16.mxu0 %v2789_v10  ;;  %v5867_v10 = vld [vmem:[#allocation37_spill] sm:$0xff] }
  0x95   :  { %3080 = vmatpush3.bf16.msra.mxu1 %v4336_v56  ;;  %3095 = vmatprep.subr.bf16.mxu0 %v4258_v43 }
  0x96   :  { %3081 = vmatprep.subr.bf16.mxu1 %v4347_v58 }
  0x98   :  { %3096 = vmatpush3.bf16.msra.mxu0 %v4270_v45 }
  0x99   :  { %3082 = vmatpush3.bf16.msra.mxu1 %v4360_v60  ;;  %3097 = vmatprep.subr.bf16.mxu0 %v4282_v47 }
  0x9a   :  { %3083 = vmatprep.subr.bf16.mxu1 %v4371_v62 }
  0x9c   :  { %3098 = vmatpush3.bf16.msra.mxu0 %v4294_v49 }
  0x9d   :  { %3084 = vmatpush3.bf16.msra.mxu1 %v4384_v32  ;;  %3099 = vmatprep.subr.bf16.mxu0 %v4306_v51 }
  0x9e   :  { %3085 = vmatprep.subr.bf16.mxu1 %v4395_v34 }
  0xa0   :  { %3100 = vmatpush3.bf16.msra.mxu0 %v5842_v12 }
  0xa1   :  { %3086 = vmatpush3.bf16.msra.mxu1 %v5843_v14  ;;  %3101 = vmatprep.subr.bf16.mxu0 %v5844_v15 }
  0xa2   :  { %3115 = vmatprep.subr.bf16.mxu1 %v5845_v16 }
  0xa4   :  { %1333 = vmatmul.mubr.bf16.vlgmr.msra.gmra.mxu1 %v2786_v13  ;;  %3102 = vmatpush3.bf16.msra.mxu0 %v5846_v18  ;;  %v5868_v13 = vld [vmem:[#allocation24_spill] sm:$0xff] }
  0xa5   :  { %3116 = vmatpush3.bf16.msra.mxu1 %v5847_v19  ;;  %3103 = vmatprep.subr.bf16.mxu0 %v5848_v20 }
  0xa6   :  { %3117 = vmatprep.subr.bf16.mxu1 %v5849_v21  ;;  %1412 = vmatprep.mubr.bf16.mxu1 %v2791_v17  ;;  %v5869_v17 = vld [vmem:[#allocation39_spill] sm:$0xff] }
  0xa8   :  { %3104 = vmatpush3.bf16.msra.mxu0 %v5850_v22 }
  0xa9   :  { %3118 = vmatpush3.bf16.msra.mxu1 %v5851_v23  ;;  %3105 = vmatprep.subr.bf16.mxu0 %v5852_v24 }
  0xaa   :  { %3119 = vmatprep.subr.bf16.mxu1 %v5853_v25 }
  0xac   :  { %3106 = vmatpush3.bf16.msra.mxu0 %v5854_v26 }
  0xad   :  { %3120 = vmatpush3.bf16.msra.mxu1 %v5855_v27  ;;  %3107 = vmatprep.subr.bf16.mxu0 %v5856_v28 }
  0xae   :  { %3121 = vmatprep.subr.bf16.mxu1 %v5857_v37  ;;  %v5877_v37 = vld [vmem:[#allocation34_spill] sm:$0xff] }
  0xb0   :  { %3108 = vmatpush3.bf16.msra.mxu0 %v5858_v35 }
  0xb1   :  { %3122 = vmatpush3.bf16.msra.mxu1 %v5859_v4  ;;  %3137 = vmatprep.subr.bf16.mxu0 %v5860_v6  ;;  %v2790_v4 = vcombine.low %v2779_v11, %v2779_v11  ;;  %v5880_v11 = vld [vmem:[#allocation40_spill] sm:$0xff] }
  0xb2   :  { %3123 = vmatprep.subr.bf16.mxu1 %v5861_v8  ;;  %v5872_v8 = vld [vmem:[#allocation28_spill] sm:$0xff] }
  0xb3   :  { %1373 = vmatmul.mubr.bf16.vlgmr.msra.gmra.mxu0 %v2788_v57  ;;  %v5871_v57 = vld [vmem:[#allocation41_spill] sm:$0xff] }
  0xb4   :  { %3138 = vmatpush3.bf16.msra.mxu0 %v5862_v1  ;;  %1452 = vmatprep.mubr.bf16.mxu0 %v2793_v36  ;;  %v5873_v36 = vld [vmem:[#allocation43_spill] sm:$0xff] }
  0xb5   :  { %3124 = vmatpush3.bf16.msra.mxu1 %v5863_v3  ;;  %3139 = vmatprep.subr.bf16.mxu0 %v5864_v5  ;;  %v5874_v3 = vld [vmem:[#allocation30_spill] sm:$0xff] }
  0xb6   :  { %3125 = vmatprep.subr.bf16.mxu1 %v5865_v9  ;;  %v5875_v9 = vld [vmem:[#allocation32_spill] sm:$0xff] }
  0xb8   :  { %3140 = vmatpush3.bf16.msra.mxu0 %v5866_v7 }
  0xb9   :  { %3126 = vmatpush3.bf16.msra.mxu1 %v5867_v10  ;;  %3141 = vmatprep.subr.bf16.mxu0 %v5868_v13  ;;  %v5876_v10 = vmov 0.0  }
  0xba   :  { %3127 = vmatprep.subr.bf16.mxu1 %v5869_v17  ;;  %v5878_v17 = vld [vmem:[#allocation36_spill] sm:$0xff] }
  0xbc   :  { %3142 = vmatpush3.bf16.msra.mxu0 %v5870_v53 }
  0xbd   :  { %3128 = vmatpush3.bf16.msra.mxu1 %v5871_v57  ;;  %3143 = vmatprep.subr.bf16.mxu0 %v5872_v8  ;;  %v4781_v57 = vld [vmem:[%s5672_s0 + $0x68] sm:$0xff] }
  0xbe   :  { %3129 = vmatprep.subr.bf16.mxu1 %v5873_v36  ;;  %v5879_v36 = vld [vmem:[#allocation38_spill] sm:$0xff] }
  0xc0   :  { %3144 = vmatpush3.bf16.msra.mxu0 %v5874_v3 }
  0xc1   :  { %3130 = vmatpush3.bf16.msra.mxu1 %v4606_v61  ;;  %3145 = vmatprep.subr.bf16.mxu0 %v5875_v9  ;;  %v2792_v61 = vcombine.low %v2780_v55, %v2780_v55  ;;  %v4796_v55 = vld [vmem:[%s5673_s1 + $0x78] sm:$0xff]  }
  0xc2   :  { %3523 = vmatprep.subr.bf16.mxu1 %v5876_v10  ;;  %5883 = vst [vmem:[#allocation5_spill] sm:$0xff] %v4796_v55 }
  0xc4   :  { %1413 = vmatmul.mubr.bf16.vlgmr.msra.gmra.mxu1 %v2790_v4  ;;  %3146 = vmatpush3.bf16.msra.mxu0 %v5877_v37  ;;  %v5881_v4 = vld [vmem:[#allocation42_spill] sm:$0xff] }
  0xc5   :  { %3524 = vmatpush3.bf16.msra.mxu1 %v4624_v33  ;;  %3147 = vmatprep.subr.bf16.mxu0 %v5878_v17  ;;  %v5882_v33 = vld [vmem:[#allocation44_spill] sm:$0xff] }
  0xc6   :  { %3525 = vmatprep.subr.bf16.mxu1 %v5876_v10  ;;  %3531 = vmatprep.mubr.msk.bf16.mxu1 %vm3986_vm0, %v5876_v10 }
  0xc8   :  { %3148 = vmatpush3.bf16.msra.mxu0 %v5879_v36 }
  0xc9   :  { %3526 = vmatpush3.bf16.msra.mxu1 %v4633_v59  ;;  %3149 = vmatprep.subr.bf16.mxu0 %v5880_v11  ;;  %v3838_v59 = vld [vmem:[%s5672_s0 + $0x64] ss:$0 sps:$4 sm:$0xff]  }
  0xca   :  { %3527 = vmatprep.subr.bf16.mxu1 %v5876_v10 }
  0xcc   :  { %3150 = vmatpush3.bf16.msra.mxu0 %v5881_v4 }
  0xcd   :  { %3528 = vmatpush3.bf16.msra.mxu1 %v4647_v0  ;;  %3151 = vmatprep.subr.bf16.mxu0 %v5882_v33  ;;  %v4790_v0 = vld [vmem:[%s5672_s0 + $0x70] sm:$0xff] }
  0xce   :  { %3529 = vmatprep.subr.bf16.mxu1 %v5876_v10  ;;  %v4802_v10 = vld [vmem:[%s5673_s1 + $0xf8] sm:$0xff]  }
  0xcf   :  { %5884 = vst [vmem:[#allocation13_spill] sm:$0xff] %v4802_v10 }
  0xd0   :  { %3152 = vmatpush3.bf16.msra.mxu0 %v4612_v63  ;;  %v2804_v63 = vcombine.high %v4781_v57, %v4781_v57 }
  0xd1   :  { %3530 = vmatpush3.bf16.msra.mxu1 %v4656_v2  ;;  %3164 = vmatprep.subr.bf16.mxu0 %v4796_v55  ;;  %v2806_v2 = vcombine.high %v4790_v0, %v4790_v0  ;;  %v4813_v55 = vld [vmem:[%s5673_s1 + $0x38] sm:$0xff]  }
  0xd2   :  { %3186 = vmatprep.subr.bf16.mxu1 %v4802_v10  ;;  %5885 = vst [vmem:[#allocation6_spill] sm:$0xff] %v4813_v55  ;;  %v4819_v10 = vld [vmem:[%s5673_s1 + $0xb8] sm:$0xff]  }
  0xd3   :  { %1453 = vmatmul.mubr.bf16.vlgmr.msra.gmra.mxu0 %v2792_v61  ;;  %5886 = vst [vmem:[#allocation15_spill] sm:$0xff] %v4819_v10  ;;  %v4825_v61 = vld [vmem:[%s5673_s1 + $0x70] sm:$0xff]  }
  0xd4   :  { %3532 = vmatmul.mubr.msk.bf16.vlgmr.msra.gmra.mxu1 %vm880_vm1, %v3838_v59  ;;  %3165 = vmatpush3.bf16.msra.mxu0 %v4813_v55  ;;  %5887 = vst [vmem:[#allocation7_spill] sm:$0xff] %v4825_v61  ;;  %v4831_v59 = vld [vmem:[%s5673_s1 + $0xf0] sm:$0xff]  }
  0xd5   :  { %3187 = vmatpush3.bf16.msra.mxu1 %v4819_v10  ;;  %3166 = vmatprep.subr.bf16.mxu0 %v4825_v61  ;;  %5888 = vst [vmem:[#allocation17_spill] sm:$0xff] %v4831_v59  ;;  %v4837_v10 = vld [vmem:[%s5673_s1 + $0x30] sm:$0xff]  }
  0xd6   :  { %3188 = vmatprep.subr.bf16.mxu1 %v4831_v59  ;;  %1588 = vmatprep.mubr.bf16.mxu0 %v2804_v63  ;;  %5889 = vst [vmem:[#allocation8_spill] sm:$0xff] %v4837_v10  ;;  %v4843_v61 = vld [vmem:[%s5673_s1 + $0xb0] sm:$0xff]   ;;  %v4849_v59 = vld [vmem:[%s5673_s1 + $0x68] sm:$0xff]  }
  0xd7   :  { %1628 = vmatprep.mubr.bf16.mxu1 %v2806_v2  ;;  %5890 = vst [vmem:[#allocation19_spill] sm:$0xff] %v4843_v61  ;;  %5891 = vst [vmem:[#allocation9_spill] sm:$0xff] %v4849_v59  ;;  %v4855_v63 = vld [vmem:[%s5673_s1 + $0xe8] sm:$0xff]  }
  0xd8   :  { %3167 = vmatpush3.bf16.msra.mxu0 %v4837_v10  ;;  %5892 = vst [vmem:[#allocation21_spill] sm:$0xff] %v4855_v63  ;;  %v4861_v2 = vld [vmem:[%s5673_s1 + $0x28] sm:$0xff]  }
  0xd9   :  { %3189 = vmatpush3.bf16.msra.mxu1 %v4843_v61  ;;  %3168 = vmatprep.subr.bf16.mxu0 %v4849_v59  ;;  %5893 = vst [vmem:[#allocation10_spill] sm:$0xff] %v4861_v2  ;;  %v4867_v61 = vld [vmem:[%s5673_s1 + $0xa8] sm:$0xff]   ;;  %v4873_v59 = vld [vmem:[%s5673_s1 + $0x60] sm:$0xff]  }
  0xda   :  { %3190 = vmatprep.subr.bf16.mxu1 %v4855_v63  ;;  %5894 = vst [vmem:[#allocation23_spill] sm:$0xff] %v4867_v61  ;;  %5895 = vst [vmem:[#allocation11_spill] sm:$0xff] %v4873_v59  ;;  %v4879_v63 = vld [vmem:[%s5673_s1 + $0xe0] sm:$0xff]  }
  0xdb   :  { %5896 = vst [vmem:[#allocation25_spill] sm:$0xff] %v4879_v63 }
  0xdc   :  { %3169 = vmatpush3.bf16.msra.mxu0 %v4861_v2  ;;  %v4885_v2 = vld [vmem:[%s5673_s1 + $0x20] sm:$0xff]  }
  0xdd   :  { %3191 = vmatpush3.bf16.msra.mxu1 %v4867_v61  ;;  %3170 = vmatprep.subr.bf16.mxu0 %v4873_v59  ;;  %5897 = vst [vmem:[#allocation12_spill] sm:$0xff] %v4885_v2  ;;  %v4891_v61 = vld [vmem:[%s5673_s1 + $0xa0] sm:$0xff]   ;;  %v4897_v59 = vld [vmem:[%s5673_s1 + $0x58] sm:$0xff]  }
  0xde   :  { %3192 = vmatprep.subr.bf16.mxu1 %v4879_v63  ;;  %5898 = vst [vmem:[#allocation14_spill] sm:$0xff] %v4891_v61  ;;  %5899 = vst [vmem:[#allocation16_spill] sm:$0xff] %v4897_v59 }
  0xe0   :  { %3171 = vmatpush3.bf16.msra.mxu0 %v4885_v2  ;;  %v4903_v2 = vld [vmem:[%s5673_s1 + $0xd8] sm:$0xff]  }
  0xe1   :  { %3193 = vmatpush3.bf16.msra.mxu1 %v4891_v61  ;;  %3172 = vmatprep.subr.bf16.mxu0 %v4897_v59  ;;  %5900 = vst [vmem:[#allocation18_spill] sm:$0xff] %v4903_v2  ;;  %v4909_v61 = vld [vmem:[%s5673_s1 + $0x18] sm:$0xff]  }
  0xe2   :  { %3194 = vmatprep.subr.bf16.mxu1 %v4903_v2  ;;  %5901 = vst [vmem:[#allocation20_spill] sm:$0xff] %v4909_v61  ;;  %v4915_v59 = vld [vmem:[%s5673_s1 + $0x98] sm:$0xff]   ;;  %v4921_v2 = vld [vmem:[%s5673_s1 + $0x50] sm:$0xff]  }
  0xe3   :  { %v2906_v63 = vpop.f32.mrf.mxu0 }
  0xe4   :  { %v2928_v10 = vpop.f32.mrf.mxu1  ;;  %3173 = vmatpush3.bf16.msra.mxu0 %v4909_v61  ;;  %v4927_v61 = vld [vmem:[%s5673_s1 + $0xd0] sm:$0xff]  }
  0xe5   :  { %v2907_v55 = vpop.f32.mrf.mxu0  ;;  %3195 = vmatpush3.bf16.msra.mxu1 %v4915_v59  ;;  %3174 = vmatprep.subr.bf16.mxu0 %v4921_v2 }
  0xe6   :  { %v2929_v33 = vpop.f32.mrf.mxu1  ;;  %v2908_v4 = vadd.f32 %v2907_v55, %v2906_v63  ;;  %3196 = vmatprep.subr.bf16.mxu1 %v4927_v61  ;;  %v4963_v63 = vld [vmem:[%s5673_s1 + $0x88] sm:$0xff]  }
  0xe7   :  { %v2930_v11 = vadd.f32 %v2929_v33, %v2928_v10  ;;  %v2909_v36 = vpop.f32.mrf.mxu0  ;;  %v4933_v33 = vld [vmem:[%s5673_s1 + $0x10] sm:$0xff]   ;;  %5904 = vst [vmem:[#allocation26_spill] sm:$0xff] %v4963_v63 }
  0xe8   :  { %v2931_v17 = vpop.f32.mrf.mxu1  ;;  %3175 = vmatpush3.bf16.msra.mxu0 %v4933_v33  ;;  %v4939_v36 = vld [vmem:[%s5673_s1 + $0x90] sm:$0xff]  }
  0xe9   :  { %v959_v37 = vadd.f32 %v2930_v11, %v2908_v4  ;;  %v2910_v10 = vpop.f32.mrf.mxu0  ;;  %5902 = vst [vmem:[#allocation22_spill] sm:$0xff] %v4939_v36  ;;  %3197 = vmatpush3.bf16.msra.mxu1 %v4939_v36  ;;  %v4945_v17 = vld [vmem:[%s5673_s1 + $0x48] sm:$0xff]   ;;  %v2799_v36 = vld [vmem:[%s5672_s0 + $0x80] sm:$0xff] }
  0xea   :  { %v2932_v55 = vpop.f32.mrf.mxu1  ;;  %3176 = vmatprep.subr.bf16.mxu0 %v4945_v17  ;;  %v4951_v11 = vld [vmem:[%s5673_s1 + $0xc8] sm:$0xff]   ;;  %v4969_v10 = vld [vmem:[%s5673_s1 + $0x40] sm:$0xff]  }
  0xeb   :  { %5903 = vst [vmem:[#allocation24_spill] sm:$0xff] %v4951_v11  ;;  %3198 = vmatprep.subr.bf16.mxu1 %v4951_v11  ;;  %v4957_v4 = vld [vmem:[%s5673_s1 + $0x8] sm:$0xff]   ;;  %v2803_v55 = vcombine.low %v4781_v57, %v4781_v57  ;;  %v2798_v11 = vld [vmem:[%s5672_s0 + $0x78] sm:$0xff]  ;;  %v2810_v57 = vcombine.high %v2799_v36, %v2799_v36 }
  0xec   :  { %3177 = vmatpush3.bf16.msra.mxu0 %v4957_v4 }
  0xed   :  { %3199 = vmatpush3.bf16.msra.mxu1 %v4963_v63  ;;  %3178 = vmatprep.subr.bf16.mxu0 %v4969_v10  ;;  %v2805_v63 = vcombine.low %v4790_v0, %v4790_v0  ;;  %v5909_v0 = vld [vmem:[#allocation34_spill] sm:$0xff] }
  0xee   :  { %3200 = vmatprep.subr.bf16.mxu1 %v4204_v29  ;;  %v2808_v29 = vcombine.high %v2798_v11, %v2798_v11 }
  0xf0   :  { %3179 = vmatpush3.bf16.msra.mxu0 %v4210_v30 }
  0xf1   :  { %3201 = vmatpush3.bf16.msra.mxu1 %v4216_v31  ;;  %3208 = vmatprep.subr.bf16.mxu0 %v4229_v38 }
  0xf2   :  { %3230 = vmatprep.subr.bf16.mxu1 %v4234_v39 }
  0xf3   :  { %1589 = vmatmul.mubr.bf16.vlgmr.msra.gmra.mxu0 %v2803_v55 }
  0xf4   :  { %1629 = vmatmul.mubr.bf16.vlgmr.msra.gmra.mxu1 %v2805_v63  ;;  %3209 = vmatpush3.bf16.msra.mxu0 %v4239_v40 }
  0xf5   :  { %3231 = vmatpush3.bf16.msra.mxu1 %v4244_v41  ;;  %3210 = vmatprep.subr.bf16.mxu0 %v4251_v42 }
  0xf6   :  { %3232 = vmatprep.subr.bf16.mxu1 %v4258_v43  ;;  %1668 = vmatprep.mubr.bf16.mxu0 %v2808_v29  ;;  %v5924_v29 = vld [vmem:[#allocation47_spill] sm:$0xff] }
  0xf7   :  { %1708 = vmatprep.mubr.bf16.mxu1 %v2810_v57  ;;  %v5925_v57 = vld [vmem:[#allocation6_spill] sm:$0xff] }
  0xf8   :  { %3211 = vmatpush3.bf16.msra.mxu0 %v4264_v44 }
  0xf9   :  { %3233 = vmatpush3.bf16.msra.mxu1 %v4270_v45  ;;  %3212 = vmatprep.subr.bf16.mxu0 %v4275_v46 }
  0xfa   :  { %3234 = vmatprep.subr.bf16.mxu1 %v4282_v47 }
  0xfc   :  { %3213 = vmatpush3.bf16.msra.mxu0 %v4288_v48  ;;  %v2807_v48 = vcombine.low %v2798_v11, %v2798_v11 }
  0xfd   :  { %3235 = vmatpush3.bf16.msra.mxu1 %v4294_v49  ;;  %3214 = vmatprep.subr.bf16.mxu0 %v4299_v50  ;;  %v2800_v49 = vld [vmem:[%s5672_s0 + $0x88] sm:$0xff]  ;;  %v2809_v50 = vcombine.low %v2799_v36, %v2799_v36 }
  0xfe   :  { %3236 = vmatprep.subr.bf16.mxu1 %v4306_v51  ;;  %v2801_v51 = vld [vmem:[%s5672_s0 + $0x90] sm:$0xff]  ;;  %v5923_v36 = vld [vmem:[#allocation5_spill] sm:$0xff] }
 0x100   :  { %3215 = vmatpush3.bf16.msra.mxu0 %v4312_v52  ;;  %v2812_v52 = vcombine.high %v2800_v49, %v2800_v49 }
 0x101   :  { %3237 = vmatpush3.bf16.msra.mxu1 %v5842_v12  ;;  %3216 = vmatprep.subr.bf16.mxu0 %v4323_v54  ;;  %v2814_v54 = vcombine.high %v2801_v51, %v2801_v51 }
 0x102   :  { %3238 = vmatprep.subr.bf16.mxu1 %v5844_v15 }
 0x103   :  { %v2950_v30 = vpop.f32.mrf.mxu0 }
 0x104   :  { %v2972_v31 = vpop.f32.mrf.mxu1  ;;  %3217 = vmatpush3.bf16.msra.mxu0 %v4336_v56  ;;  %v5905_v56 = vld [vmem:[#allocation27_spill] sm:$0xff] }
 0x105   :  { %3239 = vmatpush3.bf16.msra.mxu1 %v5846_v18  ;;  %v2951_v38 = vpop.f32.mrf.mxu0  ;;  %3218 = vmatprep.subr.bf16.mxu0 %v4347_v58  ;;  %v5906_v58 = vld [vmem:[#allocation29_spill] sm:$0xff] }
 0x106   :  { %v2952_v39 = vadd.f32 %v2951_v38, %v2950_v30  ;;  %v2973_v40 = vpop.f32.mrf.mxu1  ;;  %3240 = vmatprep.subr.bf16.mxu1 %v5848_v20 }
 0x107   :  { %v2974_v41 = vadd.f32 %v2973_v40, %v2972_v31  ;;  %v2953_v42 = vpop.f32.mrf.mxu0  ;;  %v5926_v31 = vld [vmem:[#allocation7_spill] sm:$0xff]  ;;  %v5928_v40 = vld [vmem:[#allocation8_spill] sm:$0xff] }
 0x108   :  { %v999_v43 = vadd.f32 %v2952_v39, %v959_v37  ;;  %v2975_v44 = vpop.f32.mrf.mxu1  ;;  %3219 = vmatpush3.bf16.msra.mxu0 %v4360_v60  ;;  %v5907_v60 = vld [vmem:[#allocation31_spill] sm:$0xff]  ;;  %v5916_v37 = vld [vmem:[#allocation41_spill] sm:$0xff]  ;;  %v5927_v39 = vld [vmem:[#allocation48_spill] sm:$0xff] }
 0x109   :  { %3241 = vmatpush3.bf16.msra.mxu1 %v5850_v22  ;;  %v2954_v45 = vpop.f32.mrf.mxu0  ;;  %3220 = vmatprep.subr.bf16.mxu0 %v4371_v62  ;;  %v5912_v22 = vld [vmem:[#allocation37_spill] sm:$0xff]  ;;  %v5931_v44 = vld [vmem:[#allocation10_spill] sm:$0xff] }
 0x10a   :  { %v1039_v46 = vadd.f32 %v2974_v41, %v999_v43  ;;  %v2976_v47 = vpop.f32.mrf.mxu1  ;;  %3242 = vmatprep.subr.bf16.mxu1 %v5852_v24  ;;  %v5929_v42 = vld [vmem:[#allocation9_spill] sm:$0xff] }
 0x10b   :  { %v5930_v43 = vld [vmem:[#allocation49_spill] sm:$0xff]  ;;  %v3851_v47 = vld [vmem:[%s5672_s0 + $0x98] ss:$0 sps:$4 sm:$0xff]  }
 0x10c   :  { %3221 = vmatpush3.bf16.msra.mxu0 %v4384_v32  ;;  %v5078_v45 = vld [vmem:[%s5672_s0 + $0xa4] sm:$0xff] }
 0x10d   :  { %3243 = vmatpush3.bf16.msra.mxu1 %v5854_v26  ;;  %3222 = vmatprep.subr.bf16.mxu0 %v4395_v34  ;;  %v5908_v34 = vld [vmem:[#allocation33_spill] sm:$0xff] }
 0x10e   :  { %3244 = vmatprep.subr.bf16.mxu1 %v5856_v28 }
 0x110   :  { %3223 = vmatpush3.bf16.msra.mxu0 %v5843_v14 }
 0x111   :  { %3245 = vmatpush3.bf16.msra.mxu1 %v5858_v35  ;;  %3252 = vmatprep.subr.bf16.mxu0 %v5845_v16  ;;  %v5911_v16 = vld [vmem:[#allocation36_spill] sm:$0xff]  ;;  %v5917_v35 = vld [vmem:[#allocation42_spill] sm:$0xff] }
 0x112   :  { %3274 = vmatprep.subr.bf16.mxu1 %v5860_v6  ;;  %v5918_v6 = vld [vmem:[#allocation43_spill] sm:$0xff] }
 0x113   :  { %1669 = vmatmul.mubr.bf16.vlgmr.msra.gmra.mxu0 %v2807_v48  ;;  %v5933_v48 = vld [vmem:[#allocation50_spill] sm:$0xff] }
 0x114   :  { %1709 = vmatmul.mubr.bf16.vlgmr.msra.gmra.mxu1 %v2809_v50  ;;  %3253 = vmatpush3.bf16.msra.mxu0 %v5847_v19  ;;  %v5934_v50 = vld [vmem:[#allocation12_spill] sm:$0xff] }
 0x115   :  { %3275 = vmatpush3.bf16.msra.mxu1 %v5862_v1  ;;  %3254 = vmatprep.subr.bf16.mxu0 %v5849_v21  ;;  %v2811_v1 = vcombine.low %v2800_v49, %v2800_v49  ;;  %v2827_v49 = vcombine.high %v5078_v45, %v5078_v45 }
 0x116   :  { %3276 = vmatprep.subr.bf16.mxu1 %v5864_v5  ;;  %1748 = vmatprep.mubr.bf16.mxu0 %v2812_v52  ;;  %v2813_v5 = vcombine.low %v2801_v51, %v2801_v51  ;;  %v5935_v51 = vld [vmem:[#allocation13_spill] sm:$0xff]  ;;  %v5936_v52 = vld [vmem:[#allocation16_spill] sm:$0xff] }
 0x117   :  { %1788 = vmatprep.mubr.bf16.mxu1 %v2814_v54 }
 0x118   :  { %3255 = vmatpush3.bf16.msra.mxu0 %v5851_v23  ;;  %v5913_v23 = vld [vmem:[#allocation38_spill] sm:$0xff] }
 0x119   :  { %3277 = vmatpush3.bf16.msra.mxu1 %v5866_v7  ;;  %3256 = vmatprep.subr.bf16.mxu0 %v5853_v25  ;;  %v5914_v25 = vld [vmem:[#allocation39_spill] sm:$0xff]  ;;  %v5921_v7 = vld [vmem:[#allocation46_spill] sm:$0xff] }
 0x11a   :  { %3278 = vmatprep.subr.bf16.mxu1 %v5868_v13  ;;  %v5922_v13 = vmov 0.0  }
 0x11c   :  { %3257 = vmatpush3.bf16.msra.mxu0 %v5855_v27  ;;  %v5915_v27 = vld [vmem:[#allocation40_spill] sm:$0xff] }
 0x11d   :  { %3279 = vmatpush3.bf16.msra.mxu1 %v5870_v53  ;;  %3258 = vmatprep.subr.bf16.mxu0 %v5905_v56  ;;  %v5910_v53 = vld [vmem:[#allocation35_spill] sm:$0xff] }
 0x11e   :  { %3280 = vmatprep.subr.bf16.mxu1 %v5872_v8  ;;  %v5919_v8 = vld [vmem:[#allocation44_spill] sm:$0xff]  ;;  %v5937_v56 = vld [vmem:[#allocation15_spill] sm:$0xff] }
 0x120   :  { %3259 = vmatpush3.bf16.msra.mxu0 %v5906_v58  ;;  %v5938_v58 = vld [vmem:[#allocation20_spill] sm:$0xff] }
 0x121   :  { %3281 = vmatpush3.bf16.msra.mxu1 %v5874_v3  ;;  %3260 = vmatprep.subr.bf16.mxu0 %v5907_v60  ;;  %v5920_v3 = vld [vmem:[#allocation45_spill] sm:$0xff] }
 0x122   :  { %3282 = vmatprep.subr.bf16.mxu1 %v5875_v9  ;;  %v2817_v9 = vld [vmem:[%s5672_s0 + $0x9c] sm:$0xff] }
 0x123   :  { %v2994_v62 = vpop.f32.mrf.mxu0  ;;  %v2825_v63 = vcombine.high %v2817_v9, %v2817_v9  ;;  %v5939_v60 = vld [vmem:[#allocation17_spill] sm:$0xff] }
 0x124   :  { %v3016_v32 = vpop.f32.mrf.mxu1  ;;  %3261 = vmatpush3.bf16.msra.mxu0 %v5908_v34 }
 0x125   :  { %3283 = vmatpush3.bf16.msra.mxu1 %v5909_v0  ;;  %v2995_v12 = vpop.f32.mrf.mxu0  ;;  %3262 = vmatprep.subr.bf16.mxu0 %v5910_v53  ;;  %v5940_v0 = vld [vmem:[#allocation19_spill] sm:$0xff] }
 0x126   :  { %v2996_v14 = vadd.f32 %v2995_v12, %v2994_v62  ;;  %v3017_v15 = vpop.f32.mrf.mxu1  ;;  %3284 = vmatprep.subr.bf16.mxu1 %v5911_v16  ;;  %v5941_v12 = vld [vmem:[#allocation21_spill] sm:$0xff]  ;;  %v5944_v16 = vld [vmem:[#allocation14_spill] sm:$0xff] }
 0x127   :  { %v3018_v18 = vadd.f32 %v3017_v15, %v3016_v32  ;;  %v2997_v19 = vpop.f32.mrf.mxu0  ;;  %v5943_v15 = vld [vmem:[#allocation25_spill] sm:$0xff] }
 0x128   :  { %v1079_v20 = vadd.f32 %v2996_v14, %v1039_v46  ;;  %v3019_v21 = vpop.f32.mrf.mxu1  ;;  %3263 = vmatpush3.bf16.msra.mxu0 %v5912_v22  ;;  %v5932_v46 = vld [vmem:[#allocation11_spill] sm:$0xff] }
 0x129   :  { %3285 = vmatpush3.bf16.msra.mxu1 %v5913_v23  ;;  %v2998_v24 = vpop.f32.mrf.mxu0  ;;  %3264 = vmatprep.subr.bf16.mxu0 %v5914_v25  ;;  %v5942_v14 = vld [vmem:[#allocation23_spill] sm:$0xff] }
 0x12a   :  { %v3020_v26 = vpop.f32.mrf.mxu1  ;;  %3286 = vmatprep.subr.bf16.mxu1 %v5915_v27  ;;  %v1119_v28 = vadd.f32 %v3018_v18, %v1079_v20  ;;  %v5945_v18 = vld [vmem:[#allocation18_spill] sm:$0xff]  ;;  %v3900_v20 = vld [vmem:[%s5673_s1 + $0x138] sm:$0xff]  }
 0x12b   :  { %v3901_v23 = vld [vmem:[%s5673_s1 + $0x170] sm:$0xff]  }
 0x12c   :  { %3265 = vmatpush3.bf16.msra.mxu0 %v5916_v37  ;;  %v5946_v26 = vld [vmem:[#allocation22_spill] sm:$0xff] }
 0x12d   :  { %3287 = vmatpush3.bf16.msra.mxu1 %v5917_v35  ;;  %3266 = vmatprep.subr.bf16.mxu0 %v5918_v6  ;;  %v5948_v37 = vld [vmem:[#allocation26_spill] sm:$0xff] }
 0x12e   :  { %3288 = vmatprep.subr.bf16.mxu1 %v5919_v8  ;;  %v3904_v35 = vld [vmem:[%s5673_s1 + $0x128] sm:$0xff]   ;;  %v3905_v8 = vld [vmem:[%s5673_s1 + $0xc0] sm:$0xff]  }
 0x130   :  { %3267 = vmatpush3.bf16.msra.mxu0 %v5920_v3 }
 0x131   :  { %3289 = vmatpush3.bf16.msra.mxu1 %v5921_v7  ;;  %3535 = vmatprep.subr.bf16.mxu0 %v5922_v13  ;;  %v3907_v7 = vld [vmem:[%s5673_s1 + $0x80] sm:$0xff]  }
 0x132   :  { %3301 = vmatprep.subr.bf16.mxu1 %v5923_v36 }
 0x133   :  { %v1158_v11 = vpop.f32.mrf.mxu0  ;;  %1749 = vmatmul.mubr.bf16.vlgmr.msra.gmra.mxu0 %v2811_v1  ;;  %v5144_v1 = vld [vmem:[%s5672_s0 + $0xb4] sm:$0xff] }
 0x134   :  { %v5060_v55 = vadd.f32 %v1158_v11, %v1119_v28  ;;  %1789 = vmatmul.mubr.bf16.vlgmr.msra.gmra.mxu1 %v2813_v5  ;;  %3536 = vmatpush3.bf16.msra.mxu0 %v5924_v29  ;;  %v5947_v28 = vld [vmem:[#allocation24_spill] sm:$0xff]  ;;  %v2831_v36 = vcombine.high %v5144_v1, %v5144_v1 }
 0x135   :  { %3302 = vmatpush3.bf16.msra.mxu1 %v5925_v57  ;;  %v3521_v30 = vpop.f32.mrf.mxu0  ;;  %3537 = vmatprep.subr.bf16.mxu0 %v5922_v13  ;;  %v3906_v5 = vld [vmem:[%s5673_s1 + $0x160] sm:$0xff]   ;;  %v3910_v57 = vld [vmem:[%s5673_s1 + $0x158] sm:$0xff]  }
 0x136   :  { %3303 = vmatprep.subr.bf16.mxu1 %v5926_v31  ;;  %3543 = vmatprep.mubr.msk.bf16.mxu0 %vm3986_vm0, %v5922_v13  ;;  %v3908_v11 = vld [vmem:[%s5673_s1 + $0x120] sm:$0xff]   ;;  %v3911_v31 = vld [vmem:[%s5673_s1 + $0x1b8] sm:$0xff]  }
 0x137   :  { %v1161_v38 = vpop.f32.mrf.mxu0  ;;  %1924 = vmatprep.mubr.bf16.mxu1 %v2825_v63  ;;  %v3909_v63 = vld [vmem:[%s5673_s1 + $0x1f8] sm:$0xff]  }
 0x138   :  { %3538 = vmatpush3.bf16.msra.mxu0 %v5927_v39  ;;  %v3912_v38 = vld [vmem:[%s5673_s1 + $0x118] sm:$0xff]  }
 0x139   :  { %3304 = vmatpush3.bf16.msra.mxu1 %v5928_v40  ;;  %v3522_v41 = vpop.f32.mrf.mxu0  ;;  %3539 = vmatprep.subr.bf16.mxu0 %v5922_v13  ;;  %v3913_v40 = vld [vmem:[%s5673_s1 + $0x1f0] sm:$0xff]  }
 0x13a   :  { %3305 = vmatprep.subr.bf16.mxu1 %v5929_v42  ;;  %v3914_v42 = vld [vmem:[%s5673_s1 + $0x150] sm:$0xff]  }
 0x13c   :  { %3540 = vmatpush3.bf16.msra.mxu0 %v5930_v43 }
 0x13d   :  { %3306 = vmatpush3.bf16.msra.mxu1 %v5931_v44  ;;  %3541 = vmatprep.subr.bf16.mxu0 %v5922_v13 }
 0x13e   :  { %3307 = vmatprep.subr.bf16.mxu1 %v5932_v46  ;;  %v3915_v46 = vld [vmem:[%s5673_s1 + $0x1b0] sm:$0xff]  }
 0x140   :  { %3542 = vmatpush3.bf16.msra.mxu0 %v5933_v48 }
 0x141   :  { %3308 = vmatpush3.bf16.msra.mxu1 %v5934_v50  ;;  %3323 = vmatprep.subr.bf16.mxu0 %v5935_v51  ;;  %v3917_v50 = vld [vmem:[%s5673_s1 + $0x1e8] sm:$0xff]  }
 0x142   :  { %3309 = vmatprep.subr.bf16.mxu1 %v5936_v52  ;;  %v3918_v52 = vld [vmem:[%s5673_s1 + $0x148] sm:$0xff]  }
 0x143   :  { %3544 = vmatmul.mubr.msk.bf16.vlgmr.msra.gmra.mxu0 %vm880_vm1, %v3851_v47 }
 0x144   :  { %v3043_v54 = vpop.f32.mrf.mxu1  ;;  %3324 = vmatpush3.bf16.msra.mxu0 %v5937_v56  ;;  %1964 = vmatprep.mubr.bf16.mxu0 %v2827_v49  ;;  %v3916_v49 = vld [vmem:[%s5673_s1 + $0x110] sm:$0xff]   ;;  %v3920_v56 = vld [vmem:[%s5673_s1 + $0x108] sm:$0xff]  }
 0x145   :  { %3310 = vmatpush3.bf16.msra.mxu1 %v5938_v58  ;;  %3325 = vmatprep.subr.bf16.mxu0 %v5939_v60  ;;  %v3921_v58 = vld [vmem:[%s5673_s1 + $0x1e0] sm:$0xff]  }
 0x146   :  { %v3044_v62 = vpop.f32.mrf.mxu1  ;;  %3311 = vmatprep.subr.bf16.mxu1 %v4921_v2  ;;  %v5106_v2 = vld [vmem:[%s5672_s0 + $0xac] sm:$0xff]  ;;  %v3922_v60 = vld [vmem:[%s5673_s1 + $0x140] sm:$0xff]  }
 0x147   :  { %v3045_v32 = vadd.f32 %v3044_v62, %v3043_v54  ;;  %v3919_v54 = vld [vmem:[%s5673_s1 + $0x1a8] sm:$0xff]   ;;  %v5204_v62 = vld [vmem:[%s5672_s0 + $0xbc] sm:$0xff] }
 0x148   :  { %v3046_v34 = vpop.f32.mrf.mxu1  ;;  %3326 = vmatpush3.bf16.msra.mxu0 %v5940_v0  ;;  %v3924_v0 = vld [vmem:[%s5673_s1 + $0x100] sm:$0xff]  }
 0x149   :  { %3312 = vmatpush3.bf16.msra.mxu1 %v4933_v33  ;;  %3327 = vmatprep.subr.bf16.mxu0 %v5941_v12  ;;  %v2824_v33 = vcombine.low %v2817_v9, %v2817_v9  ;;  %v2826_v9 = vcombine.low %v5078_v45, %v5078_v45  ;;  %v2828_v34 = vcombine.low %v5106_v2, %v5106_v2  ;;  %v3925_v12 = vld [vmem:[%s5673_s1 + $0x1d8] sm:$0xff]  }
 0x14a   :  { %v3047_v53 = vpop.f32.mrf.mxu1  ;;  %3313 = vmatprep.subr.bf16.mxu1 %v4945_v17  ;;  %v3898_v17 = vld [vmem:[%s5673_s1] sm:$0xff]  }
 0x14b   :  { %v3926_v53 = vld [vmem:[%s5673_s1 + $0x278] sm:$0xff]  }
 0x14c   :  { %3328 = vmatpush3.bf16.msra.mxu0 %v5942_v14  ;;  %v2833_v14 = vcombine.high %v5204_v62, %v5204_v62 }
 0x14d   :  { %3314 = vmatpush3.bf16.msra.mxu1 %v4957_v4  ;;  %3329 = vmatprep.subr.bf16.mxu0 %v5943_v15  ;;  %v3899_v4 = vld [vmem:[%s5673_s1 + $0x178] sm:$0xff]  }
 0x14e   :  { %3315 = vmatprep.subr.bf16.mxu1 %v4969_v10  ;;  %v2829_v10 = vcombine.high %v5106_v2, %v5106_v2  ;;  %v3927_v2 = vld [vmem:[%s5673_s1 + $0x198] sm:$0xff]  }
 0x150   :  { %3330 = vmatpush3.bf16.msra.mxu0 %v5944_v16  ;;  %v3928_v16 = vld [vmem:[%s5673_s1 + $0x238] sm:$0xff]  }
 0x151   :  { %3316 = vmatpush3.bf16.msra.mxu1 %v3898_v17  ;;  %3331 = vmatprep.subr.bf16.mxu0 %v5945_v18  ;;  %v3929_v17 = vld [vmem:[%s5673_s1 + $0x1d0] sm:$0xff]  }
 0x152   :  { %3345 = vmatprep.subr.bf16.mxu1 %v3899_v4  ;;  %v3930_v4 = vld [vmem:[%s5673_s1 + $0x270] sm:$0xff]  }
 0x153   :  { %v3065_v19 = vpop.f32.mrf.mxu0 }
 0x154   :  { %1925 = vmatmul.mubr.bf16.vlgmr.msra.gmra.mxu1 %v2824_v33  ;;  %3332 = vmatpush3.bf16.msra.mxu0 %v4915_v59  ;;  %v3902_v59 = vld [vmem:[%s5673_s1 + $0x130] sm:$0xff]  }
 0x155   :  { %3346 = vmatpush3.bf16.msra.mxu1 %v3900_v20  ;;  %v3066_v21 = vpop.f32.mrf.mxu0  ;;  %3333 = vmatprep.subr.bf16.mxu0 %v4927_v61  ;;  %v3903_v61 = vld [vmem:[%s5673_s1 + $0x168] sm:$0xff]   ;;  %v3931_v20 = vld [vmem:[%s5673_s1 + $0x190] sm:$0xff]  }
 0x156   :  { %v3067_v22 = vadd.f32 %v3066_v21, %v3065_v19  ;;  %3347 = vmatprep.subr.bf16.mxu1 %v3901_v23  ;;  %2004 = vmatprep.mubr.bf16.mxu1 %v2829_v10  ;;  %v3932_v21 = vld [vmem:[%s5673_s1 + $0x230] sm:$0xff]   ;;  %v3933_v23 = vld [vmem:[%s5673_s1 + $0x1c8] sm:$0xff]  }
 0x157   :  { %v3068_v24 = vpop.f32.mrf.mxu0 }
 0x158   :  { %v1295_v25 = vadd.f32 %v3067_v22, %v3045_v32  ;;  %3334 = vmatpush3.bf16.msra.mxu0 %v5946_v26  ;;  %v3923_v32 = vld [vmem:[%s5673_s1 + $0x1a0] sm:$0xff]   ;;  %v3934_v24 = vld [vmem:[%s5673_s1 + $0x268] sm:$0xff]  }
 0x159   :  { %3348 = vmatpush3.bf16.msra.mxu1 %v3902_v59  ;;  %v3069_v27 = vpop.f32.mrf.mxu0  ;;  %3335 = vmatprep.subr.bf16.mxu0 %v5947_v28  ;;  %v3936_v26 = vld [vmem:[%s5673_s1 + $0x228] sm:$0xff]   ;;  %v3937_v59 = vld [vmem:[%s5673_s1 + $0x1c0] sm:$0xff]  }
 0x15a   :  { %3349 = vmatprep.subr.bf16.mxu1 %v3903_v61  ;;  %v5258_v27 = vld [vmem:[%s5672_s0 + $0xc4] sm:$0xff]  ;;  %v2830_v61 = vcombine.low %v5144_v1, %v5144_v1  ;;  %v3942_v1 = vld [vmem:[%s5673_s1 + $0x258] sm:$0xff]  }
 0x15b   :  { %v3938_v28 = vld [vmem:[%s5673_s1 + $0x260] sm:$0xff]  }
 0x15c   :  { %3336 = vmatpush3.bf16.msra.mxu0 %v5948_v37  ;;  %v3939_v37 = vld [vmem:[%s5673_s1 + $0x180] sm:$0xff]  }
 0x15d   :  { %3350 = vmatpush3.bf16.msra.mxu1 %v3904_v35  ;;  %3337 = vmatprep.subr.bf16.mxu0 %v3905_v8  ;;  %v2835_v35 = vcombine.high %v5258_v27, %v5258_v27  ;;  %v3940_v8 = vld [vmem:[%s5673_s1 + $0x220] sm:$0xff]  }
 0x15e   :  { %3351 = vmatprep.subr.bf16.mxu1 %v3906_v5  ;;  %v3941_v5 = vld [vmem:[%s5673_s1 + $0x2f8] sm:$0xff]  }
 0x160   :  { %3338 = vmatpush3.bf16.msra.mxu0 %v3907_v7  ;;  %v3943_v7 = vld [vmem:[%s5673_s1 + $0x2b8] sm:$0xff]  }
 0x161   :  { %3352 = vmatpush3.bf16.msra.mxu1 %v3908_v11  ;;  %3367 = vmatprep.subr.bf16.mxu0 %v3909_v63  ;;  %v3945_v11 = vld [vmem:[%s5673_s1 + $0x2f0] sm:$0xff]  }
 0x162   :  { %3353 = vmatprep.subr.bf16.mxu1 %v3910_v57  ;;  %v3946_v57 = vld [vmem:[%s5673_s1 + $0x250] sm:$0xff]  }
 0x163   :  { %1965 = vmatmul.mubr.bf16.vlgmr.msra.gmra.mxu0 %v2826_v9 }
 0x164   :  { %v3087_v30 = vpop.f32.mrf.mxu1  ;;  %3368 = vmatpush3.bf16.msra.mxu0 %v3911_v31  ;;  %2044 = vmatprep.mubr.bf16.mxu0 %v2831_v36  ;;  %v3944_v36 = vld [vmem:[%s5673_s1 + $0x218] sm:$0xff]  }
 0x165   :  { %3354 = vmatpush3.bf16.msra.mxu1 %v3912_v38  ;;  %3369 = vmatprep.subr.bf16.mxu0 %v3913_v40  ;;  %v3947_v38 = vld [vmem:[%s5673_s1 + $0x2b0] sm:$0xff]  }
 0x166   :  { %v3088_v41 = vpop.f32.mrf.mxu1  ;;  %3355 = vmatprep.subr.bf16.mxu1 %v3914_v42  ;;  %v3949_v42 = vld [vmem:[%s5673_s1 + $0x2e8] sm:$0xff]  }
 0x167   :  { %v3089_v44 = vadd.f32 %v3088_v41, %v3087_v30  ;;  %v3948_v41 = vld [vmem:[%s5673_s1 + $0x210] sm:$0xff]  }
 0x168   :  { %v3090_v45 = vpop.f32.mrf.mxu1  ;;  %3370 = vmatpush3.bf16.msra.mxu0 %v3915_v46  ;;  %v3951_v46 = vld [vmem:[%s5673_s1 + $0x2a8] sm:$0xff]  }
 0x169   :  { %v1335_v47 = vadd.f32 %v3089_v44, %v1295_v25  ;;  %3356 = vmatpush3.bf16.msra.mxu1 %v3916_v49  ;;  %3371 = vmatprep.subr.bf16.mxu0 %v3917_v50  ;;  %v3935_v25 = vld [vmem:[%s5673_s1 + $0x188] sm:$0xff]   ;;  %v3953_v49 = vld [vmem:[%s5673_s1 + $0x2e0] sm:$0xff]  }
 0x16a   :  { %v3091_v51 = vpop.f32.mrf.mxu1  ;;  %3357 = vmatprep.subr.bf16.mxu1 %v3918_v52  ;;  %v3950_v45 = vld [vmem:[%s5673_s1 + $0x248] sm:$0xff]   ;;  %v3954_v50 = vld [vmem:[%s5673_s1 + $0x2a0] sm:$0xff]   ;;  %v3955_v52 = vld [vmem:[%s5673_s1 + $0x2d8] sm:$0xff]  }
 0x16b   :  { %v2832_v51 = vcombine.low %v5204_v62, %v5204_v62 }
 0x16c   :  { %3372 = vmatpush3.bf16.msra.mxu0 %v3919_v54 }
 0x16d   :  { %3358 = vmatpush3.bf16.msra.mxu1 %v3920_v56  ;;  %3373 = vmatprep.subr.bf16.mxu0 %v3921_v58  ;;  %v3956_v56 = vld [vmem:[%s5673_s1 + $0x298] sm:$0xff]  }
 0x16e   :  { %3359 = vmatprep.subr.bf16.mxu1 %v3922_v60 }
 0x170   :  { %3374 = vmatpush3.bf16.msra.mxu0 %v3923_v32 }
 0x171   :  { %3360 = vmatpush3.bf16.msra.mxu1 %v3924_v0  ;;  %3375 = vmatprep.subr.bf16.mxu0 %v3925_v12 }
 0x172   :  { %3389 = vmatprep.subr.bf16.mxu1 %v3926_v53  ;;  %v3959_v53 = vld [vmem:[%s5673_s1 + $0x2c8] sm:$0xff]  }
 0x173   :  { %v3109_v15 = vpop.f32.mrf.mxu0 }
 0x174   :  { %2005 = vmatmul.mubr.bf16.vlgmr.msra.gmra.mxu1 %v2828_v34  ;;  %3376 = vmatpush3.bf16.msra.mxu0 %v3927_v2 }
 0x175   :  { %3390 = vmatpush3.bf16.msra.mxu1 %v3928_v16  ;;  %v3110_v33 = vpop.f32.mrf.mxu0  ;;  %3377 = vmatprep.subr.bf16.mxu0 %v3929_v17  ;;  %v3960_v16 = vld [vmem:[%s5673_s1 + $0x288] sm:$0xff]   ;;  %v3962_v17 = vld [vmem:[%s5673_s1 + $0x280] sm:$0xff]  }
 0x176   :  { %v3111_v18 = vadd.f32 %v3110_v33, %v3109_v15  ;;  %3391 = vmatprep.subr.bf16.mxu1 %v3930_v4  ;;  %2084 = vmatprep.mubr.bf16.mxu1 %v2833_v14  ;;  %v2834_v33 = vcombine.low %v5258_v27, %v5258_v27  ;;  %v2199_v27 = vld [vmem:[%s5675_s3 + $0x78] sm:$0xff] }
 0x177   :  { %v3112_v10 = vpop.f32.mrf.mxu0 }
 0x178   :  { %v1375_v19 = vadd.f32 %v3111_v18, %v1335_v47  ;;  %3378 = vmatpush3.bf16.msra.mxu0 %v3931_v20  ;;  %v3952_v47 = vld [vmem:[%s5673_s1 + $0x208] sm:$0xff]  }
 0x179   :  { %3392 = vmatpush3.bf16.msra.mxu1 %v3932_v21  ;;  %v3113_v22 = vpop.f32.mrf.mxu0  ;;  %3379 = vmatprep.subr.bf16.mxu0 %v3933_v23  ;;  %v3864_v18 = vld [vmem:[%s5672_s0 + $0xcc] ss:$0 sps:$4 sm:$0xff]  }
 0x17a   :  { %3393 = vmatprep.subr.bf16.mxu1 %v3934_v24 }
 0x17c   :  { %3380 = vmatpush3.bf16.msra.mxu0 %v3935_v25 }
 0x17d   :  { %3394 = vmatpush3.bf16.msra.mxu1 %v3936_v26  ;;  %3381 = vmatprep.subr.bf16.mxu0 %v3937_v59 }
 0x17e   :  { %3395 = vmatprep.subr.bf16.mxu1 %v3938_v28 }
 0x180   :  { %3382 = vmatpush3.bf16.msra.mxu0 %v3939_v37 }
 0x181   :  { %3396 = vmatpush3.bf16.msra.mxu1 %v3940_v8  ;;  %3411 = vmatprep.subr.bf16.mxu0 %v3941_v5  ;;  %v2198_v8 = vld [vmem:[%s5675_s3 + $0x70] sm:$0xff] }
 0x182   :  { %3397 = vmatprep.subr.bf16.mxu1 %v3942_v1 }
 0x183   :  { %2045 = vmatmul.mubr.bf16.vlgmr.msra.gmra.mxu0 %v2830_v61 }
 0x184   :  { %v3131_v9 = vpop.f32.mrf.mxu1  ;;  %3412 = vmatpush3.bf16.msra.mxu0 %v3943_v7  ;;  %2124 = vmatprep.mubr.bf16.mxu0 %v2835_v35  ;;  %v2854_v35 = vld [vmem:[%s5675_s3 + $0xf8] sm:$0xff] }
 0x185   :  { %3398 = vmatpush3.bf16.msra.mxu1 %v3944_v36  ;;  %3413 = vmatprep.subr.bf16.mxu0 %v3945_v11  ;;  %v2853_v36 = vld [vmem:[%s5675_s3 + $0xf0] sm:$0xff]  ;;  %v2197_v11 = vld [vmem:[%s5675_s3 + $0x68] sm:$0xff] }
 0x186   :  { %v3132_v63 = vpop.f32.mrf.mxu1  ;;  %3399 = vmatprep.subr.bf16.mxu1 %v3946_v57 }
 0x187   :  { %v3133_v30 = vadd.f32 %v3132_v63, %v3131_v9 }
 0x188   :  { %v3134_v31 = vpop.f32.mrf.mxu1  ;;  %3414 = vmatpush3.bf16.msra.mxu0 %v3947_v38  ;;  %v2196_v38 = vld [vmem:[%s5675_s3 + $0x60] sm:$0xff] }
 0x189   :  { %v1415_v40 = vadd.f32 %v3133_v30, %v1375_v19  ;;  %3400 = vmatpush3.bf16.msra.mxu1 %v3948_v41  ;;  %3415 = vmatprep.subr.bf16.mxu0 %v3949_v42  ;;  %v2852_v31 = vld [vmem:[%s5675_s3 + $0xe8] sm:$0xff]  ;;  %v2195_v41 = vld [vmem:[%s5675_s3 + $0x58] sm:$0xff] }
 0x18a   :  { %v3135_v44 = vpop.f32.mrf.mxu1  ;;  %3401 = vmatprep.subr.bf16.mxu1 %v3950_v45  ;;  %v2850_v42 = vld [vmem:[%s5675_s3 + $0xd8] sm:$0xff]  ;;  %v2849_v45 = vld [vmem:[%s5675_s3 + $0xd0] sm:$0xff] }
 0x18b   :  { %v2194_v44 = vld [vmem:[%s5675_s3 + $0x50] sm:$0xff] }
 0x18c   :  { %3416 = vmatpush3.bf16.msra.mxu0 %v3951_v46  ;;  %v2193_v46 = vld [vmem:[%s5675_s3 + $0x48] sm:$0xff] }
 0x18d   :  { %3402 = vmatpush3.bf16.msra.mxu1 %v3952_v47  ;;  %3417 = vmatprep.subr.bf16.mxu0 %v3953_v49  ;;  %v2848_v47 = vld [vmem:[%s5675_s3 + $0xc8] sm:$0xff]  ;;  %v2192_v49 = vld [vmem:[%s5675_s3 + $0x40] sm:$0xff] }
 0x18e   :  { %3403 = vmatprep.subr.bf16.mxu1 %v5918_v6 }
 0x190   :  { %3418 = vmatpush3.bf16.msra.mxu0 %v3954_v50  ;;  %v2847_v50 = vld [vmem:[%s5675_s3 + $0xc0] sm:$0xff] }
 0x191   :  { %3404 = vmatpush3.bf16.msra.mxu1 %v5920_v3  ;;  %3419 = vmatprep.subr.bf16.mxu0 %v3955_v52  ;;  %v3957_v3 = vld [vmem:[%s5673_s1 + $0x2d0] sm:$0xff]   ;;  %v2846_v52 = vld [vmem:[%s5675_s3 + $0xb8] sm:$0xff] }
 0x192   :  { %3547 = vmatprep.subr.bf16.mxu1 %v5922_v13 }
 0x193   :  { %v3153_v54 = vpop.f32.mrf.mxu0 }
 0x194   :  { %2085 = vmatmul.mubr.bf16.vlgmr.msra.gmra.mxu1 %v2832_v51  ;;  %v1494_v6 = vpop.f32.mrf.mxu1  ;;  %3420 = vmatpush3.bf16.msra.mxu0 %v3956_v56  ;;  %v2191_v51 = vld [vmem:[%s5675_s3 + $0x38] sm:$0xff]  ;;  %v2189_v56 = vld [vmem:[%s5675_s3 + $0x28] sm:$0xff] }
 0x195   :  { %3548 = vmatpush3.bf16.msra.mxu1 %v5924_v29  ;;  %v3154_v58 = vpop.f32.mrf.mxu0  ;;  %3421 = vmatprep.subr.bf16.mxu0 %v3957_v3  ;;  %v3958_v29 = vld [vmem:[%s5673_s1 + $0x290] sm:$0xff]   ;;  %v2188_v3 = vld [vmem:[%s5675_s3 + $0x20] sm:$0xff] }
 0x196   :  { %v3155_v60 = vadd.f32 %v3154_v58, %v3153_v54  ;;  %v3533_v62 = vpop.f32.mrf.mxu1  ;;  %3549 = vmatprep.subr.bf16.mxu1 %v5922_v13  ;;  %3555 = vmatprep.mubr.msk.bf16.mxu1 %vm3986_vm0, %v5922_v13  ;;  %v2190_v54 = vld [vmem:[%s5675_s3 + $0x30] sm:$0xff]  ;;  %v2844_v58 = vld [vmem:[%s5675_s3 + $0xa8] sm:$0xff] }
 0x197   :  { %v3156_v32 = vpop.f32.mrf.mxu0  ;;  %v2187_v62 = vld [vmem:[%s5675_s3 + $0x18] sm:$0xff] }
 0x198   :  { %v1455_v34 = vadd.f32 %v3155_v60, %v1415_v40  ;;  %v1497_v0 = vpop.f32.mrf.mxu1  ;;  %3422 = vmatpush3.bf16.msra.mxu0 %v3958_v29  ;;  %v2851_v40 = vld [vmem:[%s5675_s3 + $0xe0] sm:$0xff]  ;;  %v2842_v32 = vld [vmem:[%s5675_s3 + $0x98] sm:$0xff]  ;;  %v2185_v29 = vld [vmem:[%s5675_s3 + $0x8] sm:$0xff] }
 0x199   :  { %3550 = vmatpush3.bf16.msra.mxu1 %v5927_v39  ;;  %v3157_v12 = vpop.f32.mrf.mxu0  ;;  %3423 = vmatprep.subr.bf16.mxu0 %v3959_v53  ;;  %v3961_v39 = vld [vmem:[%s5673_s1 + $0x2c0] sm:$0xff]   ;;  %v2841_v0 = vld [vmem:[%s5675_s3 + $0x90] sm:$0xff] }
 0x19a   :  { %v5340_v14 = vadd.f32 %v1494_v6, %v1455_v34  ;;  %v3534_v15 = vpop.f32.mrf.mxu1  ;;  %3551 = vmatprep.subr.bf16.mxu1 %v5922_v13  ;;  %v2845_v6 = vld [vmem:[%s5675_s3 + $0xb0] sm:$0xff]  ;;  %v2843_v60 = vld [vmem:[%s5675_s3 + $0xa0] sm:$0xff]  ;;  %v2840_v12 = vld [vmem:[%s5675_s3 + $0x88] sm:$0xff] }
 0x19b   :  { %v2186_v34 = vld [vmem:[%s5675_s3 + $0x10] sm:$0xff]  ;;  %v2184_v53 = vld [vmem:[%s5675_s3] sm:$0xff] }
 0x19c   :  { %v2172_v2 = vmax.f32 %v5060_v55, %v5340_v14  ;;  %3424 = vmatpush3.bf16.msra.mxu0 %v3960_v16  ;;  %v2839_v15 = vld [vmem:[%s5675_s3 + $0x80] sm:$0xff]  ;;  %v2885_v55 = vld [vmem:[%s5675_s3 + $0x1f0] sm:$0xff] }
 0x19d   :  { %3552 = vmatpush3.bf16.msra.mxu1 %v5930_v43  ;;  %3425 = vmatprep.subr.bf16.mxu0 %v3961_v39  ;;  %v2869_v14 = vld [vmem:[%s5675_s3 + $0x170] sm:$0xff] }
 0x19e   :  { %3553 = vmatprep.subr.bf16.mxu1 %v5922_v13 }
 0x1a0   :  { %3426 = vmatpush3.bf16.msra.mxu0 %v3962_v17 }
 0x1a1   :  { %3554 = vmatpush3.bf16.msra.mxu1 %v5933_v48  ;;  %3559 = vmatprep.subr.mxu0 %v5922_v13 }
 0x1a2   :  { %3594 = vmatprep.subr.mxu1 %v5922_v13 }
 0x1a3   :  { %2125 = vmatmul.mubr.bf16.vlgmr.msra.gmra.mxu0 %v2834_v33 }
 0x1a4   :  { %3556 = vmatmul.mubr.msk.bf16.vlgmr.msra.gmra.mxu1 %vm880_vm1, %v3864_v18  ;;  %3591 = vmatprep.mubr.msk.f32.mxu0 %vm3986_vm0, %v5922_v13 }
 0x1a5   :  { %3626 = vmatprep.mubr.msk.f32.mxu1 %vm3986_vm0, %v5922_v13  ;;  %3595 = vmatpush3.msra.mxu1 %v2199_v27 }
 0x1a6   :  { %3596 = vmatprep.subr.mxu1 %v5922_v13  ;;  %3560 = vmatpush3.msra.mxu0 %v2854_v35 }
 0x1a7   :  { %3597 = vmatpush3.msra.mxu1 %v2198_v8  ;;  %3561 = vmatprep.subr.mxu0 %v5922_v13 }
 0x1a8   :  { %3598 = vmatprep.subr.mxu1 %v5922_v13  ;;  %3562 = vmatpush3.msra.mxu0 %v2853_v36 }
 0x1a9   :  { %3599 = vmatpush3.msra.mxu1 %v2197_v11  ;;  %3563 = vmatprep.subr.mxu0 %v5922_v13 }
 0x1aa   :  { %3600 = vmatprep.subr.mxu1 %v5922_v13  ;;  %3564 = vmatpush3.msra.mxu0 %v2852_v31 }
 0x1ab   :  { %3601 = vmatpush3.msra.mxu1 %v2196_v38  ;;  %3565 = vmatprep.subr.mxu0 %v5922_v13 }
 0x1ac   :  { %3602 = vmatprep.subr.mxu1 %v5922_v13  ;;  %3566 = vmatpush3.msra.mxu0 %v2851_v40 }
 0x1ad   :  { %3603 = vmatpush3.msra.mxu1 %v2195_v41  ;;  %3567 = vmatprep.subr.mxu0 %v5922_v13 }
 0x1ae   :  { %3604 = vmatprep.subr.mxu1 %v5922_v13  ;;  %3568 = vmatpush3.msra.mxu0 %v2850_v42 }
 0x1af   :  { %3605 = vmatpush3.msra.mxu1 %v2194_v44  ;;  %3569 = vmatprep.subr.mxu0 %v5922_v13 }
 0x1b0   :  { %3606 = vmatprep.subr.mxu1 %v5922_v13  ;;  %3570 = vmatpush3.msra.mxu0 %v2849_v45 }
 0x1b1   :  { %3607 = vmatpush3.msra.mxu1 %v2193_v46  ;;  %3571 = vmatprep.subr.mxu0 %v5922_v13 }
 0x1b2   :  { %3608 = vmatprep.subr.mxu1 %v5922_v13  ;;  %3572 = vmatpush3.msra.mxu0 %v2848_v47 }
 0x1b3   :  { %v3180_v43 = vpop.f32.mrf.mxu0  ;;  %3609 = vmatpush3.msra.mxu1 %v2192_v49  ;;  %3573 = vmatprep.subr.mxu0 %v5922_v13 }
 0x1b4   :  { %v3202_v4 = vpop.f32.mrf.mxu1  ;;  %3610 = vmatprep.subr.mxu1 %v5922_v13  ;;  %3574 = vmatpush3.msra.mxu0 %v2847_v50 }
 0x1b5   :  { %v3181_v10 = vpop.f32.mrf.mxu0  ;;  %3611 = vmatpush3.msra.mxu1 %v2191_v51  ;;  %3575 = vmatprep.subr.mxu0 %v5922_v13 }
 0x1b6   :  { %v3182_v19 = vadd.f32 %v3181_v10, %v3180_v43  ;;  %v3203_v20 = vpop.f32.mrf.mxu1  ;;  %3612 = vmatprep.subr.mxu1 %v5922_v13  ;;  %3576 = vmatpush3.msra.mxu0 %v2846_v52 }
 0x1b7   :  { %v3204_v21 = vadd.f32 %v3203_v20, %v3202_v4  ;;  %v3183_v48 = vpop.f32.mrf.mxu0  ;;  %3613 = vmatpush3.msra.mxu1 %v2190_v54  ;;  %3577 = vmatprep.subr.mxu0 %v5922_v13 }
 0x1b8   :  { %v3205_v22 = vpop.f32.mrf.mxu1  ;;  %3614 = vmatprep.subr.mxu1 %v5922_v13  ;;  %3578 = vmatpush3.msra.mxu0 %v2845_v6 }
 0x1b9   :  { %v1631_v23 = vadd.f32 %v3204_v21, %v3182_v19  ;;  %v3184_v24 = vpop.f32.mrf.mxu0  ;;  %3615 = vmatpush3.msra.mxu1 %v2189_v56  ;;  %3579 = vmatprep.subr.mxu0 %v5922_v13 }
 0x1ba   :  { %v3206_v25 = vpop.f32.mrf.mxu1  ;;  %3616 = vmatprep.subr.mxu1 %v5922_v13  ;;  %3580 = vmatpush3.msra.mxu0 %v2844_v58 }
 0x1bb   :  { %3617 = vmatpush3.msra.mxu1 %v2188_v3  ;;  %3581 = vmatprep.subr.mxu0 %v5922_v13 }
 0x1bc   :  { %3618 = vmatprep.subr.mxu1 %v5922_v13  ;;  %3582 = vmatpush3.msra.mxu0 %v2843_v60 }
 0x1bd   :  { %3619 = vmatpush3.msra.mxu1 %v2187_v62  ;;  %3583 = vmatprep.subr.mxu0 %v5922_v13 }
 0x1be   :  { %3620 = vmatprep.subr.mxu1 %v5922_v13  ;;  %3584 = vmatpush3.msra.mxu0 %v2842_v32 }
 0x1bf   :  { %3621 = vmatpush3.msra.mxu1 %v2186_v34  ;;  %3585 = vmatprep.subr.mxu0 %v5922_v13 }
 0x1c0   :  { %3622 = vmatprep.subr.mxu1 %v5922_v13  ;;  %3586 = vmatpush3.msra.mxu0 %v2841_v0 }
 0x1c1   :  { %3623 = vmatpush3.msra.mxu1 %v2185_v29  ;;  %3587 = vmatprep.subr.mxu0 %v5922_v13 }
 0x1c2   :  { %3624 = vmatprep.subr.mxu1 %v5922_v13  ;;  %3588 = vmatpush3.msra.mxu0 %v2840_v12 }
 0x1c3   :  { %3625 = vmatpush3.msra.mxu1 %v2184_v53  ;;  %3589 = vmatprep.subr.mxu0 %v5922_v13  ;;  %v2838_v53 = vld [vmem:[%s5674_s2] ss:$0 sm:$0xff] }
 0x1c4   :  { %3664 = vmatprep.subr.mxu1 %v5922_v13  ;;  %3590 = vmatpush3.msra.mxu0 %v2839_v15 }
 0x1c5   :  { %3629 = vmatprep.subr.mxu0 %v5922_v13 }
 0x1d3   :  { %v3224_v26 = vpop.f32.mrf.mxu0 }
 0x1d4   :  { %v3246_v59 = vpop.f32.mrf.mxu1 }
 0x1d5   :  { %v3225_v28 = vpop.f32.mrf.mxu0 }
 0x1d6   :  { %v3226_v61 = vadd.f32 %v3225_v28, %v3224_v26  ;;  %v3247_v37 = vpop.f32.mrf.mxu1 }
 0x1d7   :  { %v3248_v5 = vadd.f32 %v3247_v37, %v3246_v59  ;;  %v3227_v1 = vpop.f32.mrf.mxu0 }
 0x1d8   :  { %v1671_v9 = vadd.f32 %v3226_v61, %v1631_v23  ;;  %v3249_v7 = vpop.f32.mrf.mxu1 }
 0x1d9   :  { %v3228_v63 = vpop.f32.mrf.mxu0 }
 0x1da   :  { %v5387_v57 = vadd.f32 %v3248_v5, %v1671_v9  ;;  %v3250_v30 = vpop.f32.mrf.mxu1 }
 0x1f3   :  { %v3268_v16 = vpop.f32.mrf.mxu0 }
 0x1f4   :  { %v3290_v39 = vpop.f32.mrf.mxu1 }
 0x1f5   :  { %v3269_v33 = vpop.f32.mrf.mxu0 }
 0x1f6   :  { %v3270_v17 = vadd.f32 %v3269_v33, %v3268_v16  ;;  %v3291_v18 = vpop.f32.mrf.mxu1  ;;  %v2886_v33 = vld [vmem:[%s5675_s3 + $0x1f8] sm:$0xff] }
 0x1f7   :  { %v3292_v43 = vadd.f32 %v3291_v18, %v3290_v39  ;;  %v3271_v4 = vpop.f32.mrf.mxu0  ;;  %v2870_v18 = vld [vmem:[%s5675_s3 + $0x178] sm:$0xff] }
 0x1f8   :  { %v1751_v10 = vadd.f32 %v3270_v17, %v5387_v57  ;;  %v3293_v19 = vpop.f32.mrf.mxu1  ;;  %v2883_v4 = vld [vmem:[%s5675_s3 + $0x1e0] sm:$0xff] }
 0x1f9   :  { %v3272_v20 = vpop.f32.mrf.mxu0  ;;  %v2882_v19 = vld [vmem:[%s5675_s3 + $0x1d8] sm:$0xff] }
 0x1fa   :  { %v3294_v21 = vpop.f32.mrf.mxu1  ;;  %v1791_v48 = vadd.f32 %v3292_v43, %v1751_v10  ;;  %v2868_v43 = vld [vmem:[%s5675_s3 + $0x168] sm:$0xff]  ;;  %v2867_v10 = vld [vmem:[%s5675_s3 + $0x160] sm:$0xff]  ;;  %v2866_v20 = vld [vmem:[%s5675_s3 + $0x158] sm:$0xff] }
 0x1fb   :  { %v2881_v21 = vld [vmem:[%s5675_s3 + $0x1d0] sm:$0xff] }
 0x203   :  { %v1830_v22 = vpop.f32.mrf.mxu0 }
 0x204   :  { %v1831_v23 = vadd.f32 %v1830_v22, %v1791_v48  ;;  %v2865_v48 = vld [vmem:[%s5675_s3 + $0x150] sm:$0xff]  ;;  %v2880_v22 = vld [vmem:[%s5675_s3 + $0x1c8] sm:$0xff] }
 0x205   :  { %v3545_v24 = vpop.f32.mrf.mxu0 }
 0x206   :  { %v2879_v24 = vld [vmem:[%s5675_s3 + $0x1c0] sm:$0xff] }
 0x207   :  { %v1833_v25 = vpop.f32.mrf.mxu0 }
 0x208   :  { %v2863_v25 = vld [vmem:[%s5675_s3 + $0x140] sm:$0xff] }
 0x209   :  { %v3546_v26 = vpop.f32.mrf.mxu0 }
 0x20a   :  { %v2878_v26 = vld [vmem:[%s5675_s3 + $0x1b8] sm:$0xff] }
 0x214   :  { %v3317_v59 = vpop.f32.mrf.mxu1 }
 0x216   :  { %v3318_v27 = vpop.f32.mrf.mxu1 }
 0x217   :  { %v3319_v28 = vadd.f32 %v3318_v27, %v3317_v59  ;;  %v2862_v59 = vld [vmem:[%s5675_s3 + $0x138] sm:$0xff]  ;;  %v2877_v27 = vld [vmem:[%s5675_s3 + $0x1b0] sm:$0xff] }
 0x218   :  { %v3320_v61 = vpop.f32.mrf.mxu1 }
 0x219   :  { %v2876_v61 = vld [vmem:[%s5675_s3 + $0x1a8] sm:$0xff] }
 0x21a   :  { %v3321_v37 = vpop.f32.mrf.mxu1 }
 0x21b   :  { %v2860_v37 = vld [vmem:[%s5675_s3 + $0x128] sm:$0xff] }
 0x223   :  { %v3339_v35 = vpop.f32.mrf.mxu0 }
 0x225   :  { %v3340_v8 = vpop.f32.mrf.mxu0 }
 0x226   :  { %v3341_v44 = vadd.f32 %v3340_v8, %v3339_v35  ;;  %v2875_v35 = vld [vmem:[%s5675_s3 + $0x1a0] sm:$0xff] }
 0x227   :  { %v3342_v5 = vpop.f32.mrf.mxu0  ;;  %v2859_v8 = vld [vmem:[%s5675_s3 + $0x120] sm:$0xff] }
 0x228   :  { %v1967_v46 = vadd.f32 %v3341_v44, %v3319_v28  ;;  %v2861_v28 = vld [vmem:[%s5675_s3 + $0x130] sm:$0xff]  ;;  %v2874_v5 = vld [vmem:[%s5675_s3 + $0x198] sm:$0xff] }
 0x229   :  { %v3343_v1 = vpop.f32.mrf.mxu0 }
 0x22a   :  { %v2858_v1 = vld [vmem:[%s5675_s3 + $0x118] sm:$0xff] }
 0x234   :  { %v3361_v9 = vpop.f32.mrf.mxu1 }
 0x236   :  { %v3362_v7 = vpop.f32.mrf.mxu1 }
 0x237   :  { %v3363_v45 = vadd.f32 %v3362_v7, %v3361_v9  ;;  %v2873_v9 = vld [vmem:[%s5675_s3 + $0x190] sm:$0xff] }
 0x238   :  { %v3364_v36 = vpop.f32.mrf.mxu1  ;;  %v2857_v7 = vld [vmem:[%s5675_s3 + $0x110] sm:$0xff] }
 0x239   :  { %v2007_v49 = vadd.f32 %v3363_v45, %v1967_v46  ;;  %v2872_v36 = vld [vmem:[%s5675_s3 + $0x188] sm:$0xff] }
 0x23a   :  { %v3365_v11 = vpop.f32.mrf.mxu1 }
 0x23b   :  { %v2856_v11 = vld [vmem:[%s5675_s3 + $0x108] sm:$0xff] }
 0x243   :  { %v3383_v63 = vpop.f32.mrf.mxu0 }
 0x245   :  { %v3384_v57 = vpop.f32.mrf.mxu0 }
 0x246   :  { %v3385_v47 = vadd.f32 %v3384_v57, %v3383_v63  ;;  %v2871_v63 = vld [vmem:[%s5675_s3 + $0x180] sm:$0xff] }
 0x247   :  { %v3386_v30 = vpop.f32.mrf.mxu0 }
 0x248   :  { %v2047_v52 = vadd.f32 %v3385_v47, %v2007_v49  ;;  %v2855_v30 = vld [vmem:[%s5675_s3 + $0x100] sm:$0xff] }
 0x249   :  { %v3387_v31 = vpop.f32.mrf.mxu0 }
 0x254   :  { %v3405_v38 = vpop.f32.mrf.mxu1 }
 0x256   :  { %v3406_v40 = vpop.f32.mrf.mxu1 }
 0x257   :  { %v3407_v50 = vadd.f32 %v3406_v40, %v3405_v38  ;;  %v2552_v38 = vld [vmem:[%s5677_s5 + $0x18] sm:$0xff]  ;;  %v2551_v40 = vld [vmem:[%s5677_s5 + $0x10] sm:$0xff] }
 0x258   :  { %v3408_v41 = vpop.f32.mrf.mxu1 }
 0x259   :  { %v2087_v56 = vadd.f32 %v3407_v50, %v2047_v52  ;;  %v2550_v41 = vld [vmem:[%s5677_s5 + $0x8] sm:$0xff] }
 0x25a   :  { %v3409_v42 = vpop.f32.mrf.mxu1 }
 0x25b   :  { %v2549_v42 = vld [vmem:[%s5677_s5] sm:$0xff] }
 0x263   :  { %v3427_v51 = vpop.f32.mrf.mxu0 }
 0x264   :  { %v2166_v54 = vpop.f32.mrf.mxu1 }
 0x265   :  { %v3428_v6 = vpop.f32.mrf.mxu0 }
 0x266   :  { %v3429_v58 = vadd.f32 %v3428_v6, %v3427_v51  ;;  %v3557_v3 = vpop.f32.mrf.mxu1  ;;  %v2887_v6 = vld [vmem:[%s5676_s4] ss:$0 sm:$0xff]  ;;  %s3987_s4 = smov [#allocation2]  }
 0x267   :  { %v3430_v60 = vpop.f32.mrf.mxu0  ;;  %s2653_s18 = sshll.u32 %s3987_s4, 4  ;;  %s2654_s18 = int_to_ptr.vmem [resolvable:$true] %s2653_s18 }
 0x268   :  { %v2127_v62 = vadd.f32 %v3429_v58, %v2087_v56  ;;  %v2169_v32 = vpop.f32.mrf.mxu1  ;;  %v2888_v60 = vld [vmem:[%s5678_s6] ss:$0 sm:$0xff]  ;;  %s3963_s6 = scalar_lea.vmem %s2654_s18, 32  ;;  %p3968_p1 = scmp.lt.s32.totalorder %s2654_s18, %s2654_s18 }
 0x269   :  { %v3431_v34 = vpop.f32.mrf.mxu0  ;;  %p3964_p0 = scmp.ne.s32.totalorder %s2654_s18, %s3963_s6  ;;  %p3969_p2 = scmp.lt.s32.totalorder %s3963_s6, %s3963_s6 }
 0x26a   :  { %v2167_v0 = vadd.f32 %v2166_v54, %v2127_v62  ;;  %v3558_v29 = vpop.f32.mrf.mxu1 }
 0x26b   :  { %p3970_p3 = por %p3969_p2, %p3968_p1 }
 0x26c   :  { %v2173_v12 = vmax.f32 %v1831_v23, %v2167_v0  ;;  %v2864_v23 = vld [vmem:[%s5675_s3 + $0x148] sm:$0xff] }
 0x26d   :  { %p3971_p4 = pnand %p3970_p3, %p3964_p0 }
 0x26e   :  { %v2174_v15 = vmax.f32 %v2172_v2, %v2173_v12  ;;  %v2884_v2 = vld [vmem:[%s5675_s3 + $0x1e8] sm:$0xff] }
 0x270   :  { %v2182_v16 = vadd.f32 %v2838_v53, %v2174_v15 }
 0x272   :  { %v5506_v39 = vmax.f32 %v2182_v16, 0.0 }
 0x274   :  { %3627 = vmatmul.mubr.f32.vlgmr.msra.gmra.mxu1 %v5506_v39  ;;  %v2218_v17 = vrot.slane %v5506_v39, 2  ;;  %v2467_v57 = vrot.slane %v5506_v39, 6  ;;  %v2377_v31 = vrot.slane %v5506_v39, 4 }
 0x275   :  { %3665 = vmatpush3.msra.mxu1 %v2886_v33  ;;  %3696 = vmatprep.mubr.msk.f32.mxu1 %vm3986_vm0, %v5922_v13 }
 0x276   :  { %3666 = vmatprep.subr.mxu1 %v5922_v13  ;;  %3592 = vmatmul.mubr.f32.vlgmr.msra.gmra.mxu0 %v2218_v17 }
 0x277   :  { %3630 = vmatpush3.msra.mxu0 %v2870_v18  ;;  %3667 = vmatpush3.msra.mxu1 %v2885_v55 }
 0x278   :  { %3631 = vmatprep.subr.mxu0 %v5922_v13  ;;  %3668 = vmatprep.subr.mxu1 %v5922_v13 }
 0x279   :  { %3632 = vmatpush3.msra.mxu0 %v2869_v14  ;;  %3669 = vmatpush3.msra.mxu1 %v2884_v2 }
 0x27a   :  { %3633 = vmatprep.subr.mxu0 %v5922_v13  ;;  %3670 = vmatprep.subr.mxu1 %v5922_v13 }
 0x27b   :  { %3634 = vmatpush3.msra.mxu0 %v2868_v43  ;;  %3671 = vmatpush3.msra.mxu1 %v2883_v4 }
 0x27c   :  { %3635 = vmatprep.subr.mxu0 %v5922_v13  ;;  %3672 = vmatprep.subr.mxu1 %v5922_v13 }
 0x27d   :  { %3636 = vmatpush3.msra.mxu0 %v2867_v10  ;;  %3673 = vmatpush3.msra.mxu1 %v2882_v19 }
 0x27e   :  { %3637 = vmatprep.subr.mxu0 %v5922_v13  ;;  %3674 = vmatprep.subr.mxu1 %v5922_v13 }
 0x27f   :  { %3638 = vmatpush3.msra.mxu0 %v2866_v20  ;;  %3675 = vmatpush3.msra.mxu1 %v2881_v21 }
 0x280   :  { %3639 = vmatprep.subr.mxu0 %v5922_v13  ;;  %3676 = vmatprep.subr.mxu1 %v5922_v13 }
 0x281   :  { %3640 = vmatpush3.msra.mxu0 %v2865_v48  ;;  %3677 = vmatpush3.msra.mxu1 %v2880_v22 }
 0x282   :  { %3641 = vmatprep.subr.mxu0 %v5922_v13  ;;  %3678 = vmatprep.subr.mxu1 %v5922_v13 }
 0x283   :  { %3642 = vmatpush3.msra.mxu0 %v2864_v23  ;;  %3679 = vmatpush3.msra.mxu1 %v2879_v24 }
 0x284   :  { %3643 = vmatprep.subr.mxu0 %v5922_v13  ;;  %3680 = vmatprep.subr.mxu1 %v5922_v13 }
 0x285   :  { %3644 = vmatpush3.msra.mxu0 %v2863_v25  ;;  %3681 = vmatpush3.msra.mxu1 %v2878_v26 }
 0x286   :  { %3645 = vmatprep.subr.mxu0 %v5922_v13  ;;  %3682 = vmatprep.subr.mxu1 %v5922_v13 }
 0x287   :  { %3646 = vmatpush3.msra.mxu0 %v2862_v59  ;;  %3683 = vmatpush3.msra.mxu1 %v2877_v27 }
 0x288   :  { %3647 = vmatprep.subr.mxu0 %v5922_v13  ;;  %3684 = vmatprep.subr.mxu1 %v5922_v13 }
 0x289   :  { %3648 = vmatpush3.msra.mxu0 %v2861_v28  ;;  %3685 = vmatpush3.msra.mxu1 %v2876_v61 }
 0x28a   :  { %3649 = vmatprep.subr.mxu0 %v5922_v13  ;;  %3686 = vmatprep.subr.mxu1 %v5922_v13 }
 0x28b   :  { %3650 = vmatpush3.msra.mxu0 %v2860_v37  ;;  %3687 = vmatpush3.msra.mxu1 %v2875_v35 }
 0x28c   :  { %3651 = vmatprep.subr.mxu0 %v5922_v13  ;;  %3688 = vmatprep.subr.mxu1 %v5922_v13 }
 0x28d   :  { %3652 = vmatpush3.msra.mxu0 %v2859_v8  ;;  %3689 = vmatpush3.msra.mxu1 %v2874_v5 }
 0x28e   :  { %3653 = vmatprep.subr.mxu0 %v5922_v13  ;;  %3690 = vmatprep.subr.mxu1 %v5922_v13 }
 0x28f   :  { %3654 = vmatpush3.msra.mxu0 %v2858_v1  ;;  %3691 = vmatpush3.msra.mxu1 %v2873_v9 }
 0x290   :  { %3655 = vmatprep.subr.mxu0 %v5922_v13  ;;  %3692 = vmatprep.subr.mxu1 %v5922_v13 }
 0x291   :  { %3656 = vmatpush3.msra.mxu0 %v2857_v7  ;;  %3693 = vmatpush3.msra.mxu1 %v2872_v36 }
 0x292   :  { %3657 = vmatprep.subr.mxu0 %v5922_v13  ;;  %3694 = vmatprep.subr.mxu1 %v5922_v13 }
 0x293   :  { %3658 = vmatpush3.msra.mxu0 %v2856_v11  ;;  %3695 = vmatpush3.msra.mxu1 %v2871_v63 }
 0x294   :  { %3659 = vmatprep.subr.mxu0 %v5922_v13  ;;  %3697 = vmatmul.mubr.f32.vlgmr.msra.gmra.mxu1 %v2467_v57 }
 0x295   :  { %3660 = vmatpush3.msra.mxu0 %v2855_v30  ;;  %3661 = vmatprep.mubr.msk.f32.mxu0 %vm3986_vm0, %v5922_v13 }
 0x296   :  { %3662 = vmatmul.mubr.f32.vlgmr.msra.gmra.mxu0 %v2377_v31  ;;  %3699 = vmatprep.subr.mxu0 %v5922_v13 }
 0x297   :  { %3707 = vmatprep.mubr.msk.f32.mxu0 %vm3986_vm0, %v5922_v13  ;;  %3700 = vmatpush3.msra.mxu0 %v2552_v38 }
 0x298   :  { %3701 = vmatprep.subr.mxu0 %v5922_v13 }
 0x299   :  { %3702 = vmatpush3.msra.mxu0 %v2551_v40 }
 0x29a   :  { %3703 = vmatprep.subr.mxu0 %v5922_v13 }
 0x29b   :  { %3704 = vmatpush3.msra.mxu0 %v2550_v41 }
 0x29c   :  { %3705 = vmatprep.subr.mxu0 %v5922_v13 }
 0x29d   :  { %3706 = vmatpush3.msra.mxu0 %v2549_v42 }
 0x334   :  { %v2356_v44 = vpop.f32.mrf.mxu1 }
 0x336   :  { %v2286_v45 = vpop.f32.mrf.mxu0  ;;  %v3628_v46 = vpop.f32.mrf.mxu1 }
 0x337   :  { %v2357_v50 = vadd.f32 %v2356_v44, %v2286_v45 }
 0x338   :  { %v3593_v47 = vpop.f32.mrf.mxu0 }
 0x354   :  { %v2535_v49 = vpop.f32.mrf.mxu1 }
 0x356   :  { %v2445_v51 = vpop.f32.mrf.mxu0  ;;  %v3698_v52 = vpop.f32.mrf.mxu1 }
 0x357   :  { %v2449_v54 = vadd.f32 %v2445_v51, %v2357_v50 }
 0x358   :  { %v3663_v56 = vpop.f32.mrf.mxu0 }
 0x359   :  { %v2539_v13 = vadd.f32 %v2535_v49, %v2449_v54 }
 0x35b   :  { %v2547_v58 = vadd.f32 %v2887_v6, %v2539_v13 }
 0x35d   :  { %v2548_v3 = vmax.f32 %v2547_v58, 0.0 }
 0x35f   :  { %3708 = vmatmul.mubr.msk.f32.vlgmr.msra.gmra.mxu0 %vm2560_vm2, %v2548_v3 }
 0x41f   :  { %v2630_v62 = vpop.f32.mrf.mxu0 }
 0x420   :  { %v2631_v32 = vadd.f32 %v2888_v60, %v2630_v62 }
 0x421   :  { %v3709_v34 = vpop.f32.mrf.mxu0 }
 0x422   :  { %v2635_v0 = vsel %vm2634_vm3, %v2631_v32, -inf }
 0x423   :  { %2636 = vmax.xlane.f32.xlu0 %v2635_v0 }
 0x4ac   :  { %v2637_v29 = vpop.xlane.xlu0 %2636 }
 0x4ad   :  { %v2638_v12 = vsub.f32 %v2631_v32, %v2637_v29 }
 0x4af   :  { %v2639_v53 = vmul.f32 1.442695, %v2638_v12 }
 0x4b1   :  { %3865 = vpow2.f32 %v2639_v53 }
 0x4be   :  { %v3866_v15 = vpop.eup %3865 }
 0x4bf   :  { %v2641_v16 = vsel %vm2634_vm3, %v3866_v15, 0.0 }
 0x4c0   :  { %2642 = vadd.xlane.f32.xlu0 %v2641_v16 }
 0x549   :  { %v2643_v39 = vpop.xlane.xlu0 %2642 }
 0x54a   :  { %3867 = vrcp.f32 %v2643_v39 }
 0x557   :  { %v3868_v33 = vpop.eup %3867 }
 0x558   :  { %v2645_v17 = vmul.f32 %v3868_v33, %v3866_v15 }
 0x55a   :  { %2646 = vst.msk [vmem:[#allocation2] sm:$0x3] %vm2634_vm3, %v2645_v17 }
 0x55b   :  { %3974 = shalt.err (!%p3971_p4)
}
 0x55c   :  { %2656 = dma.vmem_to_hbm [thread:$0]  %s2654_s18, 32, %s5679_s7, [#allocation3]  }
 0x55d   :  { %3983 = dma.done.wait [#allocation3], 32  }
 0x55e   :  { %3984 = vsyncadd [#allocation3], 4294967264 }
 0x55f   :  { %2660 = vsyncpa [#allocation3], 1 }

</bundles_post_ra>
